<compile_context>
chip_gen: v6e
topology: v6e:2x2x1
jax: 0.10.0
libtpu: 0.0.40
codegen_flags: <defaults>
</compile_context>

<pallas_src>
import functools

import jax
import jax.numpy as jnp
from jax.experimental import pallas as pl
from jax.experimental.pallas import tpu as pltpu

# ------------------------- model hyper-parameters (opt / config) -------------
B = 2             # batch size
T = 16            # opt.maxlen
H = 32            # opt.rnn_hidden_size
EMB = 16          # opt.encoder_emb_size
POS_EMB = 8       # opt.pos_emb_size
TT_EMB = 8        # opt.token_type_emb_size
D_IN = 2 * EMB + POS_EMB + TT_EMB     # rnn_input_size = 48
NODE_EMB = 32     # opt.node_emb_size
WORD_N = 50       # config.word_number
LEMMA_N = 40      # config.lemma_number
POS_N = 10        # config.pos_number
NUM_LAYERS = 1    # opt.num_layers
N_NODES = B * T


# ------------------------------ fused Pallas kernel ---------------------------
def _encoder_kernel(xcat_ref, mask2_ref, wih_ref, whh_ref, bih_ref, bhh_ref,
                    adj_ref, selh_ref, selt_ref, amask_ref, temb_ref,
                    g0w_ref, g1w_ref, tlw_ref, tlb_ref, rlw_ref, rlb_ref,
                    out_ref, hid_ref, tgt_ref, span_ref,
                    gi_sc, outs_f, outs_b):
    h2, h4, h6 = 2 * H, 4 * H, 6 * H

    # ---- merged bidirectional GRU (one recurrence carries both directions) --
    # Hoisted input projection: [T*B, 2*D_IN] @ [2*D_IN, 6H] (+ input bias).
    gi_all = (jnp.dot(xcat_ref[...], wih_ref[...],
                      preferred_element_type=jnp.float32) + bih_ref[...])
    gi_sc[...] = gi_all                      # park in VMEM -> bounded vreg use

    whh = whh_ref[...]                       # [2H, 6H] block-diagonal (fwd/bwd)
    bhh = bhh_ref[...]                       # [1, 6H]

    h = jnp.zeros((B, h2), dtype=jnp.float32)          # lanes: [h_fwd | h_bwd]
    for i in range(T):                                  # fully unrolled, T=16
        gi = gi_sc[i * B:(i + 1) * B, :]                # [B, 6H] static rows
        m = mask2_ref[i * B:(i + 1) * B, :]             # [B, 2H] fwd|bwd masks
        gh = jnp.dot(h, whh, preferred_element_type=jnp.float32) + bhh
        # PyTorch GRU gate order (r, z, n); lanes [r_f r_b | z_f z_b | n_f n_b]
        r = jax.nn.sigmoid(gi[:, 0:h2] + gh[:, 0:h2])
        z = jax.nn.sigmoid(gi[:, h2:h4] + gh[:, h2:h4])
        n = jnp.tanh(gi[:, h4:h6] + r * gh[:, h4:h6])
        h_new = (1.0 - z) * n + z * h
        # packed-sequence semantics: hold state past sequence end, emit zeros
        h = m * h_new + (1.0 - m) * h
        mh = m * h
        # per-step stores at static node rows: fwd -> b*T+i, bwd -> b*T+(T-1-i)
        for b in range(B):
            rf = b * T + i
            rb = b * T + (T - 1 - i)
            outs_f[rf:rf + 1, :] = mh[b:b + 1, 0:H]
            outs_b[rb:rb + 1, :] = mh[b:b + 1, H:h2]

    # ---- post chain: GCN x2 + residual, selects, attention, linears ---------
    x_nodes = jnp.concatenate([outs_f[...], outs_b[...]], axis=-1)   # [N, 2H]
    adj = adj_ref[...]
    xl0 = jnp.dot(x_nodes, g0w_ref[...], preferred_element_type=jnp.float32)
    g0 = jnp.maximum(jnp.dot(adj, xl0, preferred_element_type=jnp.float32), 0.0)
    xl1 = jnp.dot(g0, g1w_ref[...], preferred_element_type=jnp.float32)
    g1 = jnp.maximum(jnp.dot(adj, xl1, preferred_element_type=jnp.float32), 0.0)
    res = x_nodes + g1                                               # [N, 2H]

    # batched_index_select as one-hot matmuls (no dynamic indexing)
    head = jnp.dot(selh_ref[...], res, preferred_element_type=jnp.float32)
    tail = jnp.dot(selt_ref[...], res, preferred_element_type=jnp.float32)
    ts0 = (head + tail) * 0.5
    target_state = (jnp.dot(ts0, tlw_ref[...],
                            preferred_element_type=jnp.float32) + tlb_ref[...])

    # masked-softmax attention over the sequence dimension
    res3 = res.reshape(B, T, h2)                                     # [B, T, 2H]
    scores = jnp.sum(res3 * target_state[:, None, :], axis=-1)       # [B, T]
    scores = jnp.where(amask_ref[...] > 0.0, scores, -1e30)
    mmax = jnp.max(scores, axis=-1, keepdims=True)
    e = jnp.exp(scores - mmax)
    p = e * pl.reciprocal(jnp.sum(e, axis=-1, keepdims=True), approx=True)
    att = jnp.sum(res3 * p[:, :, None], axis=1)                      # [B, 2H]

    # relu_linear with row-split weights (avoids the lane-axis concat)
    tgt = (jnp.dot(target_state, rlw_ref[0:h2, :],
                   preferred_element_type=jnp.float32)
           + jnp.dot(att, rlw_ref[h2:h4, :],
                     preferred_element_type=jnp.float32)
           + jnp.dot(temb_ref[...], rlw_ref[h4:, :],
                     preferred_element_type=jnp.float32)
           + rlb_ref[...])

    out_ref[...] = res3
    hid_ref[0] = (h[:, 0:H] + h[:, H:h2]) * (1.0 / (2.0 * NUM_LAYERS))
    tgt_ref[...] = jnp.maximum(tgt, 0.0)          # Dropout(0.4) == id in eval
    span_ref[...] = jnp.concatenate([head + tail, head - tail], axis=-1)


# ------------------------------ kernel wrapper --------------------------------
def encoder_pallas(x_cat, mask2, wih, whh, bih, bhh, adj, selh, selt, amask,
                   temb, g0w, g1w, tlw, tlb, rlw, rlb):
    return pl.pallas_call(
        _encoder_kernel,
        out_shape=(jax.ShapeDtypeStruct((B, T, 2 * H), jnp.float32),
                   jax.ShapeDtypeStruct((1, B, H), jnp.float32),
                   jax.ShapeDtypeStruct((B, NODE_EMB), jnp.float32),
                   jax.ShapeDtypeStruct((B, 4 * H), jnp.float32)),
        scratch_shapes=[pltpu.VMEM((T * B, 6 * H), jnp.float32),   # gate pre-acts
                        pltpu.VMEM((N_NODES, H), jnp.float32),     # fwd outputs
                        pltpu.VMEM((N_NODES, H), jnp.float32)],    # bwd outputs
    )(x_cat, mask2, wih, whh, bih, bhh, adj, selh, selt, amask, temb,
      g0w, g1w, tlw, tlb, rlw, rlb)


# ------------------------------ glue (plain JAX) ------------------------------
def encoder_forward(params, word_input, lemma_input, pos_input, lengths,
                    frame_idx, dep_A, token_type_ids, attention_mask):
    bsz, seqlen = word_input.shape

    # embeddings (embed_dropout == identity in eval mode)
    we = params["word_emb"][word_input]
    le = params["lemma_emb"][lemma_input]
    pe = params["pos_emb"][pos_input]
    te = params["tt_emb"][token_type_ids]
    embedded = jnp.concatenate([we, le, pe, te], axis=-1)        # [B, T, D_IN]

    # length mask replaces pack/sort/unsort machinery (mathematically identical)
    step_mask = (jnp.arange(seqlen)[None, :] < lengths[:, None]).astype(jnp.float32)

    # layout plumbing for the fused kernel: time-major, fwd || time-reversed,
    # row-flattened so the kernel only does static leading-row slices.
    emb_t = jnp.transpose(embedded, (1, 0, 2))                   # [T, B, D_IN]
    x_cat = jnp.concatenate([emb_t, emb_t[::-1]], axis=-1)       # [T, B, 2*D_IN]
    x_cat = x_cat.reshape(seqlen * bsz, 2 * D_IN)
    mask_t = step_mask.T                                         # [T, B]
    mask2 = jnp.concatenate(
        [jnp.broadcast_to(mask_t[:, :, None], (seqlen, bsz, H)),
         jnp.broadcast_to(mask_t[::-1][:, :, None], (seqlen, bsz, H))],
        axis=-1).reshape(seqlen * bsz, 2 * H)                    # [T*B, 2H]

    # one-hot node selectors over flattened (b-major) nodes: node = b*T + idx
    base = jnp.arange(bsz, dtype=jnp.int32) * seqlen
    sel_head = jax.nn.one_hot(base + frame_idx[0], bsz * seqlen, dtype=jnp.float32)
    sel_tail = jax.nn.one_hot(base + frame_idx[1], bsz * seqlen, dtype=jnp.float32)

    # target embedding (head/tail average of the concatenated embeddings)
    emb_flat = embedded.reshape(bsz * seqlen, D_IN)
    target_emb = 0.5 * (sel_head @ emb_flat + sel_tail @ emb_flat)   # [B, D_IN]

    return encoder_pallas(
        x_cat, mask2, params["wih_blk"], params["whh_blk"],
        params["bih_cat"], params["bhh_cat"],
        dep_A, sel_head, sel_tail, attention_mask.astype(jnp.float32),
        target_emb, params["gcn0_w"], params["gcn1_w"],
        params["tl_w"], params["tl_b"], params["rl_w"], params["rl_b"])


# ------------------------------ parameters ------------------------------------
def _pack_bigru(wih_f, whh_f, bih_f, bhh_f, wih_b, whh_b, bih_b, bhh_b):
    """Pack per-direction PyTorch-layout GRU weights into the merged block form.

    Gate-column layout (6H): [r_f r_b | z_f z_b | n_f n_b].
    wih rows: [0:D_IN] multiply x(t) (fwd), [D_IN:2*D_IN] multiply x(T-1-t) (bwd).
    whh rows: [0:H] = h_fwd, [H:2H] = h_bwd (block diagonal).
    """
    wih_blk = jnp.zeros((2 * D_IN, 6 * H), jnp.float32)
    whh_blk = jnp.zeros((2 * H, 6 * H), jnp.float32)
    bih_cat = jnp.zeros((1, 6 * H), jnp.float32)
    bhh_cat = jnp.zeros((1, 6 * H), jnp.float32)
    for g in range(3):                          # PyTorch gate order: r, z, n
        rows = slice(g * H, (g + 1) * H)
        cf = slice(2 * g * H, (2 * g + 1) * H)
        cb = slice((2 * g + 1) * H, (2 * g + 2) * H)
        wih_blk = wih_blk.at[0:D_IN, cf].set(wih_f[rows].T)
        wih_blk = wih_blk.at[D_IN:, cb].set(wih_b[rows].T)
        whh_blk = whh_blk.at[0:H, cf].set(whh_f[rows].T)
        whh_blk = whh_blk.at[H:, cb].set(whh_b[rows].T)
        bih_cat = bih_cat.at[0, cf].set(bih_f[rows])
        bih_cat = bih_cat.at[0, cb].set(bih_b[rows])
        bhh_cat = bhh_cat.at[0, cf].set(bhh_f[rows])
        bhh_cat = bhh_cat.at[0, cb].set(bhh_b[rows])
    return wih_blk, whh_blk, bih_cat, bhh_cat


def init_params(key):
    ks = jax.random.split(key, 18)

    def n(k, shape, scale=0.1):
        return (scale * jax.random.normal(k, shape)).astype(jnp.float32)

    # per-direction GRU weights in PyTorch layout, then packed for the kernel
    wih_f = n(ks[4], (3 * H, D_IN)); whh_f = n(ks[5], (3 * H, H))
    bih_f = n(ks[6], (3 * H,));      bhh_f = n(ks[7], (3 * H,))
    wih_b = n(ks[8], (3 * H, D_IN)); whh_b = n(ks[9], (3 * H, H))
    bih_b = n(ks[10], (3 * H,));     bhh_b = n(ks[11], (3 * H,))
    wih_blk, whh_blk, bih_cat, bhh_cat = _pack_bigru(
        wih_f, whh_f, bih_f, bhh_f, wih_b, whh_b, bih_b, bhh_b)

    return dict(
        word_emb=n(ks[0], (WORD_N, EMB)),
        lemma_emb=n(ks[1], (LEMMA_N, EMB)),
        pos_emb=n(ks[2], (POS_N, POS_EMB)),
        tt_emb=n(ks[3], (2, TT_EMB)),
        wih_blk=wih_blk, whh_blk=whh_blk, bih_cat=bih_cat, bhh_cat=bhh_cat,
        # target_linear: Linear(2H, 2H)   (pre-transposed to [in, out])
        tl_w=n(ks[12], (2 * H, 2 * H)), tl_b=n(ks[13], (1, 2 * H)),
        # relu_linear: Linear(4H + D_IN, NODE_EMB)
        rl_w=n(ks[14], (4 * H + D_IN, NODE_EMB)), rl_b=n(ks[15], (1, NODE_EMB)),
        # GCN linear layers (no bias)
        gcn0_w=n(ks[16], (2 * H, 2 * H)),
        gcn1_w=n(ks[17], (2 * H, 2 * H)),
    )


# ---------------------------------- main ---------------------------------------
if __name__ == "__main__":
    key = jax.random.PRNGKey(0)
    kparam, kw, kl, kp, ka = jax.random.split(key, 5)

    params = init_params(kparam)

    word_input = jax.random.randint(kw, (B, T), 0, WORD_N, dtype=jnp.int32)
    lemma_input = jax.random.randint(kl, (B, T), 0, LEMMA_N, dtype=jnp.int32)
    pos_input = jax.random.randint(kp, (B, T), 0, POS_N, dtype=jnp.int32)
    lengths = jnp.array([T, 12], dtype=jnp.int32)
    token_type_ids = (jnp.arange(T)[None, :] >= (lengths // 2)[:, None]).astype(jnp.int32)
    attention_mask = (jnp.arange(T)[None, :] < lengths[:, None]).astype(jnp.int32)
    frame_idx = (jnp.array([2, 3], dtype=jnp.int32),
                 jnp.array([4, 5], dtype=jnp.int32))

    # dense row-normalized adjacency over B*T nodes (stand-in for sparse dep_A)
    adj = (jax.random.uniform(ka, (N_NODES, N_NODES)) < 0.1).astype(jnp.float32)
    adj = adj + jnp.eye(N_NODES, dtype=jnp.float32)
    adj = adj / jnp.sum(adj, axis=1, keepdims=True)

    fwd = jax.jit(functools.partial(encoder_forward, params))
    output, hidden, target, target_span = fwd(
        word_input, lemma_input, pos_input, lengths,
        frame_idx, adj, token_type_ids, attention_mask)
    jax.block_until_ready((output, hidden, target, target_span))

    assert output.shape == (B, T, 2 * H)
    assert hidden.shape == (1, B, H)
    assert target.shape == (B, NODE_EMB)
    assert target_span.shape == (B, 4 * H)
    assert bool(jnp.all(jnp.isfinite(output)))
    assert bool(jnp.all(jnp.isfinite(hidden)))
    assert bool(jnp.all(jnp.isfinite(target)))
    assert bool(jnp.all(jnp.isfinite(target_span)))
    print("KERNEL_OK")
</pallas_src>

<mosaic_0001>
module attributes {stable_mosaic.version = 11 : i64} {
  func.func @_encoder_kernel(%arg0: memref<32x96xf32, #tpu.memory_space<vmem>>, %arg1: memref<32x64xf32, #tpu.memory_space<vmem>>, %arg2: memref<96x192xf32, #tpu.memory_space<vmem>>, %arg3: memref<64x192xf32, #tpu.memory_space<vmem>>, %arg4: memref<1x192xf32, #tpu.memory_space<vmem>>, %arg5: memref<1x192xf32, #tpu.memory_space<vmem>>, %arg6: memref<32x32xf32, #tpu.memory_space<vmem>>, %arg7: memref<2x32xf32, #tpu.memory_space<vmem>>, %arg8: memref<2x32xf32, #tpu.memory_space<vmem>>, %arg9: memref<2x16xf32, #tpu.memory_space<vmem>>, %arg10: memref<2x48xf32, #tpu.memory_space<vmem>>, %arg11: memref<64x64xf32, #tpu.memory_space<vmem>>, %arg12: memref<64x64xf32, #tpu.memory_space<vmem>>, %arg13: memref<64x64xf32, #tpu.memory_space<vmem>>, %arg14: memref<1x64xf32, #tpu.memory_space<vmem>>, %arg15: memref<176x32xf32, #tpu.memory_space<vmem>>, %arg16: memref<1x32xf32, #tpu.memory_space<vmem>>, %arg17: memref<2x16x64xf32, #tpu.memory_space<vmem>>, %arg18: memref<1x2x32xf32, #tpu.memory_space<vmem>>, %arg19: memref<2x32xf32, #tpu.memory_space<vmem>>, %arg20: memref<2x128xf32, #tpu.memory_space<vmem>>, %arg21: memref<32x192xf32, #tpu.memory_space<vmem>>, %arg22: memref<32x32xf32, #tpu.memory_space<vmem>>, %arg23: memref<32x32xf32, #tpu.memory_space<vmem>>) attributes {dimension_semantics = [], scalar_prefetch = 0 : i64, scratch_operands = 3 : i64, tpu.core_type = #tpu.core_type<tc>} {
    %c0 = arith.constant 0 : index
    %c0_0 = arith.constant 0 : index
    %0 = vector.load %arg0[%c0, %c0_0] : memref<32x96xf32, #tpu.memory_space<vmem>>, vector<32x96xf32>
    %c0_1 = arith.constant 0 : index
    %c0_2 = arith.constant 0 : index
    %1 = vector.load %arg2[%c0_1, %c0_2] : memref<96x192xf32, #tpu.memory_space<vmem>>, vector<96x192xf32>
    %cst = arith.constant dense<0.000000e+00> : vector<32x192xf32>
    %2 = tpu.matmul %0, %1, %cst {dimension_numbers = #tpu.dot_dimension_numbers<[1], [0], [0], [1], [0, 0, 1, 1], [], []>} : vector<32x96xf32>, vector<96x192xf32>, vector<32x192xf32> -> vector<32x192xf32>
    %c0_3 = arith.constant 0 : index
    %c0_4 = arith.constant 0 : index
    %3 = vector.load %arg4[%c0_3, %c0_4] : memref<1x192xf32, #tpu.memory_space<vmem>>, vector<1x192xf32>
    %4 = vector.broadcast %3 : vector<1x192xf32> to vector<32x192xf32>
    %5 = arith.addf %2, %4 : vector<32x192xf32>
    %c0_5 = arith.constant 0 : index
    %c0_6 = arith.constant 0 : index
    %6 = vector.load %arg21[%c0_5, %c0_6] : memref<32x192xf32, #tpu.memory_space<vmem>>, vector<32x192xf32>
    tpu.vector_store %arg21[%c0_5, %c0_6], %5 {strides = array<i32>} : memref<32x192xf32, #tpu.memory_space<vmem>>, vector<32x192xf32>,
    %c0_7 = arith.constant 0 : index
    %c0_8 = arith.constant 0 : index
    %7 = vector.load %arg3[%c0_7, %c0_8] : memref<64x192xf32, #tpu.memory_space<vmem>>, vector<64x192xf32>
    %c0_9 = arith.constant 0 : index
    %c0_10 = arith.constant 0 : index
    %8 = vector.load %arg5[%c0_9, %c0_10] : memref<1x192xf32, #tpu.memory_space<vmem>>, vector<1x192xf32>
    %cst_11 = arith.constant 0.000000e+00 : f32
    %9 = vector.broadcast %cst_11 : f32 to vector<2x64xf32>
    %c0_12 = arith.constant 0 : index
    %c0_13 = arith.constant 0 : index
    %10 = vector.load %arg21[%c0_12, %c0_13] : memref<32x192xf32, #tpu.memory_space<vmem>>, vector<2x192xf32>
    %c0_14 = arith.constant 0 : index
    %c0_15 = arith.constant 0 : index
    %11 = vector.load %arg1[%c0_14, %c0_15] : memref<32x64xf32, #tpu.memory_space<vmem>>, vector<2x64xf32>
    %cst_16 = arith.constant dense<0.000000e+00> : vector<2x192xf32>
    %12 = tpu.matmul %9, %7, %cst_16 {dimension_numbers = #tpu.dot_dimension_numbers<[1], [0], [0], [1], [0, 0, 1, 1], [], []>} : vector<2x64xf32>, vector<64x192xf32>, vector<2x192xf32> -> vector<2x192xf32>
    %13 = vector.broadcast %8 : vector<1x192xf32> to vector<2x192xf32>
    %14 = arith.addf %12, %13 : vector<2x192xf32>
    %15 = vector.extract_strided_slice %10 {offsets = [0, 0], sizes = [2, 64], strides = [1, 1]} : vector<2x192xf32> to vector<2x64xf32>
    %16 = vector.extract_strided_slice %14 {offsets = [0, 0], sizes = [2, 64], strides = [1, 1]} : vector<2x192xf32> to vector<2x64xf32>
    %17 = arith.addf %15, %16 : vector<2x64xf32>
    %18 = arith.negf %17 : vector<2x64xf32>
    %19 = math.exp %18 : vector<2x64xf32>
    %cst_17 = arith.constant 1.000000e+00 : f32
    %20 = vector.broadcast %cst_17 : f32 to vector<2x64xf32>
    %21 = arith.addf %20, %19 : vector<2x64xf32>
    %22 = arith.divf %20, %21 : vector<2x64xf32>
    %23 = vector.extract_strided_slice %10 {offsets = [0, 64], sizes = [2, 64], strides = [1, 1]} : vector<2x192xf32> to vector<2x64xf32>
    %24 = vector.extract_strided_slice %14 {offsets = [0, 64], sizes = [2, 64], strides = [1, 1]} : vector<2x192xf32> to vector<2x64xf32>
    %25 = arith.addf %23, %24 : vector<2x64xf32>
    %26 = arith.negf %25 : vector<2x64xf32>
    %27 = math.exp %26 : vector<2x64xf32>
    %cst_18 = arith.constant 1.000000e+00 : f32
    %28 = vector.broadcast %cst_18 : f32 to vector<2x64xf32>
    %29 = arith.addf %28, %27 : vector<2x64xf32>
    %30 = arith.divf %28, %29 : vector<2x64xf32>
    %31 = vector.extract_strided_slice %10 {offsets = [0, 128], sizes = [2, 64], strides = [1, 1]} : vector<2x192xf32> to vector<2x64xf32>
    %32 = vector.extract_strided_slice %14 {offsets = [0, 128], sizes = [2, 64], strides = [1, 1]} : vector<2x192xf32> to vector<2x64xf32>
    %33 = arith.mulf %22, %32 : vector<2x64xf32>
    %34 = arith.addf %31, %33 : vector<2x64xf32>
    %35 = math.tanh %34 : vector<2x64xf32>
    %cst_19 = arith.constant 1.000000e+00 : f32
    %36 = vector.broadcast %cst_19 : f32 to vector<2x64xf32>
    %37 = arith.subf %36, %30 : vector<2x64xf32>
    %38 = arith.mulf %37, %35 : vector<2x64xf32>
    %39 = arith.mulf %30, %9 : vector<2x64xf32>
    %40 = arith.addf %38, %39 : vector<2x64xf32>
    %41 = arith.mulf %11, %40 : vector<2x64xf32>
    %cst_20 = arith.constant 1.000000e+00 : f32
    %42 = vector.broadcast %cst_20 : f32 to vector<2x64xf32>
    %43 = arith.subf %42, %11 : vector<2x64xf32>
    %44 = arith.mulf %43, %9 : vector<2x64xf32>
    %45 = arith.addf %41, %44 : vector<2x64xf32>
    %46 = arith.mulf %11, %45 : vector<2x64xf32>
    %47 = vector.extract_strided_slice %46 {offsets = [0, 0], sizes = [1, 32], strides = [1, 1]} : vector<2x64xf32> to vector<1x32xf32>
    %c0_21 = arith.constant 0 : index
    %c0_22 = arith.constant 0 : index
    %48 = vector.load %arg22[%c0_21, %c0_22] : memref<32x32xf32, #tpu.memory_space<vmem>>, vector<1x32xf32>
    tpu.vector_store %arg22[%c0_21, %c0_22], %47 {strides = array<i32>} : memref<32x32xf32, #tpu.memory_space<vmem>>, vector<1x32xf32>,
    %49 = vector.extract_strided_slice %46 {offsets = [0, 32], sizes = [1, 32], strides = [1, 1]} : vector<2x64xf32> to vector<1x32xf32>
    %c15 = arith.constant 15 : index
    %c0_23 = arith.constant 0 : index
    %50 = vector.load %arg23[%c15, %c0_23] : memref<32x32xf32, #tpu.memory_space<vmem>>, vector<1x32xf32>
    tpu.vector_store %arg23[%c15, %c0_23], %49 {strides = array<i32>} : memref<32x32xf32, #tpu.memory_space<vmem>>, vector<1x32xf32>,
    %51 = vector.extract_strided_slice %46 {offsets = [1, 0], sizes = [1, 32], strides = [1, 1]} : vector<2x64xf32> to vector<1x32xf32>
    %c16 = arith.constant 16 : index
    %c0_24 = arith.constant 0 : index
    %52 = vector.load %arg22[%c16, %c0_24] : memref<32x32xf32, #tpu.memory_space<vmem>>, vector<1x32xf32>
    tpu.vector_store %arg22[%c16, %c0_24], %51 {strides = array<i32>} : memref<32x32xf32, #tpu.memory_space<vmem>>, vector<1x32xf32>,
    %53 = vector.extract_strided_slice %46 {offsets = [1, 32], sizes = [1, 32], strides = [1, 1]} : vector<2x64xf32> to vector<1x32xf32>
    %c31 = arith.constant 31 : index
    %c0_25 = arith.constant 0 : index
    %54 = vector.load %arg23[%c31, %c0_25] : memref<32x32xf32, #tpu.memory_space<vmem>>, vector<1x32xf32>
    tpu.vector_store %arg23[%c31, %c0_25], %53 {strides = array<i32>} : memref<32x32xf32, #tpu.memory_space<vmem>>, vector<1x32xf32>,
    %c2 = arith.constant 2 : index
    %c0_26 = arith.constant 0 : index
    %55 = vector.load %arg21[%c2, %c0_26] : memref<32x192xf32, #tpu.memory_space<vmem>>, vector<2x192xf32>
    %c2_27 = arith.constant 2 : index
    %c0_28 = arith.constant 0 : index
    %56 = vector.load %arg1[%c2_27, %c0_28] : memref<32x64xf32, #tpu.memory_space<vmem>>, vector<2x64xf32>
    %cst_29 = arith.constant dense<0.000000e+00> : vector<2x192xf32>
    %57 = tpu.matmul %45, %7, %cst_29 {dimension_numbers = #tpu.dot_dimension_numbers<[1], [0], [0], [1], [0, 0, 1, 1], [], []>} : vector<2x64xf32>, vector<64x192xf32>, vector<2x192xf32> -> vector<2x192xf32>
    %58 = vector.broadcast %8 : vector<1x192xf32> to vector<2x192xf32>
    %59 = arith.addf %57, %58 : vector<2x192xf32>
    %60 = vector.extract_strided_slice %55 {offsets = [0, 0], sizes = [2, 64], strides = [1, 1]} : vector<2x192xf32> to vector<2x64xf32>
    %61 = vector.extract_strided_slice %59 {offsets = [0, 0], sizes = [2, 64], strides = [1, 1]} : vector<2x192xf32> to vector<2x64xf32>
    %62 = arith.addf %60, %61 : vector<2x64xf32>
    %63 = arith.negf %62 : vector<2x64xf32>
    %64 = math.exp %63 : vector<2x64xf32>
    %cst_30 = arith.constant 1.000000e+00 : f32
    %65 = vector.broadcast %cst_30 : f32 to vector<2x64xf32>
    %66 = arith.addf %65, %64 : vector<2x64xf32>
    %67 = arith.divf %65, %66 : vector<2x64xf32>
    %68 = vector.extract_strided_slice %55 {offsets = [0, 64], sizes = [2, 64], strides = [1, 1]} : vector<2x192xf32> to vector<2x64xf32>
    %69 = vector.extract_strided_slice %59 {offsets = [0, 64], sizes = [2, 64], strides = [1, 1]} : vector<2x192xf32> to vector<2x64xf32>
    %70 = arith.addf %68, %69 : vector<2x64xf32>
    %71 = arith.negf %70 : vector<2x64xf32>
    %72 = math.exp %71 : vector<2x64xf32>
    %cst_31 = arith.constant 1.000000e+00 : f32
    %73 = vector.broadcast %cst_31 : f32 to vector<2x64xf32>
    %74 = arith.addf %73, %72 : vector<2x64xf32>
    %75 = arith.divf %73, %74 : vector<2x64xf32>
    %76 = vector.extract_strided_slice %55 {offsets = [0, 128], sizes = [2, 64], strides = [1, 1]} : vector<2x192xf32> to vector<2x64xf32>
    %77 = vector.extract_strided_slice %59 {offsets = [0, 128], sizes = [2, 64], strides = [1, 1]} : vector<2x192xf32> to vector<2x64xf32>
    %78 = arith.mulf %67, %77 : vector<2x64xf32>
    %79 = arith.addf %76, %78 : vector<2x64xf32>
    %80 = math.tanh %79 : vector<2x64xf32>
    %cst_32 = arith.constant 1.000000e+00 : f32
    %81 = vector.broadcast %cst_32 : f32 to vector<2x64xf32>
    %82 = arith.subf %81, %75 : vector<2x64xf32>
    %83 = arith.mulf %82, %80 : vector<2x64xf32>
    %84 = arith.mulf %75, %45 : vector<2x64xf32>
    %85 = arith.addf %83, %84 : vector<2x64xf32>
    %86 = arith.mulf %56, %85 : vector<2x64xf32>
    %cst_33 = arith.constant 1.000000e+00 : f32
    %87 = vector.broadcast %cst_33 : f32 to vector<2x64xf32>
    %88 = arith.subf %87, %56 : vector<2x64xf32>
    %89 = arith.mulf %88, %45 : vector<2x64xf32>
    %90 = arith.addf %86, %89 : vector<2x64xf32>
    %91 = arith.mulf %56, %90 : vector<2x64xf32>
    %92 = vector.extract_strided_slice %91 {offsets = [0, 0], sizes = [1, 32], strides = [1, 1]} : vector<2x64xf32> to vector<1x32xf32>
    %c1 = arith.constant 1 : index
    %c0_34 = arith.constant 0 : index
    %93 = vector.load %arg22[%c1, %c0_34] : memref<32x32xf32, #tpu.memory_space<vmem>>, vector<1x32xf32>
    tpu.vector_store %arg22[%c1, %c0_34], %92 {strides = array<i32>} : memref<32x32xf32, #tpu.memory_space<vmem>>, vector<1x32xf32>,
    %94 = vector.extract_strided_slice %91 {offsets = [0, 32], sizes = [1, 32], strides = [1, 1]} : vector<2x64xf32> to vector<1x32xf32>
    %c14 = arith.constant 14 : index
    %c0_35 = arith.constant 0 : index
    %95 = vector.load %arg23[%c14, %c0_35] : memref<32x32xf32, #tpu.memory_space<vmem>>, vector<1x32xf32>
    tpu.vector_store %arg23[%c14, %c0_35], %94 {strides = array<i32>} : memref<32x32xf32, #tpu.memory_space<vmem>>, vector<1x32xf32>,
    %96 = vector.extract_strided_slice %91 {offsets = [1, 0], sizes = [1, 32], strides = [1, 1]} : vector<2x64xf32> to vector<1x32xf32>
    %c17 = arith.constant 17 : index
    %c0_36 = arith.constant 0 : index
    %97 = vector.load %arg22[%c17, %c0_36] : memref<32x32xf32, #tpu.memory_space<vmem>>, vector<1x32xf32>
    tpu.vector_store %arg22[%c17, %c0_36], %96 {strides = array<i32>} : memref<32x32xf32, #tpu.memory_space<vmem>>, vector<1x32xf32>,
    %98 = vector.extract_strided_slice %91 {offsets = [1, 32], sizes = [1, 32], strides = [1, 1]} : vector<2x64xf32> to vector<1x32xf32>
    %c30 = arith.constant 30 : index
    %c0_37 = arith.constant 0 : index
    %99 = vector.load %arg23[%c30, %c0_37] : memref<32x32xf32, #tpu.memory_space<vmem>>, vector<1x32xf32>
    tpu.vector_store %arg23[%c30, %c0_37], %98 {strides = array<i32>} : memref<32x32xf32, #tpu.memory_space<vmem>>, vector<1x32xf32>,
    %c4 = arith.constant 4 : index
    %c0_38 = arith.constant 0 : index
    %100 = vector.load %arg21[%c4, %c0_38] : memref<32x192xf32, #tpu.memory_space<vmem>>, vector<2x192xf32>
    %c4_39 = arith.constant 4 : index
    %c0_40 = arith.constant 0 : index
    %101 = vector.load %arg1[%c4_39, %c0_40] : memref<32x64xf32, #tpu.memory_space<vmem>>, vector<2x64xf32>
    %cst_41 = arith.constant dense<0.000000e+00> : vector<2x192xf32>
    %102 = tpu.matmul %90, %7, %cst_41 {dimension_numbers = #tpu.dot_dimension_numbers<[1], [0], [0], [1], [0, 0, 1, 1], [], []>} : vector<2x64xf32>, vector<64x192xf32>, vector<2x192xf32> -> vector<2x192xf32>
    %103 = vector.broadcast %8 : vector<1x192xf32> to vector<2x192xf32>
    %104 = arith.addf %102, %103 : vector<2x192xf32>
    %105 = vector.extract_strided_slice %100 {offsets = [0, 0], sizes = [2, 64], strides = [1, 1]} : vector<2x192xf32> to vector<2x64xf32>
    %106 = vector.extract_strided_slice %104 {offsets = [0, 0], sizes = [2, 64], strides = [1, 1]} : vector<2x192xf32> to vector<2x64xf32>
    %107 = arith.addf %105, %106 : vector<2x64xf32>
    %108 = arith.negf %107 : vector<2x64xf32>
    %109 = math.exp %108 : vector<2x64xf32>
    %cst_42 = arith.constant 1.000000e+00 : f32
    %110 = vector.broadcast %cst_42 : f32 to vector<2x64xf32>
    %111 = arith.addf %110, %109 : vector<2x64xf32>
    %112 = arith.divf %110, %111 : vector<2x64xf32>
    %113 = vector.extract_strided_slice %100 {offsets = [0, 64], sizes = [2, 64], strides = [1, 1]} : vector<2x192xf32> to vector<2x64xf32>
    %114 = vector.extract_strided_slice %104 {offsets = [0, 64], sizes = [2, 64], strides = [1, 1]} : vector<2x192xf32> to vector<2x64xf32>
    %115 = arith.addf %113, %114 : vector<2x64xf32>
    %116 = arith.negf %115 : vector<2x64xf32>
    %117 = math.exp %116 : vector<2x64xf32>
    %cst_43 = arith.constant 1.000000e+00 : f32
    %118 = vector.broadcast %cst_43 : f32 to vector<2x64xf32>
    %119 = arith.addf %118, %117 : vector<2x64xf32>
    %120 = arith.divf %118, %119 : vector<2x64xf32>
    %121 = vector.extract_strided_slice %100 {offsets = [0, 128], sizes = [2, 64], strides = [1, 1]} : vector<2x192xf32> to vector<2x64xf32>
    %122 = vector.extract_strided_slice %104 {offsets = [0, 128], sizes = [2, 64], strides = [1, 1]} : vector<2x192xf32> to vector<2x64xf32>
    %123 = arith.mulf %112, %122 : vector<2x64xf32>
    %124 = arith.addf %121, %123 : vector<2x64xf32>
    %125 = math.tanh %124 : vector<2x64xf32>
    %cst_44 = arith.constant 1.000000e+00 : f32
    %126 = vector.broadcast %cst_44 : f32 to vector<2x64xf32>
    %127 = arith.subf %126, %120 : vector<2x64xf32>
    %128 = arith.mulf %127, %125 : vector<2x64xf32>
    %129 = arith.mulf %120, %90 : vector<2x64xf32>
    %130 = arith.addf %128, %129 : vector<2x64xf32>
    %131 = arith.mulf %101, %130 : vector<2x64xf32>
    %cst_45 = arith.constant 1.000000e+00 : f32
    %132 = vector.broadcast %cst_45 : f32 to vector<2x64xf32>
    %133 = arith.subf %132, %101 : vector<2x64xf32>
    %134 = arith.mulf %133, %90 : vector<2x64xf32>
    %135 = arith.addf %131, %134 : vector<2x64xf32>
    %136 = arith.mulf %101, %135 : vector<2x64xf32>
    %137 = vector.extract_strided_slice %136 {offsets = [0, 0], sizes = [1, 32], strides = [1, 1]} : vector<2x64xf32> to vector<1x32xf32>
    %c2_46 = arith.constant 2 : index
    %c0_47 = arith.constant 0 : index
    %138 = vector.load %arg22[%c2_46, %c0_47] : memref<32x32xf32, #tpu.memory_space<vmem>>, vector<1x32xf32>
    tpu.vector_store %arg22[%c2_46, %c0_47], %137 {strides = array<i32>} : memref<32x32xf32, #tpu.memory_space<vmem>>, vector<1x32xf32>,
    %139 = vector.extract_strided_slice %136 {offsets = [0, 32], sizes = [1, 32], strides = [1, 1]} : vector<2x64xf32> to vector<1x32xf32>
    %c13 = arith.constant 13 : index
    %c0_48 = arith.constant 0 : index
    %140 = vector.load %arg23[%c13, %c0_48] : memref<32x32xf32, #tpu.memory_space<vmem>>, vector<1x32xf32>
    tpu.vector_store %arg23[%c13, %c0_48], %139 {strides = array<i32>} : memref<32x32xf32, #tpu.memory_space<vmem>>, vector<1x32xf32>,
    %141 = vector.extract_strided_slice %136 {offsets = [1, 0], sizes = [1, 32], strides = [1, 1]} : vector<2x64xf32> to vector<1x32xf32>
    %c18 = arith.constant 18 : index
    %c0_49 = arith.constant 0 : index
    %142 = vector.load %arg22[%c18, %c0_49] : memref<32x32xf32, #tpu.memory_space<vmem>>, vector<1x32xf32>
    tpu.vector_store %arg22[%c18, %c0_49], %141 {strides = array<i32>} : memref<32x32xf32, #tpu.memory_space<vmem>>, vector<1x32xf32>,
    %143 = vector.extract_strided_slice %136 {offsets = [1, 32], sizes = [1, 32], strides = [1, 1]} : vector<2x64xf32> to vector<1x32xf32>
    %c29 = arith.constant 29 : index
    %c0_50 = arith.constant 0 : index
    %144 = vector.load %arg23[%c29, %c0_50] : memref<32x32xf32, #tpu.memory_space<vmem>>, vector<1x32xf32>
    tpu.vector_store %arg23[%c29, %c0_50], %143 {strides = array<i32>} : memref<32x32xf32, #tpu.memory_space<vmem>>, vector<1x32xf32>,
    %c6 = arith.constant 6 : index
    %c0_51 = arith.constant 0 : index
    %145 = vector.load %arg21[%c6, %c0_51] : memref<32x192xf32, #tpu.memory_space<vmem>>, vector<2x192xf32>
    %c6_52 = arith.constant 6 : index
    %c0_53 = arith.constant 0 : index
    %146 = vector.load %arg1[%c6_52, %c0_53] : memref<32x64xf32, #tpu.memory_space<vmem>>, vector<2x64xf32>
    %cst_54 = arith.constant dense<0.000000e+00> : vector<2x192xf32>
    %147 = tpu.matmul %135, %7, %cst_54 {dimension_numbers = #tpu.dot_dimension_numbers<[1], [0], [0], [1], [0, 0, 1, 1], [], []>} : vector<2x64xf32>, vector<64x192xf32>, vector<2x192xf32> -> vector<2x192xf32>
    %148 = vector.broadcast %8 : vector<1x192xf32> to vector<2x192xf32>
    %149 = arith.addf %147, %148 : vector<2x192xf32>
    %150 = vector.extract_strided_slice %145 {offsets = [0, 0], sizes = [2, 64], strides = [1, 1]} : vector<2x192xf32> to vector<2x64xf32>
    %151 = vector.extract_strided_slice %149 {offsets = [0, 0], sizes = [2, 64], strides = [1, 1]} : vector<2x192xf32> to vector<2x64xf32>
    %152 = arith.addf %150, %151 : vector<2x64xf32>
    %153 = arith.negf %152 : vector<2x64xf32>
    %154 = math.exp %153 : vector<2x64xf32>
    %cst_55 = arith.constant 1.000000e+00 : f32
    %155 = vector.broadcast %cst_55 : f32 to vector<2x64xf32>
    %156 = arith.addf %155, %154 : vector<2x64xf32>
    %157 = arith.divf %155, %156 : vector<2x64xf32>
    %158 = vector.extract_strided_slice %145 {offsets = [0, 64], sizes = [2, 64], strides = [1, 1]} : vector<2x192xf32> to vector<2x64xf32>
    %159 = vector.extract_strided_slice %149 {offsets = [0, 64], sizes = [2, 64], strides = [1, 1]} : vector<2x192xf32> to vector<2x64xf32>
    %160 = arith.addf %158, %159 : vector<2x64xf32>
    %161 = arith.negf %160 : vector<2x64xf32>
    %162 = math.exp %161 : vector<2x64xf32>
    %cst_56 = arith.constant 1.000000e+00 : f32
    %163 = vector.broadcast %cst_56 : f32 to vector<2x64xf32>
    %164 = arith.addf %163, %162 : vector<2x64xf32>
    %165 = arith.divf %163, %164 : vector<2x64xf32>
    %166 = vector.extract_strided_slice %145 {offsets = [0, 128], sizes = [2, 64], strides = [1, 1]} : vector<2x192xf32> to vector<2x64xf32>
    %167 = vector.extract_strided_slice %149 {offsets = [0, 128], sizes = [2, 64], strides = [1, 1]} : vector<2x192xf32> to vector<2x64xf32>
    %168 = arith.mulf %157, %167 : vector<2x64xf32>
    %169 = arith.addf %166, %168 : vector<2x64xf32>
    %170 = math.tanh %169 : vector<2x64xf32>
    %cst_57 = arith.constant 1.000000e+00 : f32
    %171 = vector.broadcast %cst_57 : f32 to vector<2x64xf32>
    %172 = arith.subf %171, %165 : vector<2x64xf32>
    %173 = arith.mulf %172, %170 : vector<2x64xf32>
    %174 = arith.mulf %165, %135 : vector<2x64xf32>
    %175 = arith.addf %173, %174 : vector<2x64xf32>
    %176 = arith.mulf %146, %175 : vector<2x64xf32>
    %cst_58 = arith.constant 1.000000e+00 : f32
    %177 = vector.broadcast %cst_58 : f32 to vector<2x64xf32>
    %178 = arith.subf %177, %146 : vector<2x64xf32>
    %179 = arith.mulf %178, %135 : vector<2x64xf32>
    %180 = arith.addf %176, %179 : vector<2x64xf32>
    %181 = arith.mulf %146, %180 : vector<2x64xf32>
    %182 = vector.extract_strided_slice %181 {offsets = [0, 0], sizes = [1, 32], strides = [1, 1]} : vector<2x64xf32> to vector<1x32xf32>
    %c3 = arith.constant 3 : index
    %c0_59 = arith.constant 0 : index
    %183 = vector.load %arg22[%c3, %c0_59] : memref<32x32xf32, #tpu.memory_space<vmem>>, vector<1x32xf32>
    tpu.vector_store %arg22[%c3, %c0_59], %182 {strides = array<i32>} : memref<32x32xf32, #tpu.memory_space<vmem>>, vector<1x32xf32>,
    %184 = vector.extract_strided_slice %181 {offsets = [0, 32], sizes = [1, 32], strides = [1, 1]} : vector<2x64xf32> to vector<1x32xf32>
    %c12 = arith.constant 12 : index
    %c0_60 = arith.constant 0 : index
    %185 = vector.load %arg23[%c12, %c0_60] : memref<32x32xf32, #tpu.memory_space<vmem>>, vector<1x32xf32>
    tpu.vector_store %arg23[%c12, %c0_60], %184 {strides = array<i32>} : memref<32x32xf32, #tpu.memory_space<vmem>>, vector<1x32xf32>,
    %186 = vector.extract_strided_slice %181 {offsets = [1, 0], sizes = [1, 32], strides = [1, 1]} : vector<2x64xf32> to vector<1x32xf32>
    %c19 = arith.constant 19 : index
    %c0_61 = arith.constant 0 : index
    %187 = vector.load %arg22[%c19, %c0_61] : memref<32x32xf32, #tpu.memory_space<vmem>>, vector<1x32xf32>
    tpu.vector_store %arg22[%c19, %c0_61], %186 {strides = array<i32>} : memref<32x32xf32, #tpu.memory_space<vmem>>, vector<1x32xf32>,
    %188 = vector.extract_strided_slice %181 {offsets = [1, 32], sizes = [1, 32], strides = [1, 1]} : vector<2x64xf32> to vector<1x32xf32>
    %c28 = arith.constant 28 : index
    %c0_62 = arith.constant 0 : index
    %189 = vector.load %arg23[%c28, %c0_62] : memref<32x32xf32, #tpu.memory_space<vmem>>, vector<1x32xf32>
    tpu.vector_store %arg23[%c28, %c0_62], %188 {strides = array<i32>} : memref<32x32xf32, #tpu.memory_space<vmem>>, vector<1x32xf32>,
    %c8 = arith.constant 8 : index
    %c0_63 = arith.constant 0 : index
    %190 = vector.load %arg21[%c8, %c0_63] : memref<32x192xf32, #tpu.memory_space<vmem>>, vector<2x192xf32>
    %c8_64 = arith.constant 8 : index
    %c0_65 = arith.constant 0 : index
    %191 = vector.load %arg1[%c8_64, %c0_65] : memref<32x64xf32, #tpu.memory_space<vmem>>, vector<2x64xf32>
    %cst_66 = arith.constant dense<0.000000e+00> : vector<2x192xf32>
    %192 = tpu.matmul %180, %7, %cst_66 {dimension_numbers = #tpu.dot_dimension_numbers<[1], [0], [0], [1], [0, 0, 1, 1], [], []>} : vector<2x64xf32>, vector<64x192xf32>, vector<2x192xf32> -> vector<2x192xf32>
    %193 = vector.broadcast %8 : vector<1x192xf32> to vector<2x192xf32>
    %194 = arith.addf %192, %193 : vector<2x192xf32>
    %195 = vector.extract_strided_slice %190 {offsets = [0, 0], sizes = [2, 64], strides = [1, 1]} : vector<2x192xf32> to vector<2x64xf32>
    %196 = vector.extract_strided_slice %194 {offsets = [0, 0], sizes = [2, 64], strides = [1, 1]} : vector<2x192xf32> to vector<2x64xf32>
    %197 = arith.addf %195, %196 : vector<2x64xf32>
    %198 = arith.negf %197 : vector<2x64xf32>
    %199 = math.exp %198 : vector<2x64xf32>
    %cst_67 = arith.constant 1.000000e+00 : f32
    %200 = vector.broadcast %cst_67 : f32 to vector<2x64xf32>
    %201 = arith.addf %200, %199 : vector<2x64xf32>
    %202 = arith.divf %200, %201 : vector<2x64xf32>
    %203 = vector.extract_strided_slice %190 {offsets = [0, 64], sizes = [2, 64], strides = [1, 1]} : vector<2x192xf32> to vector<2x64xf32>
    %204 = vector.extract_strided_slice %194 {offsets = [0, 64], sizes = [2, 64], strides = [1, 1]} : vector<2x192xf32> to vector<2x64xf32>
    %205 = arith.addf %203, %204 : vector<2x64xf32>
    %206 = arith.negf %205 : vector<2x64xf32>
    %207 = math.exp %206 : vector<2x64xf32>
    %cst_68 = arith.constant 1.000000e+00 : f32
    %208 = vector.broadcast %cst_68 : f32 to vector<2x64xf32>
    %209 = arith.addf %208, %207 : vector<2x64xf32>
    %210 = arith.divf %208, %209 : vector<2x64xf32>
    %211 = vector.extract_strided_slice %190 {offsets = [0, 128], sizes = [2, 64], strides = [1, 1]} : vector<2x192xf32> to vector<2x64xf32>
    %212 = vector.extract_strided_slice %194 {offsets = [0, 128], sizes = [2, 64], strides = [1, 1]} : vector<2x192xf32> to vector<2x64xf32>
    %213 = arith.mulf %202, %212 : vector<2x64xf32>
    %214 = arith.addf %211, %213 : vector<2x64xf32>
    %215 = math.tanh %214 : vector<2x64xf32>
    %cst_69 = arith.constant 1.000000e+00 : f32
    %216 = vector.broadcast %cst_69 : f32 to vector<2x64xf32>
    %217 = arith.subf %216, %210 : vector<2x64xf32>
    %218 = arith.mulf %217, %215 : vector<2x64xf32>
    %219 = arith.mulf %210, %180 : vector<2x64xf32>
    %220 = arith.addf %218, %219 : vector<2x64xf32>
    %221 = arith.mulf %191, %220 : vector<2x64xf32>
    %cst_70 = arith.constant 1.000000e+00 : f32
    %222 = vector.broadcast %cst_70 : f32 to vector<2x64xf32>
    %223 = arith.subf %222, %191 : vector<2x64xf32>
    %224 = arith.mulf %223, %180 : vector<2x64xf32>
    %225 = arith.addf %221, %224 : vector<2x64xf32>
    %226 = arith.mulf %191, %225 : vector<2x64xf32>
    %227 = vector.extract_strided_slice %226 {offsets = [0, 0], sizes = [1, 32], strides = [1, 1]} : vector<2x64xf32> to vector<1x32xf32>
    %c4_71 = arith.constant 4 : index
    %c0_72 = arith.constant 0 : index
    %228 = vector.load %arg22[%c4_71, %c0_72] : memref<32x32xf32, #tpu.memory_space<vmem>>, vector<1x32xf32>
    tpu.vector_store %arg22[%c4_71, %c0_72], %227 {strides = array<i32>} : memref<32x32xf32, #tpu.memory_space<vmem>>, vector<1x32xf32>,
    %229 = vector.extract_strided_slice %226 {offsets = [0, 32], sizes = [1, 32], strides = [1, 1]} : vector<2x64xf32> to vector<1x32xf32>
    %c11 = arith.constant 11 : index
    %c0_73 = arith.constant 0 : index
    %230 = vector.load %arg23[%c11, %c0_73] : memref<32x32xf32, #tpu.memory_space<vmem>>, vector<1x32xf32>
    tpu.vector_store %arg23[%c11, %c0_73], %229 {strides = array<i32>} : memref<32x32xf32, #tpu.memory_space<vmem>>, vector<1x32xf32>,
    %231 = vector.extract_strided_slice %226 {offsets = [1, 0], sizes = [1, 32], strides = [1, 1]} : vector<2x64xf32> to vector<1x32xf32>
    %c20 = arith.constant 20 : index
    %c0_74 = arith.constant 0 : index
    %232 = vector.load %arg22[%c20, %c0_74] : memref<32x32xf32, #tpu.memory_space<vmem>>, vector<1x32xf32>
    tpu.vector_store %arg22[%c20, %c0_74], %231 {strides = array<i32>} : memref<32x32xf32, #tpu.memory_space<vmem>>, vector<1x32xf32>,
    %233 = vector.extract_strided_slice %226 {offsets = [1, 32], sizes = [1, 32], strides = [1, 1]} : vector<2x64xf32> to vector<1x32xf32>
    %c27 = arith.constant 27 : index
    %c0_75 = arith.constant 0 : index
    %234 = vector.load %arg23[%c27, %c0_75] : memref<32x32xf32, #tpu.memory_space<vmem>>, vector<1x32xf32>
    tpu.vector_store %arg23[%c27, %c0_75], %233 {strides = array<i32>} : memref<32x32xf32, #tpu.memory_space<vmem>>, vector<1x32xf32>,
    %c10 = arith.constant 10 : index
    %c0_76 = arith.constant 0 : index
    %235 = vector.load %arg21[%c10, %c0_76] : memref<32x192xf32, #tpu.memory_space<vmem>>, vector<2x192xf32>
    %c10_77 = arith.constant 10 : index
    %c0_78 = arith.constant 0 : index
    %236 = vector.load %arg1[%c10_77, %c0_78] : memref<32x64xf32, #tpu.memory_space<vmem>>, vector<2x64xf32>
    %cst_79 = arith.constant dense<0.000000e+00> : vector<2x192xf32>
    %237 = tpu.matmul %225, %7, %cst_79 {dimension_numbers = #tpu.dot_dimension_numbers<[1], [0], [0], [1], [0, 0, 1, 1], [], []>} : vector<2x64xf32>, vector<64x192xf32>, vector<2x192xf32> -> vector<2x192xf32>
    %238 = vector.broadcast %8 : vector<1x192xf32> to vector<2x192xf32>
    %239 = arith.addf %237, %238 : vector<2x192xf32>
    %240 = vector.extract_strided_slice %235 {offsets = [0, 0], sizes = [2, 64], strides = [1, 1]} : vector<2x192xf32> to vector<2x64xf32>
    %241 = vector.extract_strided_slice %239 {offsets = [0, 0], sizes = [2, 64], strides = [1, 1]} : vector<2x192xf32> to vector<2x64xf32>
    %242 = arith.addf %240, %241 : vector<2x64xf32>
    %243 = arith.negf %242 : vector<2x64xf32>
    %244 = math.exp %243 : vector<2x64xf32>
    %cst_80 = arith.constant 1.000000e+00 : f32
    %245 = vector.broadcast %cst_80 : f32 to vector<2x64xf32>
    %246 = arith.addf %245, %244 : vector<2x64xf32>
    %247 = arith.divf %245, %246 : vector<2x64xf32>
    %248 = vector.extract_strided_slice %235 {offsets = [0, 64], sizes = [2, 64], strides = [1, 1]} : vector<2x192xf32> to vector<2x64xf32>
    %249 = vector.extract_strided_slice %239 {offsets = [0, 64], sizes = [2, 64], strides = [1, 1]} : vector<2x192xf32> to vector<2x64xf32>
    %250 = arith.addf %248, %249 : vector<2x64xf32>
    %251 = arith.negf %250 : vector<2x64xf32>
    %252 = math.exp %251 : vector<2x64xf32>
    %cst_81 = arith.constant 1.000000e+00 : f32
    %253 = vector.broadcast %cst_81 : f32 to vector<2x64xf32>
    %254 = arith.addf %253, %252 : vector<2x64xf32>
    %255 = arith.divf %253, %254 : vector<2x64xf32>
    %256 = vector.extract_strided_slice %235 {offsets = [0, 128], sizes = [2, 64], strides = [1, 1]} : vector<2x192xf32> to vector<2x64xf32>
    %257 = vector.extract_strided_slice %239 {offsets = [0, 128], sizes = [2, 64], strides = [1, 1]} : vector<2x192xf32> to vector<2x64xf32>
    %258 = arith.mulf %247, %257 : vector<2x64xf32>
    %259 = arith.addf %256, %258 : vector<2x64xf32>
    %260 = math.tanh %259 : vector<2x64xf32>
    %cst_82 = arith.constant 1.000000e+00 : f32
    %261 = vector.broadcast %cst_82 : f32 to vector<2x64xf32>
    %262 = arith.subf %261, %255 : vector<2x64xf32>
    %263 = arith.mulf %262, %260 : vector<2x64xf32>
    %264 = arith.mulf %255, %225 : vector<2x64xf32>
    %265 = arith.addf %263, %264 : vector<2x64xf32>
    %266 = arith.mulf %236, %265 : vector<2x64xf32>
    %cst_83 = arith.constant 1.000000e+00 : f32
    %267 = vector.broadcast %cst_83 : f32 to vector<2x64xf32>
    %268 = arith.subf %267, %236 : vector<2x64xf32>
    %269 = arith.mulf %268, %225 : vector<2x64xf32>
    %270 = arith.addf %266, %269 : vector<2x64xf32>
    %271 = arith.mulf %236, %270 : vector<2x64xf32>
    %272 = vector.extract_strided_slice %271 {offsets = [0, 0], sizes = [1, 32], strides = [1, 1]} : vector<2x64xf32> to vector<1x32xf32>
    %c5 = arith.constant 5 : index
    %c0_84 = arith.constant 0 : index
    %273 = vector.load %arg22[%c5, %c0_84] : memref<32x32xf32, #tpu.memory_space<vmem>>, vector<1x32xf32>
    tpu.vector_store %arg22[%c5, %c0_84], %272 {strides = array<i32>} : memref<32x32xf32, #tpu.memory_space<vmem>>, vector<1x32xf32>,
    %274 = vector.extract_strided_slice %271 {offsets = [0, 32], sizes = [1, 32], strides = [1, 1]} : vector<2x64xf32> to vector<1x32xf32>
    %c10_85 = arith.constant 10 : index
    %c0_86 = arith.constant 0 : index
    %275 = vector.load %arg23[%c10_85, %c0_86] : memref<32x32xf32, #tpu.memory_space<vmem>>, vector<1x32xf32>
    tpu.vector_store %arg23[%c10_85, %c0_86], %274 {strides = array<i32>} : memref<32x32xf32, #tpu.memory_space<vmem>>, vector<1x32xf32>,
    %276 = vector.extract_strided_slice %271 {offsets = [1, 0], sizes = [1, 32], strides = [1, 1]} : vector<2x64xf32> to vector<1x32xf32>
    %c21 = arith.constant 21 : index
    %c0_87 = arith.constant 0 : index
    %277 = vector.load %arg22[%c21, %c0_87] : memref<32x32xf32, #tpu.memory_space<vmem>>, vector<1x32xf32>
    tpu.vector_store %arg22[%c21, %c0_87], %276 {strides = array<i32>} : memref<32x32xf32, #tpu.memory_space<vmem>>, vector<1x32xf32>,
    %278 = vector.extract_strided_slice %271 {offsets = [1, 32], sizes = [1, 32], strides = [1, 1]} : vector<2x64xf32> to vector<1x32xf32>
    %c26 = arith.constant 26 : index
    %c0_88 = arith.constant 0 : index
    %279 = vector.load %arg23[%c26, %c0_88] : memref<32x32xf32, #tpu.memory_space<vmem>>, vector<1x32xf32>
    tpu.vector_store %arg23[%c26, %c0_88], %278 {strides = array<i32>} : memref<32x32xf32, #tpu.memory_space<vmem>>, vector<1x32xf32>,
    %c12_89 = arith.constant 12 : index
    %c0_90 = arith.constant 0 : index
    %280 = vector.load %arg21[%c12_89, %c0_90] : memref<32x192xf32, #tpu.memory_space<vmem>>, vector<2x192xf32>
    %c12_91 = arith.constant 12 : index
    %c0_92 = arith.constant 0 : index
    %281 = vector.load %arg1[%c12_91, %c0_92] : memref<32x64xf32, #tpu.memory_space<vmem>>, vector<2x64xf32>
    %cst_93 = arith.constant dense<0.000000e+00> : vector<2x192xf32>
    %282 = tpu.matmul %270, %7, %cst_93 {dimension_numbers = #tpu.dot_dimension_numbers<[1], [0], [0], [1], [0, 0, 1, 1], [], []>} : vector<2x64xf32>, vector<64x192xf32>, vector<2x192xf32> -> vector<2x192xf32>
    %283 = vector.broadcast %8 : vector<1x192xf32> to vector<2x192xf32>
    %284 = arith.addf %282, %283 : vector<2x192xf32>
    %285 = vector.extract_strided_slice %280 {offsets = [0, 0], sizes = [2, 64], strides = [1, 1]} : vector<2x192xf32> to vector<2x64xf32>
    %286 = vector.extract_strided_slice %284 {offsets = [0, 0], sizes = [2, 64], strides = [1, 1]} : vector<2x192xf32> to vector<2x64xf32>
    %287 = arith.addf %285, %286 : vector<2x64xf32>
    %288 = arith.negf %287 : vector<2x64xf32>
    %289 = math.exp %288 : vector<2x64xf32>
    %cst_94 = arith.constant 1.000000e+00 : f32
    %290 = vector.broadcast %cst_94 : f32 to vector<2x64xf32>
    %291 = arith.addf %290, %289 : vector<2x64xf32>
    %292 = arith.divf %290, %291 : vector<2x64xf32>
    %293 = vector.extract_strided_slice %280 {offsets = [0, 64], sizes = [2, 64], strides = [1, 1]} : vector<2x192xf32> to vector<2x64xf32>
    %294 = vector.extract_strided_slice %284 {offsets = [0, 64], sizes = [2, 64], strides = [1, 1]} : vector<2x192xf32> to vector<2x64xf32>
    %295 = arith.addf %293, %294 : vector<2x64xf32>
    %296 = arith.negf %295 : vector<2x64xf32>
    %297 = math.exp %296 : vector<2x64xf32>
    %cst_95 = arith.constant 1.000000e+00 : f32
    %298 = vector.broadcast %cst_95 : f32 to vector<2x64xf32>
    %299 = arith.addf %298, %297 : vector<2x64xf32>
    %300 = arith.divf %298, %299 : vector<2x64xf32>
    %301 = vector.extract_strided_slice %280 {offsets = [0, 128], sizes = [2, 64], strides = [1, 1]} : vector<2x192xf32> to vector<2x64xf32>
    %302 = vector.extract_strided_slice %284 {offsets = [0, 128], sizes = [2, 64], strides = [1, 1]} : vector<2x192xf32> to vector<2x64xf32>
    %303 = arith.mulf %292, %302 : vector<2x64xf32>
    %304 = arith.addf %301, %303 : vector<2x64xf32>
    %305 = math.tanh %304 : vector<2x64xf32>
    %cst_96 = arith.constant 1.000000e+00 : f32
    %306 = vector.broadcast %cst_96 : f32 to vector<2x64xf32>
    %307 = arith.subf %306, %300 : vector<2x64xf32>
    %308 = arith.mulf %307, %305 : vector<2x64xf32>
    %309 = arith.mulf %300, %270 : vector<2x64xf32>
    %310 = arith.addf %308, %309 : vector<2x64xf32>
    %311 = arith.mulf %281, %310 : vector<2x64xf32>
    %cst_97 = arith.constant 1.000000e+00 : f32
    %312 = vector.broadcast %cst_97 : f32 to vector<2x64xf32>
    %313 = arith.subf %312, %281 : vector<2x64xf32>
    %314 = arith.mulf %313, %270 : vector<2x64xf32>
    %315 = arith.addf %311, %314 : vector<2x64xf32>
    %316 = arith.mulf %281, %315 : vector<2x64xf32>
    %317 = vector.extract_strided_slice %316 {offsets = [0, 0], sizes = [1, 32], strides = [1, 1]} : vector<2x64xf32> to vector<1x32xf32>
    %c6_98 = arith.constant 6 : index
    %c0_99 = arith.constant 0 : index
    %318 = vector.load %arg22[%c6_98, %c0_99] : memref<32x32xf32, #tpu.memory_space<vmem>>, vector<1x32xf32>
    tpu.vector_store %arg22[%c6_98, %c0_99], %317 {strides = array<i32>} : memref<32x32xf32, #tpu.memory_space<vmem>>, vector<1x32xf32>,
    %319 = vector.extract_strided_slice %316 {offsets = [0, 32], sizes = [1, 32], strides = [1, 1]} : vector<2x64xf32> to vector<1x32xf32>
    %c9 = arith.constant 9 : index
    %c0_100 = arith.constant 0 : index
    %320 = vector.load %arg23[%c9, %c0_100] : memref<32x32xf32, #tpu.memory_space<vmem>>, vector<1x32xf32>
    tpu.vector_store %arg23[%c9, %c0_100], %319 {strides = array<i32>} : memref<32x32xf32, #tpu.memory_space<vmem>>, vector<1x32xf32>,
    %321 = vector.extract_strided_slice %316 {offsets = [1, 0], sizes = [1, 32], strides = [1, 1]} : vector<2x64xf32> to vector<1x32xf32>
    %c22 = arith.constant 22 : index
    %c0_101 = arith.constant 0 : index
    %322 = vector.load %arg22[%c22, %c0_101] : memref<32x32xf32, #tpu.memory_space<vmem>>, vector<1x32xf32>
    tpu.vector_store %arg22[%c22, %c0_101], %321 {strides = array<i32>} : memref<32x32xf32, #tpu.memory_space<vmem>>, vector<1x32xf32>,
    %323 = vector.extract_strided_slice %316 {offsets = [1, 32], sizes = [1, 32], strides = [1, 1]} : vector<2x64xf32> to vector<1x32xf32>
    %c25 = arith.constant 25 : index
    %c0_102 = arith.constant 0 : index
    %324 = vector.load %arg23[%c25, %c0_102] : memref<32x32xf32, #tpu.memory_space<vmem>>, vector<1x32xf32>
    tpu.vector_store %arg23[%c25, %c0_102], %323 {strides = array<i32>} : memref<32x32xf32, #tpu.memory_space<vmem>>, vector<1x32xf32>,
    %c14_103 = arith.constant 14 : index
    %c0_104 = arith.constant 0 : index
    %325 = vector.load %arg21[%c14_103, %c0_104] : memref<32x192xf32, #tpu.memory_space<vmem>>, vector<2x192xf32>
    %c14_105 = arith.constant 14 : index
    %c0_106 = arith.constant 0 : index
    %326 = vector.load %arg1[%c14_105, %c0_106] : memref<32x64xf32, #tpu.memory_space<vmem>>, vector<2x64xf32>
    %cst_107 = arith.constant dense<0.000000e+00> : vector<2x192xf32>
    %327 = tpu.matmul %315, %7, %cst_107 {dimension_numbers = #tpu.dot_dimension_numbers<[1], [0], [0], [1], [0, 0, 1, 1], [], []>} : vector<2x64xf32>, vector<64x192xf32>, vector<2x192xf32> -> vector<2x192xf32>
    %328 = vector.broadcast %8 : vector<1x192xf32> to vector<2x192xf32>
    %329 = arith.addf %327, %328 : vector<2x192xf32>
    %330 = vector.extract_strided_slice %325 {offsets = [0, 0], sizes = [2, 64], strides = [1, 1]} : vector<2x192xf32> to vector<2x64xf32>
    %331 = vector.extract_strided_slice %329 {offsets = [0, 0], sizes = [2, 64], strides = [1, 1]} : vector<2x192xf32> to vector<2x64xf32>
    %332 = arith.addf %330, %331 : vector<2x64xf32>
    %333 = arith.negf %332 : vector<2x64xf32>
    %334 = math.exp %333 : vector<2x64xf32>
    %cst_108 = arith.constant 1.000000e+00 : f32
    %335 = vector.broadcast %cst_108 : f32 to vector<2x64xf32>
    %336 = arith.addf %335, %334 : vector<2x64xf32>
    %337 = arith.divf %335, %336 : vector<2x64xf32>
    %338 = vector.extract_strided_slice %325 {offsets = [0, 64], sizes = [2, 64], strides = [1, 1]} : vector<2x192xf32> to vector<2x64xf32>
    %339 = vector.extract_strided_slice %329 {offsets = [0, 64], sizes = [2, 64], strides = [1, 1]} : vector<2x192xf32> to vector<2x64xf32>
    %340 = arith.addf %338, %339 : vector<2x64xf32>
    %341 = arith.negf %340 : vector<2x64xf32>
    %342 = math.exp %341 : vector<2x64xf32>
    %cst_109 = arith.constant 1.000000e+00 : f32
    %343 = vector.broadcast %cst_109 : f32 to vector<2x64xf32>
    %344 = arith.addf %343, %342 : vector<2x64xf32>
    %345 = arith.divf %343, %344 : vector<2x64xf32>
    %346 = vector.extract_strided_slice %325 {offsets = [0, 128], sizes = [2, 64], strides = [1, 1]} : vector<2x192xf32> to vector<2x64xf32>
    %347 = vector.extract_strided_slice %329 {offsets = [0, 128], sizes = [2, 64], strides = [1, 1]} : vector<2x192xf32> to vector<2x64xf32>
    %348 = arith.mulf %337, %347 : vector<2x64xf32>
    %349 = arith.addf %346, %348 : vector<2x64xf32>
    %350 = math.tanh %349 : vector<2x64xf32>
    %cst_110 = arith.constant 1.000000e+00 : f32
    %351 = vector.broadcast %cst_110 : f32 to vector<2x64xf32>
    %352 = arith.subf %351, %345 : vector<2x64xf32>
    %353 = arith.mulf %352, %350 : vector<2x64xf32>
    %354 = arith.mulf %345, %315 : vector<2x64xf32>
    %355 = arith.addf %353, %354 : vector<2x64xf32>
    %356 = arith.mulf %326, %355 : vector<2x64xf32>
    %cst_111 = arith.constant 1.000000e+00 : f32
    %357 = vector.broadcast %cst_111 : f32 to vector<2x64xf32>
    %358 = arith.subf %357, %326 : vector<2x64xf32>
    %359 = arith.mulf %358, %315 : vector<2x64xf32>
    %360 = arith.addf %356, %359 : vector<2x64xf32>
    %361 = arith.mulf %326, %360 : vector<2x64xf32>
    %362 = vector.extract_strided_slice %361 {offsets = [0, 0], sizes = [1, 32], strides = [1, 1]} : vector<2x64xf32> to vector<1x32xf32>
    %c7 = arith.constant 7 : index
    %c0_112 = arith.constant 0 : index
    %363 = vector.load %arg22[%c7, %c0_112] : memref<32x32xf32, #tpu.memory_space<vmem>>, vector<1x32xf32>
    tpu.vector_store %arg22[%c7, %c0_112], %362 {strides = array<i32>} : memref<32x32xf32, #tpu.memory_space<vmem>>, vector<1x32xf32>,
    %364 = vector.extract_strided_slice %361 {offsets = [0, 32], sizes = [1, 32], strides = [1, 1]} : vector<2x64xf32> to vector<1x32xf32>
    %c8_113 = arith.constant 8 : index
    %c0_114 = arith.constant 0 : index
    %365 = vector.load %arg23[%c8_113, %c0_114] : memref<32x32xf32, #tpu.memory_space<vmem>>, vector<1x32xf32>
    tpu.vector_store %arg23[%c8_113, %c0_114], %364 {strides = array<i32>} : memref<32x32xf32, #tpu.memory_space<vmem>>, vector<1x32xf32>,
    %366 = vector.extract_strided_slice %361 {offsets = [1, 0], sizes = [1, 32], strides = [1, 1]} : vector<2x64xf32> to vector<1x32xf32>
    %c23 = arith.constant 23 : index
    %c0_115 = arith.constant 0 : index
    %367 = vector.load %arg22[%c23, %c0_115] : memref<32x32xf32, #tpu.memory_space<vmem>>, vector<1x32xf32>
    tpu.vector_store %arg22[%c23, %c0_115], %366 {strides = array<i32>} : memref<32x32xf32, #tpu.memory_space<vmem>>, vector<1x32xf32>,
    %368 = vector.extract_strided_slice %361 {offsets = [1, 32], sizes = [1, 32], strides = [1, 1]} : vector<2x64xf32> to vector<1x32xf32>
    %c24 = arith.constant 24 : index
    %c0_116 = arith.constant 0 : index
    %369 = vector.load %arg23[%c24, %c0_116] : memref<32x32xf32, #tpu.memory_space<vmem>>, vector<1x32xf32>
    tpu.vector_store %arg23[%c24, %c0_116], %368 {strides = array<i32>} : memref<32x32xf32, #tpu.memory_space<vmem>>, vector<1x32xf32>,
    %c16_117 = arith.constant 16 : index
    %c0_118 = arith.constant 0 : index
    %370 = vector.load %arg21[%c16_117, %c0_118] : memref<32x192xf32, #tpu.memory_space<vmem>>, vector<2x192xf32>
    %c16_119 = arith.constant 16 : index
    %c0_120 = arith.constant 0 : index
    %371 = vector.load %arg1[%c16_119, %c0_120] : memref<32x64xf32, #tpu.memory_space<vmem>>, vector<2x64xf32>
    %cst_121 = arith.constant dense<0.000000e+00> : vector<2x192xf32>
    %372 = tpu.matmul %360, %7, %cst_121 {dimension_numbers = #tpu.dot_dimension_numbers<[1], [0], [0], [1], [0, 0, 1, 1], [], []>} : vector<2x64xf32>, vector<64x192xf32>, vector<2x192xf32> -> vector<2x192xf32>
    %373 = vector.broadcast %8 : vector<1x192xf32> to vector<2x192xf32>
    %374 = arith.addf %372, %373 : vector<2x192xf32>
    %375 = vector.extract_strided_slice %370 {offsets = [0, 0], sizes = [2, 64], strides = [1, 1]} : vector<2x192xf32> to vector<2x64xf32>
    %376 = vector.extract_strided_slice %374 {offsets = [0, 0], sizes = [2, 64], strides = [1, 1]} : vector<2x192xf32> to vector<2x64xf32>
    %377 = arith.addf %375, %376 : vector<2x64xf32>
    %378 = arith.negf %377 : vector<2x64xf32>
    %379 = math.exp %378 : vector<2x64xf32>
    %cst_122 = arith.constant 1.000000e+00 : f32
    %380 = vector.broadcast %cst_122 : f32 to vector<2x64xf32>
    %381 = arith.addf %380, %379 : vector<2x64xf32>
    %382 = arith.divf %380, %381 : vector<2x64xf32>
    %383 = vector.extract_strided_slice %370 {offsets = [0, 64], sizes = [2, 64], strides = [1, 1]} : vector<2x192xf32> to vector<2x64xf32>
    %384 = vector.extract_strided_slice %374 {offsets = [0, 64], sizes = [2, 64], strides = [1, 1]} : vector<2x192xf32> to vector<2x64xf32>
    %385 = arith.addf %383, %384 : vector<2x64xf32>
    %386 = arith.negf %385 : vector<2x64xf32>
    %387 = math.exp %386 : vector<2x64xf32>
    %cst_123 = arith.constant 1.000000e+00 : f32
    %388 = vector.broadcast %cst_123 : f32 to vector<2x64xf32>
    %389 = arith.addf %388, %387 : vector<2x64xf32>
    %390 = arith.divf %388, %389 : vector<2x64xf32>
    %391 = vector.extract_strided_slice %370 {offsets = [0, 128], sizes = [2, 64], strides = [1, 1]} : vector<2x192xf32> to vector<2x64xf32>
    %392 = vector.extract_strided_slice %374 {offsets = [0, 128], sizes = [2, 64], strides = [1, 1]} : vector<2x192xf32> to vector<2x64xf32>
    %393 = arith.mulf %382, %392 : vector<2x64xf32>
    %394 = arith.addf %391, %393 : vector<2x64xf32>
    %395 = math.tanh %394 : vector<2x64xf32>
    %cst_124 = arith.constant 1.000000e+00 : f32
    %396 = vector.broadcast %cst_124 : f32 to vector<2x64xf32>
    %397 = arith.subf %396, %390 : vector<2x64xf32>
    %398 = arith.mulf %397, %395 : vector<2x64xf32>
    %399 = arith.mulf %390, %360 : vector<2x64xf32>
    %400 = arith.addf %398, %399 : vector<2x64xf32>
    %401 = arith.mulf %371, %400 : vector<2x64xf32>
    %cst_125 = arith.constant 1.000000e+00 : f32
    %402 = vector.broadcast %cst_125 : f32 to vector<2x64xf32>
    %403 = arith.subf %402, %371 : vector<2x64xf32>
    %404 = arith.mulf %403, %360 : vector<2x64xf32>
    %405 = arith.addf %401, %404 : vector<2x64xf32>
    %406 = arith.mulf %371, %405 : vector<2x64xf32>
    %407 = vector.extract_strided_slice %406 {offsets = [0, 0], sizes = [1, 32], strides = [1, 1]} : vector<2x64xf32> to vector<1x32xf32>
    %c8_126 = arith.constant 8 : index
    %c0_127 = arith.constant 0 : index
    %408 = vector.load %arg22[%c8_126, %c0_127] : memref<32x32xf32, #tpu.memory_space<vmem>>, vector<1x32xf32>
    tpu.vector_store %arg22[%c8_126, %c0_127], %407 {strides = array<i32>} : memref<32x32xf32, #tpu.memory_space<vmem>>, vector<1x32xf32>,
    %409 = vector.extract_strided_slice %406 {offsets = [0, 32], sizes = [1, 32], strides = [1, 1]} : vector<2x64xf32> to vector<1x32xf32>
    %c7_128 = arith.constant 7 : index
    %c0_129 = arith.constant 0 : index
    %410 = vector.load %arg23[%c7_128, %c0_129] : memref<32x32xf32, #tpu.memory_space<vmem>>, vector<1x32xf32>
    tpu.vector_store %arg23[%c7_128, %c0_129], %409 {strides = array<i32>} : memref<32x32xf32, #tpu.memory_space<vmem>>, vector<1x32xf32>,
    %411 = vector.extract_strided_slice %406 {offsets = [1, 0], sizes = [1, 32], strides = [1, 1]} : vector<2x64xf32> to vector<1x32xf32>
    %c24_130 = arith.constant 24 : index
    %c0_131 = arith.constant 0 : index
    %412 = vector.load %arg22[%c24_130, %c0_131] : memref<32x32xf32, #tpu.memory_space<vmem>>, vector<1x32xf32>
    tpu.vector_store %arg22[%c24_130, %c0_131], %411 {strides = array<i32>} : memref<32x32xf32, #tpu.memory_space<vmem>>, vector<1x32xf32>,
    %413 = vector.extract_strided_slice %406 {offsets = [1, 32], sizes = [1, 32], strides = [1, 1]} : vector<2x64xf32> to vector<1x32xf32>
    %c23_132 = arith.constant 23 : index
    %c0_133 = arith.constant 0 : index
    %414 = vector.load %arg23[%c23_132, %c0_133] : memref<32x32xf32, #tpu.memory_space<vmem>>, vector<1x32xf32>
    tpu.vector_store %arg23[%c23_132, %c0_133], %413 {strides = array<i32>} : memref<32x32xf32, #tpu.memory_space<vmem>>, vector<1x32xf32>,
    %c18_134 = arith.constant 18 : index
    %c0_135 = arith.constant 0 : index
    %415 = vector.load %arg21[%c18_134, %c0_135] : memref<32x192xf32, #tpu.memory_space<vmem>>, vector<2x192xf32>
    %c18_136 = arith.constant 18 : index
    %c0_137 = arith.constant 0 : index
    %416 = vector.load %arg1[%c18_136, %c0_137] : memref<32x64xf32, #tpu.memory_space<vmem>>, vector<2x64xf32>
    %cst_138 = arith.constant dense<0.000000e+00> : vector<2x192xf32>
    %417 = tpu.matmul %405, %7, %cst_138 {dimension_numbers = #tpu.dot_dimension_numbers<[1], [0], [0], [1], [0, 0, 1, 1], [], []>} : vector<2x64xf32>, vector<64x192xf32>, vector<2x192xf32> -> vector<2x192xf32>
    %418 = vector.broadcast %8 : vector<1x192xf32> to vector<2x192xf32>
    %419 = arith.addf %417, %418 : vector<2x192xf32>
    %420 = vector.extract_strided_slice %415 {offsets = [0, 0], sizes = [2, 64], strides = [1, 1]} : vector<2x192xf32> to vector<2x64xf32>
    %421 = vector.extract_strided_slice %419 {offsets = [0, 0], sizes = [2, 64], strides = [1, 1]} : vector<2x192xf32> to vector<2x64xf32>
    %422 = arith.addf %420, %421 : vector<2x64xf32>
    %423 = arith.negf %422 : vector<2x64xf32>
    %424 = math.exp %423 : vector<2x64xf32>
    %cst_139 = arith.constant 1.000000e+00 : f32
    %425 = vector.broadcast %cst_139 : f32 to vector<2x64xf32>
    %426 = arith.addf %425, %424 : vector<2x64xf32>
    %427 = arith.divf %425, %426 : vector<2x64xf32>
    %428 = vector.extract_strided_slice %415 {offsets = [0, 64], sizes = [2, 64], strides = [1, 1]} : vector<2x192xf32> to vector<2x64xf32>
    %429 = vector.extract_strided_slice %419 {offsets = [0, 64], sizes = [2, 64], strides = [1, 1]} : vector<2x192xf32> to vector<2x64xf32>
    %430 = arith.addf %428, %429 : vector<2x64xf32>
    %431 = arith.negf %430 : vector<2x64xf32>
    %432 = math.exp %431 : vector<2x64xf32>
    %cst_140 = arith.constant 1.000000e+00 : f32
    %433 = vector.broadcast %cst_140 : f32 to vector<2x64xf32>
    %434 = arith.addf %433, %432 : vector<2x64xf32>
    %435 = arith.divf %433, %434 : vector<2x64xf32>
    %436 = vector.extract_strided_slice %415 {offsets = [0, 128], sizes = [2, 64], strides = [1, 1]} : vector<2x192xf32> to vector<2x64xf32>
    %437 = vector.extract_strided_slice %419 {offsets = [0, 128], sizes = [2, 64], strides = [1, 1]} : vector<2x192xf32> to vector<2x64xf32>
    %438 = arith.mulf %427, %437 : vector<2x64xf32>
    %439 = arith.addf %436, %438 : vector<2x64xf32>
    %440 = math.tanh %439 : vector<2x64xf32>
    %cst_141 = arith.constant 1.000000e+00 : f32
    %441 = vector.broadcast %cst_141 : f32 to vector<2x64xf32>
    %442 = arith.subf %441, %435 : vector<2x64xf32>
    %443 = arith.mulf %442, %440 : vector<2x64xf32>
    %444 = arith.mulf %435, %405 : vector<2x64xf32>
    %445 = arith.addf %443, %444 : vector<2x64xf32>
    %446 = arith.mulf %416, %445 : vector<2x64xf32>
    %cst_142 = arith.constant 1.000000e+00 : f32
    %447 = vector.broadcast %cst_142 : f32 to vector<2x64xf32>
    %448 = arith.subf %447, %416 : vector<2x64xf32>
    %449 = arith.mulf %448, %405 : vector<2x64xf32>
    %450 = arith.addf %446, %449 : vector<2x64xf32>
    %451 = arith.mulf %416, %450 : vector<2x64xf32>
    %452 = vector.extract_strided_slice %451 {offsets = [0, 0], sizes = [1, 32], strides = [1, 1]} : vector<2x64xf32> to vector<1x32xf32>
    %c9_143 = arith.constant 9 : index
    %c0_144 = arith.constant 0 : index
    %453 = vector.load %arg22[%c9_143, %c0_144] : memref<32x32xf32, #tpu.memory_space<vmem>>, vector<1x32xf32>
    tpu.vector_store %arg22[%c9_143, %c0_144], %452 {strides = array<i32>} : memref<32x32xf32, #tpu.memory_space<vmem>>, vector<1x32xf32>,
    %454 = vector.extract_strided_slice %451 {offsets = [0, 32], sizes = [1, 32], strides = [1, 1]} : vector<2x64xf32> to vector<1x32xf32>
    %c6_145 = arith.constant 6 : index
    %c0_146 = arith.constant 0 : index
    %455 = vector.load %arg23[%c6_145, %c0_146] : memref<32x32xf32, #tpu.memory_space<vmem>>, vector<1x32xf32>
    tpu.vector_store %arg23[%c6_145, %c0_146], %454 {strides = array<i32>} : memref<32x32xf32, #tpu.memory_space<vmem>>, vector<1x32xf32>,
    %456 = vector.extract_strided_slice %451 {offsets = [1, 0], sizes = [1, 32], strides = [1, 1]} : vector<2x64xf32> to vector<1x32xf32>
    %c25_147 = arith.constant 25 : index
    %c0_148 = arith.constant 0 : index
    %457 = vector.load %arg22[%c25_147, %c0_148] : memref<32x32xf32, #tpu.memory_space<vmem>>, vector<1x32xf32>
    tpu.vector_store %arg22[%c25_147, %c0_148], %456 {strides = array<i32>} : memref<32x32xf32, #tpu.memory_space<vmem>>, vector<1x32xf32>,
    %458 = vector.extract_strided_slice %451 {offsets = [1, 32], sizes = [1, 32], strides = [1, 1]} : vector<2x64xf32> to vector<1x32xf32>
    %c22_149 = arith.constant 22 : index
    %c0_150 = arith.constant 0 : index
    %459 = vector.load %arg23[%c22_149, %c0_150] : memref<32x32xf32, #tpu.memory_space<vmem>>, vector<1x32xf32>
    tpu.vector_store %arg23[%c22_149, %c0_150], %458 {strides = array<i32>} : memref<32x32xf32, #tpu.memory_space<vmem>>, vector<1x32xf32>,
    %c20_151 = arith.constant 20 : index
    %c0_152 = arith.constant 0 : index
    %460 = vector.load %arg21[%c20_151, %c0_152] : memref<32x192xf32, #tpu.memory_space<vmem>>, vector<2x192xf32>
    %c20_153 = arith.constant 20 : index
    %c0_154 = arith.constant 0 : index
    %461 = vector.load %arg1[%c20_153, %c0_154] : memref<32x64xf32, #tpu.memory_space<vmem>>, vector<2x64xf32>
    %cst_155 = arith.constant dense<0.000000e+00> : vector<2x192xf32>
    %462 = tpu.matmul %450, %7, %cst_155 {dimension_numbers = #tpu.dot_dimension_numbers<[1], [0], [0], [1], [0, 0, 1, 1], [], []>} : vector<2x64xf32>, vector<64x192xf32>, vector<2x192xf32> -> vector<2x192xf32>
    %463 = vector.broadcast %8 : vector<1x192xf32> to vector<2x192xf32>
    %464 = arith.addf %462, %463 : vector<2x192xf32>
    %465 = vector.extract_strided_slice %460 {offsets = [0, 0], sizes = [2, 64], strides = [1, 1]} : vector<2x192xf32> to vector<2x64xf32>
    %466 = vector.extract_strided_slice %464 {offsets = [0, 0], sizes = [2, 64], strides = [1, 1]} : vector<2x192xf32> to vector<2x64xf32>
    %467 = arith.addf %465, %466 : vector<2x64xf32>
    %468 = arith.negf %467 : vector<2x64xf32>
    %469 = math.exp %468 : vector<2x64xf32>
    %cst_156 = arith.constant 1.000000e+00 : f32
    %470 = vector.broadcast %cst_156 : f32 to vector<2x64xf32>
    %471 = arith.addf %470, %469 : vector<2x64xf32>
    %472 = arith.divf %470, %471 : vector<2x64xf32>
    %473 = vector.extract_strided_slice %460 {offsets = [0, 64], sizes = [2, 64], strides = [1, 1]} : vector<2x192xf32> to vector<2x64xf32>
    %474 = vector.extract_strided_slice %464 {offsets = [0, 64], sizes = [2, 64], strides = [1, 1]} : vector<2x192xf32> to vector<2x64xf32>
    %475 = arith.addf %473, %474 : vector<2x64xf32>
    %476 = arith.negf %475 : vector<2x64xf32>
    %477 = math.exp %476 : vector<2x64xf32>
    %cst_157 = arith.constant 1.000000e+00 : f32
    %478 = vector.broadcast %cst_157 : f32 to vector<2x64xf32>
    %479 = arith.addf %478, %477 : vector<2x64xf32>
    %480 = arith.divf %478, %479 : vector<2x64xf32>
    %481 = vector.extract_strided_slice %460 {offsets = [0, 128], sizes = [2, 64], strides = [1, 1]} : vector<2x192xf32> to vector<2x64xf32>
    %482 = vector.extract_strided_slice %464 {offsets = [0, 128], sizes = [2, 64], strides = [1, 1]} : vector<2x192xf32> to vector<2x64xf32>
    %483 = arith.mulf %472, %482 : vector<2x64xf32>
    %484 = arith.addf %481, %483 : vector<2x64xf32>
    %485 = math.tanh %484 : vector<2x64xf32>
    %cst_158 = arith.constant 1.000000e+00 : f32
    %486 = vector.broadcast %cst_158 : f32 to vector<2x64xf32>
    %487 = arith.subf %486, %480 : vector<2x64xf32>
    %488 = arith.mulf %487, %485 : vector<2x64xf32>
    %489 = arith.mulf %480, %450 : vector<2x64xf32>
    %490 = arith.addf %488, %489 : vector<2x64xf32>
    %491 = arith.mulf %461, %490 : vector<2x64xf32>
    %cst_159 = arith.constant 1.000000e+00 : f32
    %492 = vector.broadcast %cst_159 : f32 to vector<2x64xf32>
    %493 = arith.subf %492, %461 : vector<2x64xf32>
    %494 = arith.mulf %493, %450 : vector<2x64xf32>
    %495 = arith.addf %491, %494 : vector<2x64xf32>
    %496 = arith.mulf %461, %495 : vector<2x64xf32>
    %497 = vector.extract_strided_slice %496 {offsets = [0, 0], sizes = [1, 32], strides = [1, 1]} : vector<2x64xf32> to vector<1x32xf32>
    %c10_160 = arith.constant 10 : index
    %c0_161 = arith.constant 0 : index
    %498 = vector.load %arg22[%c10_160, %c0_161] : memref<32x32xf32, #tpu.memory_space<vmem>>, vector<1x32xf32>
    tpu.vector_store %arg22[%c10_160, %c0_161], %497 {strides = array<i32>} : memref<32x32xf32, #tpu.memory_space<vmem>>, vector<1x32xf32>,
    %499 = vector.extract_strided_slice %496 {offsets = [0, 32], sizes = [1, 32], strides = [1, 1]} : vector<2x64xf32> to vector<1x32xf32>
    %c5_162 = arith.constant 5 : index
    %c0_163 = arith.constant 0 : index
    %500 = vector.load %arg23[%c5_162, %c0_163] : memref<32x32xf32, #tpu.memory_space<vmem>>, vector<1x32xf32>
    tpu.vector_store %arg23[%c5_162, %c0_163], %499 {strides = array<i32>} : memref<32x32xf32, #tpu.memory_space<vmem>>, vector<1x32xf32>,
    %501 = vector.extract_strided_slice %496 {offsets = [1, 0], sizes = [1, 32], strides = [1, 1]} : vector<2x64xf32> to vector<1x32xf32>
    %c26_164 = arith.constant 26 : index
    %c0_165 = arith.constant 0 : index
    %502 = vector.load %arg22[%c26_164, %c0_165] : memref<32x32xf32, #tpu.memory_space<vmem>>, vector<1x32xf32>
    tpu.vector_store %arg22[%c26_164, %c0_165], %501 {strides = array<i32>} : memref<32x32xf32, #tpu.memory_space<vmem>>, vector<1x32xf32>,
    %503 = vector.extract_strided_slice %496 {offsets = [1, 32], sizes = [1, 32], strides = [1, 1]} : vector<2x64xf32> to vector<1x32xf32>
    %c21_166 = arith.constant 21 : index
    %c0_167 = arith.constant 0 : index
    %504 = vector.load %arg23[%c21_166, %c0_167] : memref<32x32xf32, #tpu.memory_space<vmem>>, vector<1x32xf32>
    tpu.vector_store %arg23[%c21_166, %c0_167], %503 {strides = array<i32>} : memref<32x32xf32, #tpu.memory_space<vmem>>, vector<1x32xf32>,
    %c22_168 = arith.constant 22 : index
    %c0_169 = arith.constant 0 : index
    %505 = vector.load %arg21[%c22_168, %c0_169] : memref<32x192xf32, #tpu.memory_space<vmem>>, vector<2x192xf32>
    %c22_170 = arith.constant 22 : index
    %c0_171 = arith.constant 0 : index
    %506 = vector.load %arg1[%c22_170, %c0_171] : memref<32x64xf32, #tpu.memory_space<vmem>>, vector<2x64xf32>
    %cst_172 = arith.constant dense<0.000000e+00> : vector<2x192xf32>
    %507 = tpu.matmul %495, %7, %cst_172 {dimension_numbers = #tpu.dot_dimension_numbers<[1], [0], [0], [1], [0, 0, 1, 1], [], []>} : vector<2x64xf32>, vector<64x192xf32>, vector<2x192xf32> -> vector<2x192xf32>
    %508 = vector.broadcast %8 : vector<1x192xf32> to vector<2x192xf32>
    %509 = arith.addf %507, %508 : vector<2x192xf32>
    %510 = vector.extract_strided_slice %505 {offsets = [0, 0], sizes = [2, 64], strides = [1, 1]} : vector<2x192xf32> to vector<2x64xf32>
    %511 = vector.extract_strided_slice %509 {offsets = [0, 0], sizes = [2, 64], strides = [1, 1]} : vector<2x192xf32> to vector<2x64xf32>
    %512 = arith.addf %510, %511 : vector<2x64xf32>
    %513 = arith.negf %512 : vector<2x64xf32>
    %514 = math.exp %513 : vector<2x64xf32>
    %cst_173 = arith.constant 1.000000e+00 : f32
    %515 = vector.broadcast %cst_173 : f32 to vector<2x64xf32>
    %516 = arith.addf %515, %514 : vector<2x64xf32>
    %517 = arith.divf %515, %516 : vector<2x64xf32>
    %518 = vector.extract_strided_slice %505 {offsets = [0, 64], sizes = [2, 64], strides = [1, 1]} : vector<2x192xf32> to vector<2x64xf32>
    %519 = vector.extract_strided_slice %509 {offsets = [0, 64], sizes = [2, 64], strides = [1, 1]} : vector<2x192xf32> to vector<2x64xf32>
    %520 = arith.addf %518, %519 : vector<2x64xf32>
    %521 = arith.negf %520 : vector<2x64xf32>
    %522 = math.exp %521 : vector<2x64xf32>
    %cst_174 = arith.constant 1.000000e+00 : f32
    %523 = vector.broadcast %cst_174 : f32 to vector<2x64xf32>
    %524 = arith.addf %523, %522 : vector<2x64xf32>
    %525 = arith.divf %523, %524 : vector<2x64xf32>
    %526 = vector.extract_strided_slice %505 {offsets = [0, 128], sizes = [2, 64], strides = [1, 1]} : vector<2x192xf32> to vector<2x64xf32>
    %527 = vector.extract_strided_slice %509 {offsets = [0, 128], sizes = [2, 64], strides = [1, 1]} : vector<2x192xf32> to vector<2x64xf32>
    %528 = arith.mulf %517, %527 : vector<2x64xf32>
    %529 = arith.addf %526, %528 : vector<2x64xf32>
    %530 = math.tanh %529 : vector<2x64xf32>
    %cst_175 = arith.constant 1.000000e+00 : f32
    %531 = vector.broadcast %cst_175 : f32 to vector<2x64xf32>
    %532 = arith.subf %531, %525 : vector<2x64xf32>
    %533 = arith.mulf %532, %530 : vector<2x64xf32>
    %534 = arith.mulf %525, %495 : vector<2x64xf32>
    %535 = arith.addf %533, %534 : vector<2x64xf32>
    %536 = arith.mulf %506, %535 : vector<2x64xf32>
    %cst_176 = arith.constant 1.000000e+00 : f32
    %537 = vector.broadcast %cst_176 : f32 to vector<2x64xf32>
    %538 = arith.subf %537, %506 : vector<2x64xf32>
    %539 = arith.mulf %538, %495 : vector<2x64xf32>
    %540 = arith.addf %536, %539 : vector<2x64xf32>
    %541 = arith.mulf %506, %540 : vector<2x64xf32>
    %542 = vector.extract_strided_slice %541 {offsets = [0, 0], sizes = [1, 32], strides = [1, 1]} : vector<2x64xf32> to vector<1x32xf32>
    %c11_177 = arith.constant 11 : index
    %c0_178 = arith.constant 0 : index
    %543 = vector.load %arg22[%c11_177, %c0_178] : memref<32x32xf32, #tpu.memory_space<vmem>>, vector<1x32xf32>
    tpu.vector_store %arg22[%c11_177, %c0_178], %542 {strides = array<i32>} : memref<32x32xf32, #tpu.memory_space<vmem>>, vector<1x32xf32>,
    %544 = vector.extract_strided_slice %541 {offsets = [0, 32], sizes = [1, 32], strides = [1, 1]} : vector<2x64xf32> to vector<1x32xf32>
    %c4_179 = arith.constant 4 : index
    %c0_180 = arith.constant 0 : index
    %545 = vector.load %arg23[%c4_179, %c0_180] : memref<32x32xf32, #tpu.memory_space<vmem>>, vector<1x32xf32>
    tpu.vector_store %arg23[%c4_179, %c0_180], %544 {strides = array<i32>} : memref<32x32xf32, #tpu.memory_space<vmem>>, vector<1x32xf32>,
    %546 = vector.extract_strided_slice %541 {offsets = [1, 0], sizes = [1, 32], strides = [1, 1]} : vector<2x64xf32> to vector<1x32xf32>
    %c27_181 = arith.constant 27 : index
    %c0_182 = arith.constant 0 : index
    %547 = vector.load %arg22[%c27_181, %c0_182] : memref<32x32xf32, #tpu.memory_space<vmem>>, vector<1x32xf32>
    tpu.vector_store %arg22[%c27_181, %c0_182], %546 {strides = array<i32>} : memref<32x32xf32, #tpu.memory_space<vmem>>, vector<1x32xf32>,
    %548 = vector.extract_strided_slice %541 {offsets = [1, 32], sizes = [1, 32], strides = [1, 1]} : vector<2x64xf32> to vector<1x32xf32>
    %c20_183 = arith.constant 20 : index
    %c0_184 = arith.constant 0 : index
    %549 = vector.load %arg23[%c20_183, %c0_184] : memref<32x32xf32, #tpu.memory_space<vmem>>, vector<1x32xf32>
    tpu.vector_store %arg23[%c20_183, %c0_184], %548 {strides = array<i32>} : memref<32x32xf32, #tpu.memory_space<vmem>>, vector<1x32xf32>,
    %c24_185 = arith.constant 24 : index
    %c0_186 = arith.constant 0 : index
    %550 = vector.load %arg21[%c24_185, %c0_186] : memref<32x192xf32, #tpu.memory_space<vmem>>, vector<2x192xf32>
    %c24_187 = arith.constant 24 : index
    %c0_188 = arith.constant 0 : index
    %551 = vector.load %arg1[%c24_187, %c0_188] : memref<32x64xf32, #tpu.memory_space<vmem>>, vector<2x64xf32>
    %cst_189 = arith.constant dense<0.000000e+00> : vector<2x192xf32>
    %552 = tpu.matmul %540, %7, %cst_189 {dimension_numbers = #tpu.dot_dimension_numbers<[1], [0], [0], [1], [0, 0, 1, 1], [], []>} : vector<2x64xf32>, vector<64x192xf32>, vector<2x192xf32> -> vector<2x192xf32>
    %553 = vector.broadcast %8 : vector<1x192xf32> to vector<2x192xf32>
    %554 = arith.addf %552, %553 : vector<2x192xf32>
    %555 = vector.extract_strided_slice %550 {offsets = [0, 0], sizes = [2, 64], strides = [1, 1]} : vector<2x192xf32> to vector<2x64xf32>
    %556 = vector.extract_strided_slice %554 {offsets = [0, 0], sizes = [2, 64], strides = [1, 1]} : vector<2x192xf32> to vector<2x64xf32>
    %557 = arith.addf %555, %556 : vector<2x64xf32>
    %558 = arith.negf %557 : vector<2x64xf32>
    %559 = math.exp %558 : vector<2x64xf32>
    %cst_190 = arith.constant 1.000000e+00 : f32
    %560 = vector.broadcast %cst_190 : f32 to vector<2x64xf32>
    %561 = arith.addf %560, %559 : vector<2x64xf32>
    %562 = arith.divf %560, %561 : vector<2x64xf32>
    %563 = vector.extract_strided_slice %550 {offsets = [0, 64], sizes = [2, 64], strides = [1, 1]} : vector<2x192xf32> to vector<2x64xf32>
    %564 = vector.extract_strided_slice %554 {offsets = [0, 64], sizes = [2, 64], strides = [1, 1]} : vector<2x192xf32> to vector<2x64xf32>
    %565 = arith.addf %563, %564 : vector<2x64xf32>
    %566 = arith.negf %565 : vector<2x64xf32>
    %567 = math.exp %566 : vector<2x64xf32>
    %cst_191 = arith.constant 1.000000e+00 : f32
    %568 = vector.broadcast %cst_191 : f32 to vector<2x64xf32>
    %569 = arith.addf %568, %567 : vector<2x64xf32>
    %570 = arith.divf %568, %569 : vector<2x64xf32>
    %571 = vector.extract_strided_slice %550 {offsets = [0, 128], sizes = [2, 64], strides = [1, 1]} : vector<2x192xf32> to vector<2x64xf32>
    %572 = vector.extract_strided_slice %554 {offsets = [0, 128], sizes = [2, 64], strides = [1, 1]} : vector<2x192xf32> to vector<2x64xf32>
    %573 = arith.mulf %562, %572 : vector<2x64xf32>
    %574 = arith.addf %571, %573 : vector<2x64xf32>
    %575 = math.tanh %574 : vector<2x64xf32>
    %cst_192 = arith.constant 1.000000e+00 : f32
    %576 = vector.broadcast %cst_192 : f32 to vector<2x64xf32>
    %577 = arith.subf %576, %570 : vector<2x64xf32>
    %578 = arith.mulf %577, %575 : vector<2x64xf32>
    %579 = arith.mulf %570, %540 : vector<2x64xf32>
    %580 = arith.addf %578, %579 : vector<2x64xf32>
    %581 = arith.mulf %551, %580 : vector<2x64xf32>
    %cst_193 = arith.constant 1.000000e+00 : f32
    %582 = vector.broadcast %cst_193 : f32 to vector<2x64xf32>
    %583 = arith.subf %582, %551 : vector<2x64xf32>
    %584 = arith.mulf %583, %540 : vector<2x64xf32>
    %585 = arith.addf %581, %584 : vector<2x64xf32>
    %586 = arith.mulf %551, %585 : vector<2x64xf32>
    %587 = vector.extract_strided_slice %586 {offsets = [0, 0], sizes = [1, 32], strides = [1, 1]} : vector<2x64xf32> to vector<1x32xf32>
    %c12_194 = arith.constant 12 : index
    %c0_195 = arith.constant 0 : index
    %588 = vector.load %arg22[%c12_194, %c0_195] : memref<32x32xf32, #tpu.memory_space<vmem>>, vector<1x32xf32>
    tpu.vector_store %arg22[%c12_194, %c0_195], %587 {strides = array<i32>} : memref<32x32xf32, #tpu.memory_space<vmem>>, vector<1x32xf32>,
    %589 = vector.extract_strided_slice %586 {offsets = [0, 32], sizes = [1, 32], strides = [1, 1]} : vector<2x64xf32> to vector<1x32xf32>
    %c3_196 = arith.constant 3 : index
    %c0_197 = arith.constant 0 : index
    %590 = vector.load %arg23[%c3_196, %c0_197] : memref<32x32xf32, #tpu.memory_space<vmem>>, vector<1x32xf32>
    tpu.vector_store %arg23[%c3_196, %c0_197], %589 {strides = array<i32>} : memref<32x32xf32, #tpu.memory_space<vmem>>, vector<1x32xf32>,
    %591 = vector.extract_strided_slice %586 {offsets = [1, 0], sizes = [1, 32], strides = [1, 1]} : vector<2x64xf32> to vector<1x32xf32>
    %c28_198 = arith.constant 28 : index
    %c0_199 = arith.constant 0 : index
    %592 = vector.load %arg22[%c28_198, %c0_199] : memref<32x32xf32, #tpu.memory_space<vmem>>, vector<1x32xf32>
    tpu.vector_store %arg22[%c28_198, %c0_199], %591 {strides = array<i32>} : memref<32x32xf32, #tpu.memory_space<vmem>>, vector<1x32xf32>,
    %593 = vector.extract_strided_slice %586 {offsets = [1, 32], sizes = [1, 32], strides = [1, 1]} : vector<2x64xf32> to vector<1x32xf32>
    %c19_200 = arith.constant 19 : index
    %c0_201 = arith.constant 0 : index
    %594 = vector.load %arg23[%c19_200, %c0_201] : memref<32x32xf32, #tpu.memory_space<vmem>>, vector<1x32xf32>
    tpu.vector_store %arg23[%c19_200, %c0_201], %593 {strides = array<i32>} : memref<32x32xf32, #tpu.memory_space<vmem>>, vector<1x32xf32>,
    %c26_202 = arith.constant 26 : index
    %c0_203 = arith.constant 0 : index
    %595 = vector.load %arg21[%c26_202, %c0_203] : memref<32x192xf32, #tpu.memory_space<vmem>>, vector<2x192xf32>
    %c26_204 = arith.constant 26 : index
    %c0_205 = arith.constant 0 : index
    %596 = vector.load %arg1[%c26_204, %c0_205] : memref<32x64xf32, #tpu.memory_space<vmem>>, vector<2x64xf32>
    %cst_206 = arith.constant dense<0.000000e+00> : vector<2x192xf32>
    %597 = tpu.matmul %585, %7, %cst_206 {dimension_numbers = #tpu.dot_dimension_numbers<[1], [0], [0], [1], [0, 0, 1, 1], [], []>} : vector<2x64xf32>, vector<64x192xf32>, vector<2x192xf32> -> vector<2x192xf32>
    %598 = vector.broadcast %8 : vector<1x192xf32> to vector<2x192xf32>
    %599 = arith.addf %597, %598 : vector<2x192xf32>
    %600 = vector.extract_strided_slice %595 {offsets = [0, 0], sizes = [2, 64], strides = [1, 1]} : vector<2x192xf32> to vector<2x64xf32>
    %601 = vector.extract_strided_slice %599 {offsets = [0, 0], sizes = [2, 64], strides = [1, 1]} : vector<2x192xf32> to vector<2x64xf32>
    %602 = arith.addf %600, %601 : vector<2x64xf32>
    %603 = arith.negf %602 : vector<2x64xf32>
    %604 = math.exp %603 : vector<2x64xf32>
    %cst_207 = arith.constant 1.000000e+00 : f32
    %605 = vector.broadcast %cst_207 : f32 to vector<2x64xf32>
    %606 = arith.addf %605, %604 : vector<2x64xf32>
    %607 = arith.divf %605, %606 : vector<2x64xf32>
    %608 = vector.extract_strided_slice %595 {offsets = [0, 64], sizes = [2, 64], strides = [1, 1]} : vector<2x192xf32> to vector<2x64xf32>
    %609 = vector.extract_strided_slice %599 {offsets = [0, 64], sizes = [2, 64], strides = [1, 1]} : vector<2x192xf32> to vector<2x64xf32>
    %610 = arith.addf %608, %609 : vector<2x64xf32>
    %611 = arith.negf %610 : vector<2x64xf32>
    %612 = math.exp %611 : vector<2x64xf32>
    %cst_208 = arith.constant 1.000000e+00 : f32
    %613 = vector.broadcast %cst_208 : f32 to vector<2x64xf32>
    %614 = arith.addf %613, %612 : vector<2x64xf32>
    %615 = arith.divf %613, %614 : vector<2x64xf32>
    %616 = vector.extract_strided_slice %595 {offsets = [0, 128], sizes = [2, 64], strides = [1, 1]} : vector<2x192xf32> to vector<2x64xf32>
    %617 = vector.extract_strided_slice %599 {offsets = [0, 128], sizes = [2, 64], strides = [1, 1]} : vector<2x192xf32> to vector<2x64xf32>
    %618 = arith.mulf %607, %617 : vector<2x64xf32>
    %619 = arith.addf %616, %618 : vector<2x64xf32>
    %620 = math.tanh %619 : vector<2x64xf32>
    %cst_209 = arith.constant 1.000000e+00 : f32
    %621 = vector.broadcast %cst_209 : f32 to vector<2x64xf32>
    %622 = arith.subf %621, %615 : vector<2x64xf32>
    %623 = arith.mulf %622, %620 : vector<2x64xf32>
    %624 = arith.mulf %615, %585 : vector<2x64xf32>
    %625 = arith.addf %623, %624 : vector<2x64xf32>
    %626 = arith.mulf %596, %625 : vector<2x64xf32>
    %cst_210 = arith.constant 1.000000e+00 : f32
    %627 = vector.broadcast %cst_210 : f32 to vector<2x64xf32>
    %628 = arith.subf %627, %596 : vector<2x64xf32>
    %629 = arith.mulf %628, %585 : vector<2x64xf32>
    %630 = arith.addf %626, %629 : vector<2x64xf32>
    %631 = arith.mulf %596, %630 : vector<2x64xf32>
    %632 = vector.extract_strided_slice %631 {offsets = [0, 0], sizes = [1, 32], strides = [1, 1]} : vector<2x64xf32> to vector<1x32xf32>
    %c13_211 = arith.constant 13 : index
    %c0_212 = arith.constant 0 : index
    %633 = vector.load %arg22[%c13_211, %c0_212] : memref<32x32xf32, #tpu.memory_space<vmem>>, vector<1x32xf32>
    tpu.vector_store %arg22[%c13_211, %c0_212], %632 {strides = array<i32>} : memref<32x32xf32, #tpu.memory_space<vmem>>, vector<1x32xf32>,
    %634 = vector.extract_strided_slice %631 {offsets = [0, 32], sizes = [1, 32], strides = [1, 1]} : vector<2x64xf32> to vector<1x32xf32>
    %c2_213 = arith.constant 2 : index
    %c0_214 = arith.constant 0 : index
    %635 = vector.load %arg23[%c2_213, %c0_214] : memref<32x32xf32, #tpu.memory_space<vmem>>, vector<1x32xf32>
    tpu.vector_store %arg23[%c2_213, %c0_214], %634 {strides = array<i32>} : memref<32x32xf32, #tpu.memory_space<vmem>>, vector<1x32xf32>,
    %636 = vector.extract_strided_slice %631 {offsets = [1, 0], sizes = [1, 32], strides = [1, 1]} : vector<2x64xf32> to vector<1x32xf32>
    %c29_215 = arith.constant 29 : index
    %c0_216 = arith.constant 0 : index
    %637 = vector.load %arg22[%c29_215, %c0_216] : memref<32x32xf32, #tpu.memory_space<vmem>>, vector<1x32xf32>
    tpu.vector_store %arg22[%c29_215, %c0_216], %636 {strides = array<i32>} : memref<32x32xf32, #tpu.memory_space<vmem>>, vector<1x32xf32>,
    %638 = vector.extract_strided_slice %631 {offsets = [1, 32], sizes = [1, 32], strides = [1, 1]} : vector<2x64xf32> to vector<1x32xf32>
    %c18_217 = arith.constant 18 : index
    %c0_218 = arith.constant 0 : index
    %639 = vector.load %arg23[%c18_217, %c0_218] : memref<32x32xf32, #tpu.memory_space<vmem>>, vector<1x32xf32>
    tpu.vector_store %arg23[%c18_217, %c0_218], %638 {strides = array<i32>} : memref<32x32xf32, #tpu.memory_space<vmem>>, vector<1x32xf32>,
    %c28_219 = arith.constant 28 : index
    %c0_220 = arith.constant 0 : index
    %640 = vector.load %arg21[%c28_219, %c0_220] : memref<32x192xf32, #tpu.memory_space<vmem>>, vector<2x192xf32>
    %c28_221 = arith.constant 28 : index
    %c0_222 = arith.constant 0 : index
    %641 = vector.load %arg1[%c28_221, %c0_222] : memref<32x64xf32, #tpu.memory_space<vmem>>, vector<2x64xf32>
    %cst_223 = arith.constant dense<0.000000e+00> : vector<2x192xf32>
    %642 = tpu.matmul %630, %7, %cst_223 {dimension_numbers = #tpu.dot_dimension_numbers<[1], [0], [0], [1], [0, 0, 1, 1], [], []>} : vector<2x64xf32>, vector<64x192xf32>, vector<2x192xf32> -> vector<2x192xf32>
    %643 = vector.broadcast %8 : vector<1x192xf32> to vector<2x192xf32>
    %644 = arith.addf %642, %643 : vector<2x192xf32>
    %645 = vector.extract_strided_slice %640 {offsets = [0, 0], sizes = [2, 64], strides = [1, 1]} : vector<2x192xf32> to vector<2x64xf32>
    %646 = vector.extract_strided_slice %644 {offsets = [0, 0], sizes = [2, 64], strides = [1, 1]} : vector<2x192xf32> to vector<2x64xf32>
    %647 = arith.addf %645, %646 : vector<2x64xf32>
    %648 = arith.negf %647 : vector<2x64xf32>
    %649 = math.exp %648 : vector<2x64xf32>
    %cst_224 = arith.constant 1.000000e+00 : f32
    %650 = vector.broadcast %cst_224 : f32 to vector<2x64xf32>
    %651 = arith.addf %650, %649 : vector<2x64xf32>
    %652 = arith.divf %650, %651 : vector<2x64xf32>
    %653 = vector.extract_strided_slice %640 {offsets = [0, 64], sizes = [2, 64], strides = [1, 1]} : vector<2x192xf32> to vector<2x64xf32>
    %654 = vector.extract_strided_slice %644 {offsets = [0, 64], sizes = [2, 64], strides = [1, 1]} : vector<2x192xf32> to vector<2x64xf32>
    %655 = arith.addf %653, %654 : vector<2x64xf32>
    %656 = arith.negf %655 : vector<2x64xf32>
    %657 = math.exp %656 : vector<2x64xf32>
    %cst_225 = arith.constant 1.000000e+00 : f32
    %658 = vector.broadcast %cst_225 : f32 to vector<2x64xf32>
    %659 = arith.addf %658, %657 : vector<2x64xf32>
    %660 = arith.divf %658, %659 : vector<2x64xf32>
    %661 = vector.extract_strided_slice %640 {offsets = [0, 128], sizes = [2, 64], strides = [1, 1]} : vector<2x192xf32> to vector<2x64xf32>
    %662 = vector.extract_strided_slice %644 {offsets = [0, 128], sizes = [2, 64], strides = [1, 1]} : vector<2x192xf32> to vector<2x64xf32>
    %663 = arith.mulf %652, %662 : vector<2x64xf32>
    %664 = arith.addf %661, %663 : vector<2x64xf32>
    %665 = math.tanh %664 : vector<2x64xf32>
    %cst_226 = arith.constant 1.000000e+00 : f32
    %666 = vector.broadcast %cst_226 : f32 to vector<2x64xf32>
    %667 = arith.subf %666, %660 : vector<2x64xf32>
    %668 = arith.mulf %667, %665 : vector<2x64xf32>
    %669 = arith.mulf %660, %630 : vector<2x64xf32>
    %670 = arith.addf %668, %669 : vector<2x64xf32>
    %671 = arith.mulf %641, %670 : vector<2x64xf32>
    %cst_227 = arith.constant 1.000000e+00 : f32
    %672 = vector.broadcast %cst_227 : f32 to vector<2x64xf32>
    %673 = arith.subf %672, %641 : vector<2x64xf32>
    %674 = arith.mulf %673, %630 : vector<2x64xf32>
    %675 = arith.addf %671, %674 : vector<2x64xf32>
    %676 = arith.mulf %641, %675 : vector<2x64xf32>
    %677 = vector.extract_strided_slice %676 {offsets = [0, 0], sizes = [1, 32], strides = [1, 1]} : vector<2x64xf32> to vector<1x32xf32>
    %c14_228 = arith.constant 14 : index
    %c0_229 = arith.constant 0 : index
    %678 = vector.load %arg22[%c14_228, %c0_229] : memref<32x32xf32, #tpu.memory_space<vmem>>, vector<1x32xf32>
    tpu.vector_store %arg22[%c14_228, %c0_229], %677 {strides = array<i32>} : memref<32x32xf32, #tpu.memory_space<vmem>>, vector<1x32xf32>,
    %679 = vector.extract_strided_slice %676 {offsets = [0, 32], sizes = [1, 32], strides = [1, 1]} : vector<2x64xf32> to vector<1x32xf32>
    %c1_230 = arith.constant 1 : index
    %c0_231 = arith.constant 0 : index
    %680 = vector.load %arg23[%c1_230, %c0_231] : memref<32x32xf32, #tpu.memory_space<vmem>>, vector<1x32xf32>
    tpu.vector_store %arg23[%c1_230, %c0_231], %679 {strides = array<i32>} : memref<32x32xf32, #tpu.memory_space<vmem>>, vector<1x32xf32>,
    %681 = vector.extract_strided_slice %676 {offsets = [1, 0], sizes = [1, 32], strides = [1, 1]} : vector<2x64xf32> to vector<1x32xf32>
    %c30_232 = arith.constant 30 : index
    %c0_233 = arith.constant 0 : index
    %682 = vector.load %arg22[%c30_232, %c0_233] : memref<32x32xf32, #tpu.memory_space<vmem>>, vector<1x32xf32>
    tpu.vector_store %arg22[%c30_232, %c0_233], %681 {strides = array<i32>} : memref<32x32xf32, #tpu.memory_space<vmem>>, vector<1x32xf32>,
    %683 = vector.extract_strided_slice %676 {offsets = [1, 32], sizes = [1, 32], strides = [1, 1]} : vector<2x64xf32> to vector<1x32xf32>
    %c17_234 = arith.constant 17 : index
    %c0_235 = arith.constant 0 : index
    %684 = vector.load %arg23[%c17_234, %c0_235] : memref<32x32xf32, #tpu.memory_space<vmem>>, vector<1x32xf32>
    tpu.vector_store %arg23[%c17_234, %c0_235], %683 {strides = array<i32>} : memref<32x32xf32, #tpu.memory_space<vmem>>, vector<1x32xf32>,
    %c30_236 = arith.constant 30 : index
    %c0_237 = arith.constant 0 : index
    %685 = vector.load %arg21[%c30_236, %c0_237] : memref<32x192xf32, #tpu.memory_space<vmem>>, vector<2x192xf32>
    %c30_238 = arith.constant 30 : index
    %c0_239 = arith.constant 0 : index
    %686 = vector.load %arg1[%c30_238, %c0_239] : memref<32x64xf32, #tpu.memory_space<vmem>>, vector<2x64xf32>
    %cst_240 = arith.constant dense<0.000000e+00> : vector<2x192xf32>
    %687 = tpu.matmul %675, %7, %cst_240 {dimension_numbers = #tpu.dot_dimension_numbers<[1], [0], [0], [1], [0, 0, 1, 1], [], []>} : vector<2x64xf32>, vector<64x192xf32>, vector<2x192xf32> -> vector<2x192xf32>
    %688 = vector.broadcast %8 : vector<1x192xf32> to vector<2x192xf32>
    %689 = arith.addf %687, %688 : vector<2x192xf32>
    %690 = vector.extract_strided_slice %685 {offsets = [0, 0], sizes = [2, 64], strides = [1, 1]} : vector<2x192xf32> to vector<2x64xf32>
    %691 = vector.extract_strided_slice %689 {offsets = [0, 0], sizes = [2, 64], strides = [1, 1]} : vector<2x192xf32> to vector<2x64xf32>
    %692 = arith.addf %690, %691 : vector<2x64xf32>
    %693 = arith.negf %692 : vector<2x64xf32>
    %694 = math.exp %693 : vector<2x64xf32>
    %cst_241 = arith.constant 1.000000e+00 : f32
    %695 = vector.broadcast %cst_241 : f32 to vector<2x64xf32>
    %696 = arith.addf %695, %694 : vector<2x64xf32>
    %697 = arith.divf %695, %696 : vector<2x64xf32>
    %698 = vector.extract_strided_slice %685 {offsets = [0, 64], sizes = [2, 64], strides = [1, 1]} : vector<2x192xf32> to vector<2x64xf32>
    %699 = vector.extract_strided_slice %689 {offsets = [0, 64], sizes = [2, 64], strides = [1, 1]} : vector<2x192xf32> to vector<2x64xf32>
    %700 = arith.addf %698, %699 : vector<2x64xf32>
    %701 = arith.negf %700 : vector<2x64xf32>
    %702 = math.exp %701 : vector<2x64xf32>
    %cst_242 = arith.constant 1.000000e+00 : f32
    %703 = vector.broadcast %cst_242 : f32 to vector<2x64xf32>
    %704 = arith.addf %703, %702 : vector<2x64xf32>
    %705 = arith.divf %703, %704 : vector<2x64xf32>
    %706 = vector.extract_strided_slice %685 {offsets = [0, 128], sizes = [2, 64], strides = [1, 1]} : vector<2x192xf32> to vector<2x64xf32>
    %707 = vector.extract_strided_slice %689 {offsets = [0, 128], sizes = [2, 64], strides = [1, 1]} : vector<2x192xf32> to vector<2x64xf32>
    %708 = arith.mulf %697, %707 : vector<2x64xf32>
    %709 = arith.addf %706, %708 : vector<2x64xf32>
    %710 = math.tanh %709 : vector<2x64xf32>
    %cst_243 = arith.constant 1.000000e+00 : f32
    %711 = vector.broadcast %cst_243 : f32 to vector<2x64xf32>
    %712 = arith.subf %711, %705 : vector<2x64xf32>
    %713 = arith.mulf %712, %710 : vector<2x64xf32>
    %714 = arith.mulf %705, %675 : vector<2x64xf32>
    %715 = arith.addf %713, %714 : vector<2x64xf32>
    %716 = arith.mulf %686, %715 : vector<2x64xf32>
    %cst_244 = arith.constant 1.000000e+00 : f32
    %717 = vector.broadcast %cst_244 : f32 to vector<2x64xf32>
    %718 = arith.subf %717, %686 : vector<2x64xf32>
    %719 = arith.mulf %718, %675 : vector<2x64xf32>
    %720 = arith.addf %716, %719 : vector<2x64xf32>
    %721 = arith.mulf %686, %720 : vector<2x64xf32>
    %722 = vector.extract_strided_slice %721 {offsets = [0, 0], sizes = [1, 32], strides = [1, 1]} : vector<2x64xf32> to vector<1x32xf32>
    %c15_245 = arith.constant 15 : index
    %c0_246 = arith.constant 0 : index
    %723 = vector.load %arg22[%c15_245, %c0_246] : memref<32x32xf32, #tpu.memory_space<vmem>>, vector<1x32xf32>
    tpu.vector_store %arg22[%c15_245, %c0_246], %722 {strides = array<i32>} : memref<32x32xf32, #tpu.memory_space<vmem>>, vector<1x32xf32>,
    %724 = vector.extract_strided_slice %721 {offsets = [0, 32], sizes = [1, 32], strides = [1, 1]} : vector<2x64xf32> to vector<1x32xf32>
    %c0_247 = arith.constant 0 : index
    %c0_248 = arith.constant 0 : index
    %725 = vector.load %arg23[%c0_247, %c0_248] : memref<32x32xf32, #tpu.memory_space<vmem>>, vector<1x32xf32>
    tpu.vector_store %arg23[%c0_247, %c0_248], %724 {strides = array<i32>} : memref<32x32xf32, #tpu.memory_space<vmem>>, vector<1x32xf32>,
    %726 = vector.extract_strided_slice %721 {offsets = [1, 0], sizes = [1, 32], strides = [1, 1]} : vector<2x64xf32> to vector<1x32xf32>
    %c31_249 = arith.constant 31 : index
    %c0_250 = arith.constant 0 : index
    %727 = vector.load %arg22[%c31_249, %c0_250] : memref<32x32xf32, #tpu.memory_space<vmem>>, vector<1x32xf32>
    tpu.vector_store %arg22[%c31_249, %c0_250], %726 {strides = array<i32>} : memref<32x32xf32, #tpu.memory_space<vmem>>, vector<1x32xf32>,
    %728 = vector.extract_strided_slice %721 {offsets = [1, 32], sizes = [1, 32], strides = [1, 1]} : vector<2x64xf32> to vector<1x32xf32>
    %c16_251 = arith.constant 16 : index
    %c0_252 = arith.constant 0 : index
    %729 = vector.load %arg23[%c16_251, %c0_252] : memref<32x32xf32, #tpu.memory_space<vmem>>, vector<1x32xf32>
    tpu.vector_store %arg23[%c16_251, %c0_252], %728 {strides = array<i32>} : memref<32x32xf32, #tpu.memory_space<vmem>>, vector<1x32xf32>,
    %c0_253 = arith.constant 0 : index
    %c0_254 = arith.constant 0 : index
    %730 = vector.load %arg22[%c0_253, %c0_254] : memref<32x32xf32, #tpu.memory_space<vmem>>, vector<32x32xf32>
    %c0_255 = arith.constant 0 : index
    %c0_256 = arith.constant 0 : index
    %731 = vector.load %arg23[%c0_255, %c0_256] : memref<32x32xf32, #tpu.memory_space<vmem>>, vector<32x32xf32>
    %732 = tpu.concatenate %730, %731 in 1 : vector<32x32xf32>, vector<32x32xf32> -> vector<32x64xf32>
    %c0_257 = arith.constant 0 : index
    %c0_258 = arith.constant 0 : index
    %733 = vector.load %arg6[%c0_257, %c0_258] : memref<32x32xf32, #tpu.memory_space<vmem>>, vector<32x32xf32>
    %c0_259 = arith.constant 0 : index
    %c0_260 = arith.constant 0 : index
    %734 = vector.load %arg11[%c0_259, %c0_260] : memref<64x64xf32, #tpu.memory_space<vmem>>, vector<64x64xf32>
    %cst_261 = arith.constant dense<0.000000e+00> : vector<32x64xf32>
    %735 = tpu.matmul %732, %734, %cst_261 {dimension_numbers = #tpu.dot_dimension_numbers<[1], [0], [0], [1], [0, 0, 1, 1], [], []>} : vector<32x64xf32>, vector<64x64xf32>, vector<32x64xf32> -> vector<32x64xf32>
    %cst_262 = arith.constant dense<0.000000e+00> : vector<32x64xf32>
    %736 = tpu.matmul %733, %735, %cst_262 {dimension_numbers = #tpu.dot_dimension_numbers<[1], [0], [0], [1], [0, 0, 1, 1], [], []>} : vector<32x32xf32>, vector<32x64xf32>, vector<32x64xf32> -> vector<32x64xf32>
    %cst_263 = arith.constant 0.000000e+00 : f32
    %737 = vector.broadcast %cst_263 : f32 to vector<32x64xf32>
    %738 = arith.maximumf %736, %737 : vector<32x64xf32>
    %c0_264 = arith.constant 0 : index
    %c0_265 = arith.constant 0 : index
    %739 = vector.load %arg12[%c0_264, %c0_265] : memref<64x64xf32, #tpu.memory_space<vmem>>, vector<64x64xf32>
    %cst_266 = arith.constant dense<0.000000e+00> : vector<32x64xf32>
    %740 = tpu.matmul %738, %739, %cst_266 {dimension_numbers = #tpu.dot_dimension_numbers<[1], [0], [0], [1], [0, 0, 1, 1], [], []>} : vector<32x64xf32>, vector<64x64xf32>, vector<32x64xf32> -> vector<32x64xf32>
    %cst_267 = arith.constant dense<0.000000e+00> : vector<32x64xf32>
    %741 = tpu.matmul %733, %740, %cst_267 {dimension_numbers = #tpu.dot_dimension_numbers<[1], [0], [0], [1], [0, 0, 1, 1], [], []>} : vector<32x32xf32>, vector<32x64xf32>, vector<32x64xf32> -> vector<32x64xf32>
    %cst_268 = arith.constant 0.000000e+00 : f32
    %742 = vector.broadcast %cst_268 : f32 to vector<32x64xf32>
    %743 = arith.maximumf %741, %742 : vector<32x64xf32>
    %744 = arith.addf %732, %743 : vector<32x64xf32>
    %c0_269 = arith.constant 0 : index
    %c0_270 = arith.constant 0 : index
    %745 = vector.load %arg7[%c0_269, %c0_270] : memref<2x32xf32, #tpu.memory_space<vmem>>, vector<2x32xf32>
    %cst_271 = arith.constant dense<0.000000e+00> : vector<2x64xf32>
    %746 = tpu.matmul %745, %744, %cst_271 {dimension_numbers = #tpu.dot_dimension_numbers<[1], [0], [0], [1], [0, 0, 1, 1], [], []>} : vector<2x32xf32>, vector<32x64xf32>, vector<2x64xf32> -> vector<2x64xf32>
    %c0_272 = arith.constant 0 : index
    %c0_273 = arith.constant 0 : index
    %747 = vector.load %arg8[%c0_272, %c0_273] : memref<2x32xf32, #tpu.memory_space<vmem>>, vector<2x32xf32>
    %cst_274 = arith.constant dense<0.000000e+00> : vector<2x64xf32>
    %748 = tpu.matmul %747, %744, %cst_274 {dimension_numbers = #tpu.dot_dimension_numbers<[1], [0], [0], [1], [0, 0, 1, 1], [], []>} : vector<2x32xf32>, vector<32x64xf32>, vector<2x64xf32> -> vector<2x64xf32>
    %749 = arith.addf %746, %748 : vector<2x64xf32>
    %cst_275 = arith.constant 5.000000e-01 : f32
    %750 = vector.broadcast %cst_275 : f32 to vector<2x64xf32>
    %751 = arith.mulf %749, %750 : vector<2x64xf32>
    %c0_276 = arith.constant 0 : index
    %c0_277 = arith.constant 0 : index
    %752 = vector.load %arg13[%c0_276, %c0_277] : memref<64x64xf32, #tpu.memory_space<vmem>>, vector<64x64xf32>
    %cst_278 = arith.constant dense<0.000000e+00> : vector<2x64xf32>
    %753 = tpu.matmul %751, %752, %cst_278 {dimension_numbers = #tpu.dot_dimension_numbers<[1], [0], [0], [1], [0, 0, 1, 1], [], []>} : vector<2x64xf32>, vector<64x64xf32>, vector<2x64xf32> -> vector<2x64xf32>
    %c0_279 = arith.constant 0 : index
    %c0_280 = arith.constant 0 : index
    %754 = vector.load %arg14[%c0_279, %c0_280] : memref<1x64xf32, #tpu.memory_space<vmem>>, vector<1x64xf32>
    %755 = vector.broadcast %754 : vector<1x64xf32> to vector<2x64xf32>
    %756 = arith.addf %753, %755 : vector<2x64xf32>
    %757 = vector.shape_cast %744 : vector<32x64xf32> to vector<2x16x64xf32>
    %758 = vector.shape_cast %756 : vector<2x64xf32> to vector<2x1x64xf32>
    %759 = vector.broadcast %758 : vector<2x1x64xf32> to vector<2x16x64xf32>
    %760 = arith.mulf %757, %759 : vector<2x16x64xf32>
    %cst_281 = arith.constant dense<0.000000e+00> : vector<2x16xf32>
    %761 = vector.multi_reduction <add>, %760, %cst_281 [2] : vector<2x16x64xf32> to vector<2x16xf32>
    %c0_282 = arith.constant 0 : index
    %c0_283 = arith.constant 0 : index
    %762 = vector.load %arg9[%c0_282, %c0_283] : memref<2x16xf32, #tpu.memory_space<vmem>>, vector<2x16xf32>
    %cst_284 = arith.constant 0.000000e+00 : f32
    %763 = vector.broadcast %cst_284 : f32 to vector<2x16xf32>
    %764 = arith.cmpf ogt, %762, %763 : vector<2x16xf32>
    %cst_285 = arith.constant -1.000000e+30 : f32
    %765 = vector.broadcast %cst_285 : f32 to vector<2x16xf32>
    %766 = arith.select %764, %761, %765 : vector<2x16xi1>, vector<2x16xf32>
    %cst_286 = arith.constant dense<0xFF800000> : vector<2xf32>
    %767 = vector.multi_reduction <maximumf>, %766, %cst_286 [1] : vector<2x16xf32> to vector<2xf32>
    %768 = vector.shape_cast %767 : vector<2xf32> to vector<2x1xf32>
    %769 = vector.broadcast %768 : vector<2x1xf32> to vector<2x16xf32>
    %770 = arith.subf %766, %769 : vector<2x16xf32>
    %771 = math.exp %770 : vector<2x16xf32>
    %cst_287 = arith.constant dense<0.000000e+00> : vector<2xf32>
    %772 = vector.multi_reduction <add>, %771, %cst_287 [1] : vector<2x16xf32> to vector<2xf32>
    %773 = vector.shape_cast %772 : vector<2xf32> to vector<2x1xf32>
    %774 = tpu.reciprocal %773 {approx = true} : vector<2x1xf32> -> vector<2x1xf32>
    %775 = vector.broadcast %774 : vector<2x1xf32> to vector<2x16xf32>
    %776 = arith.mulf %771, %775 : vector<2x16xf32>
    %777 = vector.shape_cast %776 : vector<2x16xf32> to vector<2x16x1xf32>
    %778 = vector.broadcast %777 : vector<2x16x1xf32> to vector<2x16x64xf32>
    %779 = arith.mulf %757, %778 : vector<2x16x64xf32>
    %cst_288 = arith.constant dense<0.000000e+00> : vector<2x64xf32>
    %780 = vector.multi_reduction <add>, %779, %cst_288 [1] : vector<2x16x64xf32> to vector<2x64xf32>
    %c0_289 = arith.constant 0 : index
    %c0_290 = arith.constant 0 : index
    %781 = vector.load %arg15[%c0_289, %c0_290] : memref<176x32xf32, #tpu.memory_space<vmem>>, vector<64x32xf32>
    %cst_291 = arith.constant dense<0.000000e+00> : vector<2x32xf32>
    %782 = tpu.matmul %756, %781, %cst_291 {dimension_numbers = #tpu.dot_dimension_numbers<[1], [0], [0], [1], [0, 0, 1, 1], [], []>} : vector<2x64xf32>, vector<64x32xf32>, vector<2x32xf32> -> vector<2x32xf32>
    %c64 = arith.constant 64 : index
    %c0_292 = arith.constant 0 : index
    %783 = vector.load %arg15[%c64, %c0_292] : memref<176x32xf32, #tpu.memory_space<vmem>>, vector<64x32xf32>
    %cst_293 = arith.constant dense<0.000000e+00> : vector<2x32xf32>
    %784 = tpu.matmul %780, %783, %cst_293 {dimension_numbers = #tpu.dot_dimension_numbers<[1], [0], [0], [1], [0, 0, 1, 1], [], []>} : vector<2x64xf32>, vector<64x32xf32>, vector<2x32xf32> -> vector<2x32xf32>
    %785 = arith.addf %782, %784 : vector<2x32xf32>
    %c0_294 = arith.constant 0 : index
    %c0_295 = arith.constant 0 : index
    %786 = vector.load %arg10[%c0_294, %c0_295] : memref<2x48xf32, #tpu.memory_space<vmem>>, vector<2x48xf32>
    %c128 = arith.constant 128 : index
    %c0_296 = arith.constant 0 : index
    %787 = vector.load %arg15[%c128, %c0_296] : memref<176x32xf32, #tpu.memory_space<vmem>>, vector<48x32xf32>
    %cst_297 = arith.constant dense<0.000000e+00> : vector<2x32xf32>
    %788 = tpu.matmul %786, %787, %cst_297 {dimension_numbers = #tpu.dot_dimension_numbers<[1], [0], [0], [1], [0, 0, 1, 1], [], []>} : vector<2x48xf32>, vector<48x32xf32>, vector<2x32xf32> -> vector<2x32xf32>
    %789 = arith.addf %785, %788 : vector<2x32xf32>
    %c0_298 = arith.constant 0 : index
    %c0_299 = arith.constant 0 : index
    %790 = vector.load %arg16[%c0_298, %c0_299] : memref<1x32xf32, #tpu.memory_space<vmem>>, vector<1x32xf32>
    %791 = vector.broadcast %790 : vector<1x32xf32> to vector<2x32xf32>
    %792 = arith.addf %789, %791 : vector<2x32xf32>
    %c0_300 = arith.constant 0 : index
    %c0_301 = arith.constant 0 : index
    %c0_302 = arith.constant 0 : index
    %793 = vector.load %arg17[%c0_300, %c0_301, %c0_302] : memref<2x16x64xf32, #tpu.memory_space<vmem>>, vector<2x16x64xf32>
    tpu.vector_store %arg17[%c0_300, %c0_301, %c0_302], %757 {strides = array<i32>} : memref<2x16x64xf32, #tpu.memory_space<vmem>>, vector<2x16x64xf32>,
    %794 = vector.extract_strided_slice %720 {offsets = [0, 0], sizes = [2, 32], strides = [1, 1]} : vector<2x64xf32> to vector<2x32xf32>
    %795 = vector.extract_strided_slice %720 {offsets = [0, 32], sizes = [2, 32], strides = [1, 1]} : vector<2x64xf32> to vector<2x32xf32>
    %796 = arith.addf %794, %795 : vector<2x32xf32>
    %cst_303 = arith.constant 5.000000e-01 : f32
    %797 = vector.broadcast %cst_303 : f32 to vector<2x32xf32>
    %798 = arith.mulf %796, %797 : vector<2x32xf32>
    %c0_304 = arith.constant 0 : index
    %c0_305 = arith.constant 0 : index
    %c0_306 = arith.constant 0 : index
    %799 = vector.load %arg18[%c0_304, %c0_305, %c0_306] : memref<1x2x32xf32, #tpu.memory_space<vmem>>, vector<1x2x32xf32>
    %800 = vector.shape_cast %799 : vector<1x2x32xf32> to vector<2x32xf32>
    %801 = vector.shape_cast %798 : vector<2x32xf32> to vector<1x2x32xf32>
    tpu.vector_store %arg18[%c0_304, %c0_305, %c0_306], %801 {strides = array<i32>} : memref<1x2x32xf32, #tpu.memory_space<vmem>>, vector<1x2x32xf32>,
    %cst_307 = arith.constant 0.000000e+00 : f32
    %802 = vector.broadcast %cst_307 : f32 to vector<2x32xf32>
    %803 = arith.maximumf %792, %802 : vector<2x32xf32>
    %c0_308 = arith.constant 0 : index
    %c0_309 = arith.constant 0 : index
    %804 = vector.load %arg19[%c0_308, %c0_309] : memref<2x32xf32, #tpu.memory_space<vmem>>, vector<2x32xf32>
    tpu.vector_store %arg19[%c0_308, %c0_309], %803 {strides = array<i32>} : memref<2x32xf32, #tpu.memory_space<vmem>>, vector<2x32xf32>,
    %805 = arith.addf %746, %748 : vector<2x64xf32>
    %806 = arith.subf %746, %748 : vector<2x64xf32>
    %807 = tpu.concatenate %805, %806 in 1 : vector<2x64xf32>, vector<2x64xf32> -> vector<2x128xf32>
    %c0_310 = arith.constant 0 : index
    %c0_311 = arith.constant 0 : index
    %808 = vector.load %arg20[%c0_310, %c0_311] : memref<2x128xf32, #tpu.memory_space<vmem>>, vector<2x128xf32>
    tpu.vector_store %arg20[%c0_310, %c0_311], %807 {strides = array<i32>} : memref<2x128xf32, #tpu.memory_space<vmem>>, vector<2x128xf32>,
    return
  }
}

</mosaic_0001>

<bundles_post_ra>
// kernel: encoder_forward.1
= control target key start
LH: loop header
LB: loop body
LE: loop exit
PB: predicated region body
PF: predicated region fallthrough
CT: control target
= control target key end

     0   :  { %s5183_s0 = inlined_call_operand.vmem [shape: f32[32,96], index: 0, kind: input, shape index: {}]   ;;  %s5184_s1 = inlined_call_operand.vmem [shape: f32[32,64], index: 1, kind: input, shape index: {}]   ;;  %s5185_s2 = inlined_call_operand.vmem [shape: f32[96,192], index: 2, kind: input, shape index: {}]   ;;  %s5186_s3 = inlined_call_operand.vmem [shape: f32[64,192], index: 3, kind: input, shape index: {}]   ;;  %s5187_s4 = inlined_call_operand.vmem [shape: f32[1,192], index: 4, kind: input, shape index: {}]   ;;  %s5188_s5 = inlined_call_operand.vmem [shape: f32[1,192], index: 5, kind: input, shape index: {}]   ;;  %s5189_s6 = inlined_call_operand.vmem [shape: f32[32,32], index: 6, kind: input, shape index: {}]   ;;  %s5190_s7 = inlined_call_operand.vmem [shape: f32[2,32], index: 7, kind: input, shape index: {}]   ;;  %s5191_s8 = inlined_call_operand.vmem [shape: f32[2,32], index: 8, kind: input, shape index: {}]   ;;  %s5192_s9 = inlined_call_operand.vmem [shape: f32[2,16], index: 9, kind: input, shape index: {}]   ;;  %s5193_s10 = inlined_call_operand.vmem [shape: f32[2,48], index: 10, kind: input, shape index: {}]   ;;  %s5194_s11 = inlined_call_operand.vmem [shape: f32[64,64], index: 11, kind: input, shape index: {}]   ;;  %s5195_s12 = inlined_call_operand.vmem [shape: f32[64,64], index: 12, kind: input, shape index: {}]   ;;  %s5196_s13 = inlined_call_operand.vmem [shape: f32[64,64], index: 13, kind: input, shape index: {}]   ;;  %s5197_s14 = inlined_call_operand.vmem [shape: f32[1,64], index: 14, kind: input, shape index: {}]   ;;  %s5198_s15 = inlined_call_operand.vmem [shape: f32[176,32], index: 15, kind: input, shape index: {}]   ;;  %s5199_s16 = inlined_call_operand.vmem [shape: f32[1,32], index: 16, kind: input, shape index: {}]   ;;  %s5200_s17 = inlined_call_operand.hbm [shape: f32[2,16,64], index: 17, kind: output, shape index: {0}]   ;;  %s5201_s18 = inlined_call_operand.hbm [shape: f32[1,2,32], index: 18, kind: output, shape index: {1}]   ;;  %s5202_s19 = inlined_call_operand.hbm [shape: f32[2,32], index: 19, kind: output, shape index: {2}]   ;;  %s5203_s20 = inlined_call_operand.hbm [shape: f32[2,128], index: 20, kind: output, shape index: {3}]  }
   0x1   :  { %5208 = sst [smem:[#allocation15_spill]] %s5183_s0 }
   0x2   :  { %5209 = sst [smem:[#allocation16_spill]] %s5184_s1 }
   0x3   :  { %5210 = sst [smem:[#allocation17_spill]] %s5185_s2 }
   0x4   :  { %5211 = sst [smem:[#allocation18_spill]] %s5186_s3 }
   0x5   :  { %5212 = sst [smem:[#allocation19_spill]] %s5187_s4 }
   0x6   :  { %26 = vsyncpa [#allocation6], 0 }
   0x7   :  { %27 = vsyncpa [#allocation8], 0  ;;  %s5213_s23 = sld [smem:[#allocation17_spill]]  ;;  %v3843_v4 = vmov 0.0  }
   0x8   :  { %180 = vmatprep.mubr.f32.mxu0 %v3843_v4  ;;  %312 = vmatprep.mubr.f32.mxu1 %v3843_v4  ;;  %s5214_s25 = sld [smem:[#allocation18_spill]] }
   0xd   :  { %v90_v0 = vld [vmem:[%s5213_s23 + $0xb8] sm:$0xff]  ;;  %v89_v1 = vld [vmem:[%s5213_s23 + $0xb0] sm:$0xff]  ;;  %v88_v2 = vld [vmem:[%s5213_s23 + $0xa8] sm:$0xff] }
   0xe   :  { %124 = vmatprep.subr.mxu0 %v90_v0  ;;  %v87_v3 = vld [vmem:[%s5213_s23 + $0xa0] sm:$0xff]  ;;  %v86_v5 = vld [vmem:[%s5213_s23 + $0x98] sm:$0xff]  ;;  %v85_v6 = vld [vmem:[%s5213_s23 + $0x90] sm:$0xff] }
   0xf   :  { %125 = vmatpush1.msra.mxu0 %v89_v1  ;;  %v84_v7 = vld [vmem:[%s5213_s23 + $0x88] sm:$0xff]  ;;  %v83_v8 = vld [vmem:[%s5213_s23 + $0x80] sm:$0xff]  ;;  %v3989_v9 = vld [vmem:[%s5214_s25 + $0x78] sm:$0xff] }
  0x10   :  { %126 = vmatprep.subr.mxu0 %v88_v2  ;;  %v3994_v10 = vld [vmem:[%s5214_s25 + $0x70] sm:$0xff]  ;;  %v82_v11 = vld [vmem:[%s5213_s23 + $0x78] sm:$0xff]  ;;  %264 = vmatprep.subr.mxu1 %v3989_v9  ;;  %v4003_v12 = vld [vmem:[%s5214_s25 + $0x68] sm:$0xff] }
  0x11   :  { %127 = vmatpush1.msra.mxu0 %v87_v3  ;;  %v81_v13 = vld [vmem:[%s5213_s23 + $0x70] sm:$0xff]  ;;  %265 = vmatpush1.msra.mxu1 %v3994_v10  ;;  %v4012_v14 = vld [vmem:[%s5214_s25 + $0x60] sm:$0xff]  ;;  %v4017_v15 = vld [vmem:[%s5214_s25 + $0x58] sm:$0xff] }
  0x12   :  { %128 = vmatprep.subr.mxu0 %v86_v5  ;;  %v80_v16 = vld [vmem:[%s5213_s23 + $0x68] sm:$0xff]  ;;  %266 = vmatprep.subr.mxu1 %v4003_v12  ;;  %v4026_v17 = vld [vmem:[%s5214_s25 + $0x50] sm:$0xff]  ;;  %v79_v18 = vld [vmem:[%s5213_s23 + $0x60] sm:$0xff] }
  0x13   :  { %129 = vmatpush1.msra.mxu0 %v85_v6  ;;  %267 = vmatpush1.msra.mxu1 %v4012_v14  ;;  %v4035_v19 = vld [vmem:[%s5214_s25 + $0x48] sm:$0xff]  ;;  %v78_v20 = vld [vmem:[%s5213_s23 + $0x58] sm:$0xff]  ;;  %v4044_v21 = vld [vmem:[%s5214_s25 + $0x40] sm:$0xff] }
  0x14   :  { %130 = vmatprep.subr.mxu0 %v84_v7  ;;  %268 = vmatprep.subr.mxu1 %v4017_v15  ;;  %v77_v22 = vld [vmem:[%s5213_s23 + $0x50] sm:$0xff]  ;;  %v4053_v23 = vld [vmem:[%s5214_s25 + $0x38] sm:$0xff]  ;;  %v76_v24 = vld [vmem:[%s5213_s23 + $0x48] sm:$0xff] }
  0x15   :  { %131 = vmatpush1.msra.mxu0 %v83_v8  ;;  %269 = vmatpush1.msra.mxu1 %v4026_v17  ;;  %v4062_v25 = vld [vmem:[%s5214_s25 + $0x30] sm:$0xff]  ;;  %v75_v26 = vld [vmem:[%s5213_s23 + $0x40] sm:$0xff]  ;;  %v4071_v27 = vld [vmem:[%s5214_s25 + $0x28] sm:$0xff] }
  0x16   :  { %132 = vmatprep.subr.mxu0 %v82_v11  ;;  %270 = vmatprep.subr.mxu1 %v4035_v19  ;;  %v74_v28 = vld [vmem:[%s5213_s23 + $0x38] sm:$0xff]  ;;  %v4080_v29 = vld [vmem:[%s5214_s25 + $0x20] sm:$0xff] }
  0x17   :  { %133 = vmatpush1.msra.mxu0 %v81_v13  ;;  %271 = vmatpush1.msra.mxu1 %v4044_v21 }
  0x18   :  { %134 = vmatprep.subr.mxu0 %v80_v16  ;;  %272 = vmatprep.subr.mxu1 %v4053_v23 }
  0x19   :  { %135 = vmatpush1.msra.mxu0 %v79_v18 }
  0x1a   :  { %136 = vmatprep.subr.mxu0 %v78_v20 }
  0x1b   :  { %137 = vmatpush1.msra.mxu0 %v77_v22 }
  0x1c   :  { %28 = vsyncpa [#allocation11], 0  ;;  %138 = vmatprep.subr.mxu0 %v76_v24  ;;  %v73_v30 = vld [vmem:[%s5213_s23 + $0x30] sm:$0xff]  ;;  %273 = vmatpush1.msra.mxu1 %v4062_v25  ;;  %v4089_v31 = vld [vmem:[%s5214_s25 + $0x18] sm:$0xff]  ;;  %s5215_s2 = sld [smem:[#allocation15_spill]]  ;;  %vm103_vm0 = vcmask 785408   ;;  %v93_v42 = vlaneseq }
  0x1d   :  { %139 = vmatpush1.msra.mxu0 %v75_v26  ;;  %v72_v32 = vld [vmem:[%s5213_s23 + $0x28] sm:$0xff]  ;;  %274 = vmatprep.subr.mxu1 %v4071_v27  ;;  %v4098_v33 = vld [vmem:[%s5214_s25 + $0x10] sm:$0xff]  ;;  %v71_v34 = vld [vmem:[%s5213_s23 + $0x20] sm:$0xff]  ;;  %s5216_s26 = sld [smem:[#allocation19_spill]]  ;;  %vm206_vm1 = vcmask 523264   ;;  %vm346_vm2 = vcmask 253952  }
  0x1e   :  { %140 = vmatprep.subr.mxu0 %v74_v28  ;;  %275 = vmatpush1.msra.mxu1 %v4080_v29  ;;  %v4107_v35 = vld [vmem:[%s5214_s25 + $0x8] sm:$0xff]  ;;  %v70_v36 = vld [vmem:[%s5213_s23 + $0x18] sm:$0xff]  ;;  %v4116_v37 = vld [vmem:[%s5214_s25] sm:$0xff]  ;;  %v4172_v43 = vshrl.u32 %v93_v42, 7  ;;  %s5217_s30 = sld [smem:[#allocation16_spill]]  ;;  %vm353_vm3 = vcmask 254977  }
  0x1f   :  { %141 = vmatpush1.msra.mxu0 %v73_v30  ;;  %276 = vmatprep.subr.mxu1 %v4089_v31  ;;  %v69_v38 = vld [vmem:[%s5213_s23 + $0x10] sm:$0xff]  ;;  %v68_v39 = vld [vmem:[%s5213_s23 + $0x8] sm:$0xff]  ;;  %v67_v40 = vld [vmem:[%s5213_s23] sm:$0xff]  ;;  %s3846_s22 = smov 32   ;;  %vm2201_vm4 = vcmask 261120   ;;  %vm3847_vm5 = vmmov 0  }
  0x20   :  { %142 = vmatprep.subr.mxu0 %v72_v32  ;;  %277 = vmatpush1.msra.mxu1 %v4098_v33  ;;  %v4175_v44 = vsub.s32 0, %v4172_v43  ;;  %v4181_v46 = vsub.s32 1, %v4172_v43  ;;  %v230_v50 = vld [vmem:[%s5188_s5] sm:$0x3]  ;;  %s3844_s5 = smov 64   ;;  %vm2918_vm6 = vcmask 130112  }
  0x21   :  { %143 = vmatpush1.msra.mxu0 %v71_v34  ;;  %278 = vmatprep.subr.mxu1 %v4107_v35  ;;  %vm2929_vm7 = vcmask 1041409   ;;  %vm2933_vm9 = vcmask 123904   ;;  %vm3252_vm10 = vcmask 254976   ;;  %vm3159_vm11 = vcmask 392192   ;;  %s3849_s21 = smov [#allocation7]  }
  0x22   :  { %144 = vmatprep.subr.mxu0 %v70_v36  ;;  %279 = vmatpush1.msra.mxu1 %v4116_v37  ;;  %v63_v41 = vld [vmem:[%s5215_s2] sm:$0xff]  ;;  %v4194_v53 = vrot.slane %v230_v50, %v4175_v44  ;;  %v4200_v62 = vrot.slane %v230_v50, %v4181_v46 }
  0x23   :  { %145 = vmatpush1.msra.mxu0 %v69_v38  ;;  %313 = vmatmul.mubr.f32.vlgmr.msra.gmra.mxu1 %v3843_v4  ;;  %v91_v45 = vld [vmem:[%s5216_s26] sm:$0x3] }
  0x24   :  { %146 = vmatprep.subr.mxu0 %v68_v39  ;;  %378 = vmatprep.subr.mxu1 %v3989_v9  ;;  %v4184_v47 = vrot.slane %v91_v45, %v4175_v44  ;;  %v4187_v48 = vrot.slane %v91_v45, %v4181_v46  ;;  %v233_v18 = vld [vmem:[%s5217_s30] sm:$0x3] }
  0x25   :  { %147 = vmatpush1.msra.mxu0 %v67_v40  ;;  %379 = vmatpush1.msra.mxu1 %v3994_v10  ;;  %v342_v20 = vsub.f32 1.0, %v233_v18 }
  0x26   :  { %3320 = vmatmul.mubr.msk.f32.vlgmr.msra.gmra.mxu0 %vm103_vm0, %v63_v41  ;;  %380 = vmatprep.subr.mxu1 %v4003_v12 }
  0x27   :  { %381 = vmatpush1.msra.mxu1 %v4012_v14  ;;  %426 = vmatprep.mubr.f32.mxu1 %v3843_v4  ;;  %v343_v22 = vmul.f32 0.0, %v342_v20 }
  0x28   :  { %382 = vmatprep.subr.mxu1 %v4017_v15  ;;  %501 = vmatprep.subr.mxu0 %v3989_v9 }
  0x29   :  { %383 = vmatpush1.msra.mxu1 %v4026_v17  ;;  %186 = vmatprep.mubr.f32.mxu0 %v3843_v4 }
  0x2a   :  { %384 = vmatprep.subr.mxu1 %v4035_v19  ;;  %502 = vmatpush1.msra.mxu0 %v3994_v10 }
  0x2b   :  { %385 = vmatpush1.msra.mxu1 %v4044_v21  ;;  %503 = vmatprep.subr.mxu0 %v4003_v12 }
  0x2c   :  { %386 = vmatprep.subr.mxu1 %v4053_v23  ;;  %504 = vmatpush1.msra.mxu0 %v4012_v14 }
  0x2d   :  { %387 = vmatpush1.msra.mxu1 %v4062_v25  ;;  %505 = vmatprep.subr.mxu0 %v4017_v15 }
  0x2e   :  { %388 = vmatprep.subr.mxu1 %v4071_v27  ;;  %506 = vmatpush1.msra.mxu0 %v4026_v17 }
  0x2f   :  { %389 = vmatpush1.msra.mxu1 %v4080_v29  ;;  %507 = vmatprep.subr.mxu0 %v4035_v19 }
  0x30   :  { %390 = vmatprep.subr.mxu1 %v4089_v31  ;;  %508 = vmatpush1.msra.mxu0 %v4044_v21 }
  0x31   :  { %391 = vmatpush1.msra.mxu1 %v4098_v33  ;;  %509 = vmatprep.subr.mxu0 %v4053_v23 }
  0x32   :  { %392 = vmatprep.subr.mxu1 %v4107_v35  ;;  %510 = vmatpush1.msra.mxu0 %v4062_v25 }
  0x33   :  { %393 = vmatpush1.msra.mxu1 %v4116_v37  ;;  %511 = vmatprep.subr.mxu0 %v4071_v27 }
  0x34   :  { %512 = vmatpush1.msra.mxu0 %v4080_v29  ;;  %624 = vmatprep.subr.mxu1 %v3989_v9 }
  0x35   :  { %513 = vmatprep.subr.mxu0 %v4089_v31 }
  0x36   :  { %514 = vmatpush1.msra.mxu0 %v4098_v33 }
  0x37   :  { %515 = vmatprep.subr.mxu0 %v4107_v35 }
  0x38   :  { %516 = vmatpush1.msra.mxu0 %v4116_v37 }
  0x39   :  { %747 = vmatprep.subr.mxu0 %v3989_v9 }
  0xe3   :  { %v314_v55 = vpop.f32.mrf.mxu1 }
  0xe4   :  { %v315_v56 = vadd.f32 %v314_v55, %v4194_v53 }
  0xe5   :  { %v316_v63 = vpop.f32.mrf.mxu1 }
  0xe6   :  { %v182_v49 = vpop.f32.mrf.mxu0  ;;  %v317_v0 = vadd.f32 %v316_v63, %v4200_v62 }
  0xe7   :  { %v183_v51 = vadd.f32 %v182_v49, %v4184_v47 }
  0xe8   :  { %v184_v52 = vpop.f32.mrf.mxu0 }
  0xe9   :  { %205 = vst [vmem:[#allocation2] sm:$0xff] %v183_v51  ;;  %v185_v54 = vadd.f32 %v184_v52, %v4187_v48 }
  0xeb   :  { %207 = vst.msk [vmem:[#allocation2 + $0x8] sm:$0xff] %vm206_vm1, %v185_v54 }
  0xf0   :  { %v231_v57 = vld [vmem:[#allocation2] sm:$0x3]  ;;  %v356_v38 = vld [vmem:[#allocation2] sm:$0xc] }
  0xf1   :  { %v319_v58 = vadd.f32 %v315_v56, %v231_v57  ;;  %v64_v57 = vld [vmem:[%s5215_s2 + $0x8] sm:$0xff] }
  0xf2   :  { %v232_v3 = vld [vmem:[#allocation2 + $0x8] sm:$0x3]  ;;  %v357_v55 = vld [vmem:[#allocation2 + $0x8] sm:$0xc]  ;;  %3321 = vmatmul.mubr.msk.f32.gmra.mxu0 %vm103_vm0, %v64_v57 }
  0xf3   :  { %v3324_v59 = vmul.f32 -1.442695, %v319_v58  ;;  %192 = vmatprep.mubr.f32.mxu0 %v3843_v4 }
  0xf5   :  { %3641 = vpow2.f32 %v3324_v59  ;;  %v65_v59 = vld [vmem:[%s5215_s2 + $0x10] sm:$0xff] }
  0xf6   :  { %3322 = vmatmul.mubr.msk.f32.gmra.mxu0 %vm103_vm0, %v65_v59 }
  0xf7   :  { %198 = vmatprep.mubr.f32.mxu0 %v3843_v4 }
 0x102   :  { %v3642_v60 = vpop.eup %3641 }
 0x103   :  { %v323_v61 = vadd.f32 1.0, %v3642_v60 }
 0x105   :  { %3643 = vrcp.f32 %v323_v61  ;;  %v66_v61 = vld [vmem:[%s5215_s2 + $0x18] sm:$0xff] }
 0x106   :  { %3323 = vmatmul.mubr.msk.f32.gmra.mxu0 %vm103_vm0, %v66_v61 }
 0x107   :  { %549 = vmatprep.mubr.f32.mxu0 %v3843_v4 }
 0x112   :  { %v3644_v1 = vpop.eup %3643 }
 0x113   :  { %v326_v2 = vmul.f32 %v3644_v1, %v317_v0  ;;  %v329_v7 = vsub.f32 1.0, %v3644_v1  ;;  %v335_v11 = vmul.f32 0.0, %v3644_v1 }
 0x115   :  { %v327_v5 = vadd.f32 %v326_v2, %v232_v3 }
 0x117   :  { %3645 = vtanh.f32 %v327_v5 }
 0x124   :  { %v3646_v6 = vpop.eup %3645 }
 0x125   :  { %331 = vrot.lane.b32.xlu0 %v3646_v6, %s3844_s5 }
 0x197   :  { %v332_v8 = vpop.permute.xlu0 %331 }
 0x198   :  { %v334_v13 = vmul.f32 %v332_v8, %v329_v7  ;;  %v358_v8 = vld [vmem:[%s5217_s30 + $0x2] sm:$0x3] }
 0x19a   :  { %v336_v16 = vadd.f32 %v335_v11, %v334_v13 }
 0x19c   :  { %338 = vrot.lane.b32.xlu0 %v336_v16, %s3844_s5 }
 0x1b2   :  { %v188_v7 = vpop.f32.mrf.mxu0 }
 0x1b3   :  { %v189_v11 = vadd.f32 %v188_v7, %v4184_v47 }
 0x1b4   :  { %v190_v13 = vpop.f32.mrf.mxu0 }
 0x1b5   :  { %208 = vst [vmem:[#allocation2 + $0x10] sm:$0xff] %v189_v11  ;;  %v191_v16 = vadd.f32 %v190_v13, %v4187_v48  ;;  %v481_v13 = vld [vmem:[%s5217_s30 + $0x4] sm:$0x3] }
 0x1b6   :  { %v194_v20 = vpop.f32.mrf.mxu0 }
 0x1b7   :  { %209 = vst.msk [vmem:[#allocation2 + $0x18] sm:$0xff] %vm206_vm1, %v191_v16  ;;  %v590_v16 = vsub.f32 1.0, %v481_v13 }
 0x20e   :  { %v339_v24 = vpop.permute.xlu0 %338 }
 0x20f   :  { %v341_v26 = vmul.f32 %v339_v24, %v233_v18  ;;  %v196_v24 = vpop.f32.mrf.mxu0 }
 0x211   :  { %v4208_v28 = vadd.f32 %v343_v22, %v341_v26  ;;  %v195_v22 = vadd.f32 %v194_v20, %v4184_v47 }
 0x213   :  { %3325 = vmatmul.mubr.msk.f32.vlgmr.msra.gmra.mxu1 %vm206_vm1, %v4208_v28  ;;  %v4213_v30 = vmul.f32 %v4208_v28, %v233_v18  ;;  %v455_v60 = vrot.slane %v4208_v28, 6  ;;  %v467_v18 = vsub.f32 1.0, %v358_v8  ;;  %210 = vst [vmem:[#allocation2 + $0x20] sm:$0xff] %v195_v22 }
 0x214   :  { %625 = vmatpush1.msra.mxu1 %v3994_v10  ;;  %672 = vmatprep.mubr.f32.mxu1 %v3843_v4 }
 0x215   :  { %626 = vmatprep.subr.mxu1 %v4003_v12  ;;  %347 = vst.msk [vmem:[#allocation3] sm:$0x1] %vm346_vm2, %v4213_v30 }
 0x216   :  { %354 = vst.msk [vmem:[#allocation3 + $0xf] sm:$0x2] %vm353_vm3, %v4213_v30  ;;  %627 = vmatpush1.msra.mxu1 %v4012_v14 }
 0x217   :  { %628 = vmatprep.subr.mxu1 %v4017_v15 }
 0x218   :  { %629 = vmatpush1.msra.mxu1 %v4026_v17 }
 0x219   :  { %630 = vmatprep.subr.mxu1 %v4035_v19 }
 0x21a   :  { %631 = vmatpush1.msra.mxu1 %v4044_v21 }
 0x21b   :  { %632 = vmatprep.subr.mxu1 %v4053_v23 }
 0x21c   :  { %633 = vmatpush1.msra.mxu1 %v4062_v25 }
 0x21d   :  { %634 = vmatprep.subr.mxu1 %v4071_v27 }
 0x21e   :  { %635 = vmatpush1.msra.mxu1 %v4080_v29 }
 0x21f   :  { %636 = vmatprep.subr.mxu1 %v4089_v31 }
 0x220   :  { %637 = vmatpush1.msra.mxu1 %v4098_v33 }
 0x221   :  { %638 = vmatprep.subr.mxu1 %v4107_v35 }
 0x222   :  { %639 = vmatpush1.msra.mxu1 %v4116_v37 }
 0x223   :  { %862 = vmatprep.subr.mxu1 %v3989_v9 }
 0x2d3   :  { %v428_v32 = vpop.f32.mrf.mxu1 }
 0x2d4   :  { %v429_v34 = vadd.f32 %v428_v32, %v4194_v53  ;;  %v197_v32 = vadd.f32 %v196_v24, %v4187_v48 }
 0x2d5   :  { %v430_v49 = vpop.f32.mrf.mxu1 }
 0x2d6   :  { %v434_v36 = vrot.slane %v429_v34, 6  ;;  %v431_v50 = vadd.f32 %v430_v49, %v4200_v62  ;;  %v468_v34 = vmul.f32 %v467_v18, %v4208_v28  ;;  %211 = vst.msk [vmem:[#allocation2 + $0x28] sm:$0xff] %vm206_vm1, %v197_v32 }
 0x2d8   :  { %v436_v39 = vadd.f32 %v434_v36, %v356_v38  ;;  %v444_v51 = vrot.slane %v431_v50, 6  ;;  %v200_v38 = vpop.f32.mrf.mxu0 }
 0x2da   :  { %v3326_v40 = vmul.f32 -1.442695, %v436_v39  ;;  %v201_v39 = vadd.f32 %v200_v38, %v4184_v47 }
 0x2dc   :  { %3647 = vpow2.f32 %v3326_v40  ;;  %212 = vst [vmem:[#allocation2 + $0x30] sm:$0xff] %v201_v39  ;;  %v602_v39 = vld [vmem:[#allocation2] sm:$0xc0] }
 0x2e9   :  { %v3648_v41 = vpop.eup %3647 }
 0x2ea   :  { %v440_v45 = vadd.f32 1.0, %v3648_v41  ;;  %v202_v41 = vpop.f32.mrf.mxu0 }
 0x2ec   :  { %3649 = vrcp.f32 %v440_v45  ;;  %v203_v45 = vadd.f32 %v202_v41, %v4187_v48 }
 0x2ee   :  { %213 = vst.msk [vmem:[#allocation2 + $0x38] sm:$0xff] %vm206_vm1, %v203_v45 }
 0x2f9   :  { %v3650_v52 = vpop.eup %3649 }
 0x2fa   :  { %v446_v54 = vmul.f32 %v3650_v52, %v444_v51  ;;  %v449_v0 = vsub.f32 1.0, %v3650_v52  ;;  %v479_v51 = vld [vmem:[#allocation2] sm:$0x30] }
 0x2fc   :  { %v447_v56 = vadd.f32 %v446_v54, %v357_v55 }
 0x2fe   :  { %3651 = vtanh.f32 %v447_v56 }
 0x30b   :  { %v3652_v58 = vpop.eup %3651 }
 0x30c   :  { %451 = vrot.lane.b32.xlu1 %v3652_v58, %s3844_s5 }
 0x310   :  { %456 = vrot.lane.b32.xlu1 %v455_v60, %s3844_s5 }
 0x37e   :  { %v452_v63 = vpop.permute.xlu1 %451 }
 0x37f   :  { %v454_v2 = vmul.f32 %v452_v63, %v449_v0  ;;  %v480_v63 = vld [vmem:[#allocation2 + $0x8] sm:$0x30] }
 0x382   :  { %v457_v1 = vpop.permute.xlu1 %456 }
 0x383   :  { %v459_v3 = vmul.f32 %v3650_v52, %v457_v1 }
 0x385   :  { %v460_v5 = vadd.f32 %v459_v3, %v454_v2 }
 0x387   :  { %v462_v6 = vrot.slane %v460_v5, 2 }
 0x389   :  { %463 = vrot.lane.b32.xlu0 %v462_v6, %s3844_s5 }
 0x3fb   :  { %v464_v26 = vpop.permute.xlu0 %463 }
 0x3fc   :  { %v466_v36 = vmul.f32 %v464_v26, %v358_v8 }
 0x3fe   :  { %v469_v40 = vadd.f32 %v468_v34, %v466_v36 }
 0x400   :  { %3327 = vmatmul.mubr.msk.f32.vlgmr.msra.gmra.mxu0 %vm206_vm1, %v469_v40  ;;  %v578_v49 = vrot.slane %v469_v40, 4  ;;  %v4270_v50 = vmul.f32 %v469_v40, %v358_v8  ;;  %v591_v20 = vmul.f32 %v590_v16, %v469_v40  ;;  %v725_v16 = vld [vmem:[#allocation2 + $0x10] sm:$0x3] }
 0x401   :  { %748 = vmatpush1.msra.mxu0 %v3994_v10  ;;  %795 = vmatprep.mubr.f32.mxu0 %v3843_v4 }
 0x402   :  { %579 = vrot.lane.b32.xlu0 %v578_v49, %s3844_s5  ;;  %749 = vmatprep.subr.mxu0 %v4003_v12  ;;  %471 = vst.msk [vmem:[#allocation3 + $0x1] sm:$0x1] %vm346_vm2, %v4270_v50 }
 0x403   :  { %477 = vst.msk [vmem:[#allocation3 + $0x10] sm:$0x2] %vm353_vm3, %v4270_v50  ;;  %750 = vmatpush1.msra.mxu0 %v4012_v14 }
 0x404   :  { %751 = vmatprep.subr.mxu0 %v4017_v15 }
 0x405   :  { %752 = vmatpush1.msra.mxu0 %v4026_v17 }
 0x406   :  { %753 = vmatprep.subr.mxu0 %v4035_v19 }
 0x407   :  { %754 = vmatpush1.msra.mxu0 %v4044_v21 }
 0x408   :  { %755 = vmatprep.subr.mxu0 %v4053_v23 }
 0x409   :  { %756 = vmatpush1.msra.mxu0 %v4062_v25 }
 0x40a   :  { %757 = vmatprep.subr.mxu0 %v4071_v27 }
 0x40b   :  { %758 = vmatpush1.msra.mxu0 %v4080_v29 }
 0x40c   :  { %759 = vmatprep.subr.mxu0 %v4089_v31 }
 0x40d   :  { %760 = vmatpush1.msra.mxu0 %v4098_v33 }
 0x40e   :  { %761 = vmatprep.subr.mxu0 %v4107_v35 }
 0x40f   :  { %762 = vmatpush1.msra.mxu0 %v4116_v37 }
 0x410   :  { %985 = vmatprep.subr.mxu0 %v3989_v9 }
 0x474   :  { %v580_v3 = vpop.permute.xlu0 %579 }
 0x4c0   :  { %v551_v47 = vpop.f32.mrf.mxu0 }
 0x4c1   :  { %v552_v48 = vadd.f32 %v551_v47, %v4194_v53 }
 0x4c2   :  { %v553_v57 = vpop.f32.mrf.mxu0 }
 0x4c3   :  { %v557_v28 = vrot.slane %v552_v48, 4  ;;  %v554_v58 = vadd.f32 %v553_v57, %v4200_v62 }
 0x4c5   :  { %v559_v52 = vadd.f32 %v557_v28, %v479_v51  ;;  %v567_v59 = vrot.slane %v554_v58, 4 }
 0x4c7   :  { %v3328_v54 = vmul.f32 -1.442695, %v559_v52 }
 0x4c9   :  { %3653 = vpow2.f32 %v3328_v54  ;;  %v603_v54 = vld [vmem:[#allocation2 + $0x8] sm:$0xc0] }
 0x4d6   :  { %v3654_v55 = vpop.eup %3653 }
 0x4d7   :  { %v563_v56 = vadd.f32 1.0, %v3654_v55 }
 0x4d9   :  { %3655 = vrcp.f32 %v563_v56 }
 0x4e6   :  { %v3656_v60 = vpop.eup %3655 }
 0x4e7   :  { %v569_v61 = vmul.f32 %v3656_v60, %v567_v59  ;;  %v572_v2 = vsub.f32 1.0, %v3656_v60  ;;  %v582_v6 = vmul.f32 %v3656_v60, %v580_v3 }
 0x4e9   :  { %v570_v0 = vadd.f32 %v569_v61, %v480_v63 }
 0x4eb   :  { %3657 = vtanh.f32 %v570_v0 }
 0x4f8   :  { %v3658_v1 = vpop.eup %3657 }
 0x4f9   :  { %574 = vrot.lane.b32.xlu1 %v3658_v1, %s3844_s5  ;;  %v604_v1 = vld [vmem:[%s5217_s30 + $0x6] sm:$0x3] }
 0x56b   :  { %v575_v5 = vpop.permute.xlu1 %574 }
 0x56c   :  { %v577_v7 = vmul.f32 %v575_v5, %v572_v2  ;;  %v713_v2 = vsub.f32 1.0, %v604_v1 }
 0x56e   :  { %v583_v8 = vadd.f32 %v582_v6, %v577_v7 }
 0x570   :  { %v585_v11 = vrot.slane %v583_v8, 4 }
 0x572   :  { %586 = vrot.lane.b32.xlu1 %v585_v11, %s3844_s5 }
 0x5e4   :  { %v587_v18 = vpop.permute.xlu1 %586 }
 0x5e5   :  { %v589_v22 = vmul.f32 %v587_v18, %v481_v13 }
 0x5e7   :  { %v592_v24 = vadd.f32 %v591_v20, %v589_v22 }
 0x5e9   :  { %3329 = vmatmul.mubr.msk.f32.vlgmr.msra.gmra.mxu1 %vm206_vm1, %v592_v24  ;;  %v701_v26 = vrot.slane %v592_v24, 2  ;;  %v4303_v32 = vmul.f32 %v592_v24, %v481_v13  ;;  %v714_v5 = vmul.f32 %v713_v2, %v592_v24 }
 0x5ea   :  { %863 = vmatpush1.msra.mxu1 %v3994_v10  ;;  %910 = vmatprep.mubr.f32.mxu1 %v3843_v4 }
 0x5eb   :  { %702 = vrot.lane.b32.xlu1 %v701_v26, %s3844_s5  ;;  %864 = vmatprep.subr.mxu1 %v4003_v12  ;;  %594 = vst.msk [vmem:[#allocation3 + $0x2] sm:$0x1] %vm346_vm2, %v4303_v32 }
 0x5ec   :  { %600 = vst.msk [vmem:[#allocation3 + $0x11] sm:$0x2] %vm353_vm3, %v4303_v32  ;;  %865 = vmatpush1.msra.mxu1 %v4012_v14 }
 0x5ed   :  { %866 = vmatprep.subr.mxu1 %v4017_v15 }
 0x5ee   :  { %867 = vmatpush1.msra.mxu1 %v4026_v17 }
 0x5ef   :  { %868 = vmatprep.subr.mxu1 %v4035_v19 }
 0x5f0   :  { %869 = vmatpush1.msra.mxu1 %v4044_v21 }
 0x5f1   :  { %870 = vmatprep.subr.mxu1 %v4053_v23 }
 0x5f2   :  { %871 = vmatpush1.msra.mxu1 %v4062_v25 }
 0x5f3   :  { %872 = vmatprep.subr.mxu1 %v4071_v27 }
 0x5f4   :  { %873 = vmatpush1.msra.mxu1 %v4080_v29 }
 0x5f5   :  { %874 = vmatprep.subr.mxu1 %v4089_v31 }
 0x5f6   :  { %875 = vmatpush1.msra.mxu1 %v4098_v33 }
 0x5f7   :  { %876 = vmatprep.subr.mxu1 %v4107_v35 }
 0x5f8   :  { %877 = vmatpush1.msra.mxu1 %v4116_v37 }
 0x5f9   :  { %1108 = vmatprep.subr.mxu1 %v3989_v9 }
 0x65d   :  { %v703_v58 = vpop.permute.xlu1 %702 }
 0x6a9   :  { %v674_v34 = vpop.f32.mrf.mxu1 }
 0x6aa   :  { %v675_v36 = vadd.f32 %v674_v34, %v4194_v53 }
 0x6ab   :  { %v676_v47 = vpop.f32.mrf.mxu1 }
 0x6ac   :  { %v680_v38 = vrot.slane %v675_v36, 2  ;;  %v677_v48 = vadd.f32 %v676_v47, %v4200_v62 }
 0x6ae   :  { %v682_v40 = vadd.f32 %v680_v38, %v602_v39  ;;  %v690_v28 = vrot.slane %v677_v48, 2  ;;  %v726_v39 = vld [vmem:[#allocation2 + $0x18] sm:$0x3] }
 0x6b0   :  { %v3330_v41 = vmul.f32 -1.442695, %v682_v40 }
 0x6b2   :  { %3659 = vpow2.f32 %v3330_v41 }
 0x6bf   :  { %v3660_v45 = vpop.eup %3659 }
 0x6c0   :  { %v686_v49 = vadd.f32 1.0, %v3660_v45 }
 0x6c2   :  { %3661 = vrcp.f32 %v686_v49 }
 0x6cf   :  { %v3662_v51 = vpop.eup %3661 }
 0x6d0   :  { %v692_v52 = vmul.f32 %v3662_v51, %v690_v28  ;;  %v695_v57 = vsub.f32 1.0, %v3662_v51  ;;  %v705_v60 = vmul.f32 %v3662_v51, %v703_v58 }
 0x6d2   :  { %v693_v55 = vadd.f32 %v692_v52, %v603_v54  ;;  %v727_v52 = vld [vmem:[%s5217_s30 + $0x8] sm:$0x3] }
 0x6d3   :  { %v828_v54 = vsub.f32 1.0, %v727_v52 }
 0x6d4   :  { %3663 = vtanh.f32 %v693_v55 }
 0x6e1   :  { %v3664_v56 = vpop.eup %3663 }
 0x6e2   :  { %697 = vrot.lane.b32.xlu0 %v3664_v56, %s3844_s5 }
 0x754   :  { %v698_v59 = vpop.permute.xlu0 %697 }
 0x755   :  { %v700_v61 = vmul.f32 %v698_v59, %v695_v57 }
 0x757   :  { %v706_v63 = vadd.f32 %v705_v60, %v700_v61 }
 0x759   :  { %v708_v0 = vrot.slane %v706_v63, 6 }
 0x75b   :  { %709 = vrot.lane.b32.xlu0 %v708_v0, %s3844_s5 }
 0x7cd   :  { %v710_v3 = vpop.permute.xlu0 %709 }
 0x7ce   :  { %v712_v6 = vmul.f32 %v710_v3, %v604_v1 }
 0x7d0   :  { %v715_v7 = vadd.f32 %v714_v5, %v712_v6 }
 0x7d2   :  { %818 = vrot.lane.b32.xlu0 %v715_v7, %s3844_s5  ;;  %3331 = vmatmul.mubr.msk.f32.vlgmr.msra.gmra.mxu0 %vm206_vm1, %v715_v7  ;;  %v4336_v8 = vmul.f32 %v715_v7, %v604_v1  ;;  %v829_v56 = vmul.f32 %v828_v54, %v715_v7  ;;  %v840_v1 = vld [vmem:[#allocation2 + $0x10] sm:$0xc] }
 0x7d3   :  { %986 = vmatpush1.msra.mxu0 %v3994_v10  ;;  %1033 = vmatprep.mubr.f32.mxu0 %v3843_v4 }
 0x7d4   :  { %987 = vmatprep.subr.mxu0 %v4003_v12  ;;  %717 = vst.msk [vmem:[#allocation3 + $0x3] sm:$0x1] %vm346_vm2, %v4336_v8 }
 0x7d5   :  { %723 = vst.msk [vmem:[#allocation3 + $0x12] sm:$0x2] %vm353_vm3, %v4336_v8  ;;  %988 = vmatpush1.msra.mxu0 %v4012_v14 }
 0x7d6   :  { %989 = vmatprep.subr.mxu0 %v4017_v15 }
 0x7d7   :  { %990 = vmatpush1.msra.mxu0 %v4026_v17 }
 0x7d8   :  { %991 = vmatprep.subr.mxu0 %v4035_v19 }
 0x7d9   :  { %992 = vmatpush1.msra.mxu0 %v4044_v21 }
 0x7da   :  { %993 = vmatprep.subr.mxu0 %v4053_v23 }
 0x7db   :  { %994 = vmatpush1.msra.mxu0 %v4062_v25 }
 0x7dc   :  { %995 = vmatprep.subr.mxu0 %v4071_v27 }
 0x7dd   :  { %996 = vmatpush1.msra.mxu0 %v4080_v29 }
 0x7de   :  { %997 = vmatprep.subr.mxu0 %v4089_v31 }
 0x7df   :  { %998 = vmatpush1.msra.mxu0 %v4098_v33 }
 0x7e0   :  { %999 = vmatprep.subr.mxu0 %v4107_v35 }
 0x7e1   :  { %1000 = vmatpush1.msra.mxu0 %v4116_v37 }
 0x7e2   :  { %1231 = vmatprep.subr.mxu0 %v3989_v9 }
 0x844   :  { %v819_v49 = vpop.permute.xlu0 %818 }
 0x892   :  { %v797_v11 = vpop.f32.mrf.mxu0 }
 0x893   :  { %v798_v13 = vadd.f32 %v797_v11, %v4194_v53 }
 0x894   :  { %v799_v26 = vpop.f32.mrf.mxu0 }
 0x895   :  { %v802_v18 = vadd.f32 %v798_v13, %v725_v16  ;;  %v800_v34 = vadd.f32 %v799_v26, %v4200_v62 }
 0x897   :  { %v3332_v20 = vmul.f32 -1.442695, %v802_v18 }
 0x899   :  { %3665 = vpow2.f32 %v3332_v20  ;;  %v841_v20 = vld [vmem:[#allocation2 + $0x18] sm:$0xc] }
 0x8a6   :  { %v3666_v22 = vpop.eup %3665 }
 0x8a7   :  { %v806_v24 = vadd.f32 1.0, %v3666_v22 }
 0x8a9   :  { %3667 = vrcp.f32 %v806_v24 }
 0x8b6   :  { %v3668_v36 = vpop.eup %3667 }
 0x8b7   :  { %v809_v38 = vmul.f32 %v3668_v36, %v800_v34  ;;  %v812_v45 = vsub.f32 1.0, %v3668_v36  ;;  %v821_v48 = vmul.f32 %v3668_v36, %v819_v49 }
 0x8b9   :  { %v810_v40 = vadd.f32 %v809_v38, %v726_v39 }
 0x8bb   :  { %3669 = vtanh.f32 %v810_v40 }
 0x8c8   :  { %v3670_v41 = vpop.eup %3669 }
 0x8c9   :  { %814 = vrot.lane.b32.xlu1 %v3670_v41, %s3844_s5 }
 0x93b   :  { %v815_v47 = vpop.permute.xlu1 %814 }
 0x93c   :  { %v817_v28 = vmul.f32 %v815_v47, %v812_v45  ;;  %v842_v45 = vld [vmem:[%s5217_s30 + $0xa] sm:$0x3] }
 0x93d   :  { %v951_v49 = vsub.f32 1.0, %v842_v45 }
 0x93e   :  { %v822_v51 = vadd.f32 %v821_v48, %v817_v28 }
 0x940   :  { %824 = vrot.lane.b32.xlu1 %v822_v51, %s3844_s5 }
 0x9b2   :  { %v825_v55 = vpop.permute.xlu1 %824 }
 0x9b3   :  { %v827_v57 = vmul.f32 %v825_v55, %v727_v52 }
 0x9b5   :  { %v830_v58 = vadd.f32 %v829_v56, %v827_v57 }
 0x9b7   :  { %3333 = vmatmul.mubr.msk.f32.vlgmr.msra.gmra.mxu1 %vm206_vm1, %v830_v58  ;;  %v939_v59 = vrot.slane %v830_v58, 6  ;;  %v4367_v60 = vmul.f32 %v830_v58, %v727_v52  ;;  %v952_v48 = vmul.f32 %v951_v49, %v830_v58  ;;  %v4483_v49 = vld [vmem:[%s5214_s25 + $0x40] sm:$0xff] }
 0x9b8   :  { %1109 = vmatpush1.msra.mxu1 %v3994_v10  ;;  %1156 = vmatprep.mubr.f32.mxu1 %v3843_v4 }
 0x9b9   :  { %940 = vrot.lane.b32.xlu1 %v939_v59, %s3844_s5  ;;  %1110 = vmatprep.subr.mxu1 %v4003_v12  ;;  %832 = vst.msk [vmem:[#allocation3 + $0x4] sm:$0x1] %vm346_vm2, %v4367_v60 }
 0x9ba   :  { %838 = vst.msk [vmem:[#allocation3 + $0x13] sm:$0x2] %vm353_vm3, %v4367_v60  ;;  %1111 = vmatpush1.msra.mxu1 %v4012_v14 }
 0x9bb   :  { %1112 = vmatprep.subr.mxu1 %v4017_v15 }
 0x9bc   :  { %1113 = vmatpush1.msra.mxu1 %v4026_v17 }
 0x9bd   :  { %1114 = vmatprep.subr.mxu1 %v4035_v19 }
 0x9be   :  { %1115 = vmatpush1.msra.mxu1 %v4044_v21 }
 0x9bf   :  { %1116 = vmatprep.subr.mxu1 %v4053_v23 }
 0x9c0   :  { %1117 = vmatpush1.msra.mxu1 %v4062_v25 }
 0x9c1   :  { %1118 = vmatprep.subr.mxu1 %v4071_v27 }
 0x9c2   :  { %1119 = vmatpush1.msra.mxu1 %v4080_v29 }
 0x9c3   :  { %1120 = vmatprep.subr.mxu1 %v4089_v31 }
 0x9c4   :  { %1121 = vmatpush1.msra.mxu1 %v4098_v33 }
 0x9c5   :  { %1122 = vmatprep.subr.mxu1 %v4107_v35 }
 0x9c6   :  { %1123 = vmatpush1.msra.mxu1 %v4116_v37 }
 0x9c7   :  { %1346 = vmatprep.subr.mxu1 %v3989_v9 }
 0xa2b   :  { %v941_v34 = vpop.permute.xlu1 %940 }
 0xa77   :  { %v912_v61 = vpop.f32.mrf.mxu1 }
 0xa78   :  { %v913_v63 = vadd.f32 %v912_v61, %v4194_v53 }
 0xa79   :  { %v914_v7 = vpop.f32.mrf.mxu1 }
 0xa7a   :  { %v918_v0 = vrot.slane %v913_v63, 6  ;;  %v915_v11 = vadd.f32 %v914_v7, %v4200_v62  ;;  %v964_v63 = vld [vmem:[#allocation2 + $0x18] sm:$0x30] }
 0xa7c   :  { %v920_v2 = vadd.f32 %v918_v0, %v840_v1  ;;  %v928_v13 = vrot.slane %v915_v11, 6 }
 0xa7e   :  { %v3334_v3 = vmul.f32 -1.442695, %v920_v2 }
 0xa80   :  { %3671 = vpow2.f32 %v3334_v3 }
 0xa8d   :  { %v3672_v5 = vpop.eup %3671 }
 0xa8e   :  { %v924_v6 = vadd.f32 1.0, %v3672_v5 }
 0xa90   :  { %3673 = vrcp.f32 %v924_v6 }
 0xa9d   :  { %v3674_v16 = vpop.eup %3673 }
 0xa9e   :  { %v930_v18 = vmul.f32 %v3674_v16, %v928_v13  ;;  %v933_v26 = vsub.f32 1.0, %v3674_v16  ;;  %v943_v38 = vmul.f32 %v3674_v16, %v941_v34  ;;  %v965_v13 = vld [vmem:[%s5217_s30 + $0xc] sm:$0x3] }
 0xa9f   :  { %v1074_v16 = vsub.f32 1.0, %v965_v13 }
 0xaa0   :  { %v931_v22 = vadd.f32 %v930_v18, %v841_v20 }
 0xaa2   :  { %3675 = vtanh.f32 %v931_v22 }
 0xaaf   :  { %v3676_v24 = vpop.eup %3675 }
 0xab0   :  { %935 = vrot.lane.b32.xlu0 %v3676_v24, %s3844_s5 }
 0xb22   :  { %v936_v36 = vpop.permute.xlu0 %935 }
 0xb23   :  { %v938_v39 = vmul.f32 %v936_v36, %v933_v26  ;;  %v4441_v36 = vld [vmem:[%s5214_s25 + $0x70] sm:$0xff] }
 0xb25   :  { %v944_v40 = vadd.f32 %v943_v38, %v938_v39  ;;  %v4449_v38 = vld [vmem:[%s5214_s25 + $0x68] sm:$0xff]  ;;  %v4459_v39 = vld [vmem:[%s5214_s25 + $0x60] sm:$0xff] }
 0xb27   :  { %v946_v41 = vrot.slane %v944_v40, 2  ;;  %v4465_v40 = vld [vmem:[%s5214_s25 + $0x58] sm:$0xff] }
 0xb29   :  { %947 = vrot.lane.b32.xlu0 %v946_v41, %s3844_s5  ;;  %v4471_v41 = vld [vmem:[%s5214_s25 + $0x50] sm:$0xff] }
 0xb9b   :  { %v948_v47 = vpop.permute.xlu0 %947 }
 0xb9c   :  { %v950_v28 = vmul.f32 %v948_v47, %v842_v45  ;;  %v4497_v47 = vld [vmem:[%s5214_s25 + $0x78] sm:$0xff] }
 0xb9e   :  { %v953_v51 = vadd.f32 %v952_v48, %v950_v28 }
 0xba0   :  { %3335 = vmatmul.mubr.msk.f32.vlgmr.msra.gmra.mxu0 %vm206_vm1, %v953_v51  ;;  %v1062_v52 = vrot.slane %v953_v51, 4  ;;  %v4399_v54 = vmul.f32 %v953_v51, %v842_v45  ;;  %v1075_v20 = vmul.f32 %v1074_v16, %v953_v51  ;;  %v4477_v45 = vld [vmem:[%s5214_s25 + $0x48] sm:$0xff] }
 0xba1   :  { %1232 = vmatpush1.msra.mxu0 %v3994_v10  ;;  %1279 = vmatprep.mubr.f32.mxu0 %v3843_v4  ;;  %v4563_v16 = vld [vmem:[%s5214_s25 + $0x8] sm:$0xff] }
 0xba2   :  { %1063 = vrot.lane.b32.xlu0 %v1062_v52, %s3844_s5  ;;  %1233 = vmatprep.subr.mxu0 %v4003_v12  ;;  %955 = vst.msk [vmem:[#allocation3 + $0x5] sm:$0x1] %vm346_vm2, %v4399_v54 }
 0xba3   :  { %961 = vst.msk [vmem:[#allocation3 + $0x14] sm:$0x2] %vm353_vm3, %v4399_v54  ;;  %1234 = vmatpush1.msra.mxu0 %v4012_v14 }
 0xba4   :  { %1235 = vmatprep.subr.mxu0 %v4017_v15  ;;  %v963_v15 = vld [vmem:[#allocation2 + $0x10] sm:$0x30] }
 0xba5   :  { %1236 = vmatpush1.msra.mxu0 %v4026_v17 }
 0xba6   :  { %1237 = vmatprep.subr.mxu0 %v4035_v19 }
 0xba7   :  { %1238 = vmatpush1.msra.mxu0 %v4044_v21 }
 0xba8   :  { %1239 = vmatprep.subr.mxu0 %v4053_v23 }
 0xba9   :  { %1240 = vmatpush1.msra.mxu0 %v4062_v25 }
 0xbaa   :  { %1241 = vmatprep.subr.mxu0 %v4071_v27 }
 0xbab   :  { %1242 = vmatpush1.msra.mxu0 %v4080_v29 }
 0xbac   :  { %1243 = vmatprep.subr.mxu0 %v4089_v31 }
 0xbad   :  { %1244 = vmatpush1.msra.mxu0 %v4098_v33 }
 0xbae   :  { %1245 = vmatprep.subr.mxu0 %v4107_v35 }
 0xbaf   :  { %1246 = vmatpush1.msra.mxu0 %v4116_v37 }
 0xbb0   :  { %1469 = vmatprep.subr.mxu0 %v3989_v9 }
 0xc14   :  { %v1064_v2 = vpop.permute.xlu0 %1063 }
 0xc60   :  { %v1035_v10 = vpop.f32.mrf.mxu0 }
 0xc61   :  { %v1036_v12 = vadd.f32 %v1035_v10, %v4194_v53 }
 0xc62   :  { %v1037_v56 = vpop.f32.mrf.mxu0 }
 0xc63   :  { %v1041_v14 = vrot.slane %v1036_v12, 4  ;;  %v1038_v57 = vadd.f32 %v1037_v56, %v4200_v62  ;;  %v1087_v12 = vld [vmem:[#allocation2 + $0x18] sm:$0xc0] }
 0xc65   :  { %v1043_v17 = vadd.f32 %v1041_v14, %v963_v15  ;;  %v1051_v58 = vrot.slane %v1038_v57, 4 }
 0xc67   :  { %v3336_v19 = vmul.f32 -1.442695, %v1043_v17 }
 0xc69   :  { %3677 = vpow2.f32 %v3336_v19 }
 0xc76   :  { %v3678_v21 = vpop.eup %3677 }
 0xc77   :  { %v1047_v55 = vadd.f32 1.0, %v3678_v21 }
 0xc79   :  { %3679 = vrcp.f32 %v1047_v55 }
 0xc86   :  { %v3680_v59 = vpop.eup %3679 }
 0xc87   :  { %v1053_v61 = vmul.f32 %v3680_v59, %v1051_v58  ;;  %v1056_v1 = vsub.f32 1.0, %v3680_v59  ;;  %v1066_v5 = vmul.f32 %v3680_v59, %v1064_v2  ;;  %v1088_v59 = vld [vmem:[%s5217_s30 + $0xe] sm:$0x3] }
 0xc89   :  { %v1054_v0 = vadd.f32 %v1053_v61, %v964_v63  ;;  %v1197_v61 = vsub.f32 1.0, %v1088_v59 }
 0xc8b   :  { %3681 = vtanh.f32 %v1054_v0 }
 0xc98   :  { %v3682_v9 = vpop.eup %3681 }
 0xc99   :  { %1058 = vrot.lane.b32.xlu1 %v3682_v9, %s3844_s5 }
 0xd0b   :  { %v1059_v3 = vpop.permute.xlu1 %1058 }
 0xd0c   :  { %v1061_v6 = vmul.f32 %v1059_v3, %v1056_v1  ;;  %v4527_v3 = vld [vmem:[%s5214_s25 + $0x38] sm:$0xff] }
 0xd0e   :  { %v1067_v7 = vadd.f32 %v1066_v5, %v1061_v6  ;;  %v4533_v5 = vld [vmem:[%s5214_s25 + $0x30] sm:$0xff]  ;;  %v4539_v6 = vld [vmem:[%s5214_s25 + $0x28] sm:$0xff] }
 0xd10   :  { %v1069_v11 = vrot.slane %v1067_v7, 4  ;;  %v4545_v7 = vld [vmem:[%s5214_s25 + $0x20] sm:$0xff] }
 0xd12   :  { %1070 = vrot.lane.b32.xlu1 %v1069_v11, %s3844_s5  ;;  %v4551_v11 = vld [vmem:[%s5214_s25 + $0x18] sm:$0xff] }
 0xd84   :  { %v1071_v18 = vpop.permute.xlu1 %1070 }
 0xd85   :  { %v1073_v22 = vmul.f32 %v1071_v18, %v965_v13  ;;  %v4569_v18 = vld [vmem:[%s5214_s25] sm:$0xff] }
 0xd87   :  { %v4430_v24 = vadd.f32 %v1075_v20, %v1073_v22 }
 0xd89   :  { %3337 = vmatmul.mubr.msk.f32.vlgmr.msra.gmra.mxu1 %vm206_vm1, %v4430_v24  ;;  %v1185_v26 = vrot.slane %v4430_v24, 2  ;;  %v4436_v34 = vmul.f32 %v4430_v24, %v965_v13  ;;  %v1198_v0 = vmul.f32 %v1197_v61, %v4430_v24  ;;  %v4557_v13 = vld [vmem:[%s5214_s25 + $0x10] sm:$0xff]  ;;  %v1209_v24 = vld [vmem:[#allocation2 + $0x20] sm:$0x3]  ;;  %s3845_s25 = smov 96  }
 0xd8a   :  { %1347 = vmatpush1.msra.mxu1 %v4441_v36  ;;  %1394 = vmatprep.mubr.f32.mxu1 %v3843_v4 }
 0xd8b   :  { %1186 = vrot.lane.b32.xlu1 %v1185_v26, %s3844_s5  ;;  %1348 = vmatprep.subr.mxu1 %v4449_v38  ;;  %1078 = vst.msk [vmem:[#allocation3 + $0x6] sm:$0x1] %vm346_vm2, %v4436_v34 }
 0xd8c   :  { %1084 = vst.msk [vmem:[#allocation3 + $0x15] sm:$0x2] %vm353_vm3, %v4436_v34  ;;  %1349 = vmatpush1.msra.mxu1 %v4459_v39 }
 0xd8d   :  { %1350 = vmatprep.subr.mxu1 %v4465_v40 }
 0xd8e   :  { %1351 = vmatpush1.msra.mxu1 %v4471_v41 }
 0xd8f   :  { %1352 = vmatprep.subr.mxu1 %v4477_v45 }
 0xd90   :  { %1353 = vmatpush1.msra.mxu1 %v4483_v49 }
 0xd91   :  { %1354 = vmatprep.subr.mxu1 %v4053_v23 }
 0xd92   :  { %1355 = vmatpush1.msra.mxu1 %v4062_v25 }
 0xd93   :  { %1356 = vmatprep.subr.mxu1 %v4071_v27 }
 0xd94   :  { %1357 = vmatpush1.msra.mxu1 %v4080_v29  ;;  %v1086_v29 = vld [vmem:[#allocation2 + $0x10] sm:$0xc0] }
 0xd95   :  { %1358 = vmatprep.subr.mxu1 %v4089_v31 }
 0xd96   :  { %1359 = vmatpush1.msra.mxu1 %v4098_v33 }
 0xd97   :  { %1360 = vmatprep.subr.mxu1 %v4107_v35 }
 0xd98   :  { %1361 = vmatpush1.msra.mxu1 %v4116_v37 }
 0xd99   :  { %1592 = vmatprep.subr.mxu1 %v4497_v47 }
 0xdfd   :  { %v1187_v19 = vpop.permute.xlu1 %1186 }
 0xe49   :  { %v1158_v23 = vpop.f32.mrf.mxu1 }
 0xe4a   :  { %v1159_v25 = vadd.f32 %v1158_v23, %v4194_v53 }
 0xe4b   :  { %v1160_v35 = vpop.f32.mrf.mxu1 }
 0xe4c   :  { %v1164_v27 = vrot.slane %v1159_v25, 2  ;;  %v1161_v37 = vadd.f32 %v1160_v35, %v4200_v62 }
 0xe4e   :  { %v1166_v48 = vadd.f32 %v1164_v27, %v1086_v29  ;;  %v1174_v51 = vrot.slane %v1161_v37, 2 }
 0xe50   :  { %v3338_v31 = vmul.f32 -1.442695, %v1166_v48 }
 0xe52   :  { %3683 = vpow2.f32 %v3338_v31 }
 0xe5f   :  { %v3684_v33 = vpop.eup %3683 }
 0xe60   :  { %v1170_v28 = vadd.f32 1.0, %v3684_v33 }
 0xe62   :  { %3685 = vrcp.f32 %v1170_v28  ;;  %v1210_v28 = vld [vmem:[#allocation2 + $0x28] sm:$0x3] }
 0xe6f   :  { %v3686_v52 = vpop.eup %3685 }
 0xe70   :  { %v1176_v10 = vmul.f32 %v3686_v52, %v1174_v51  ;;  %v1179_v17 = vsub.f32 1.0, %v3686_v52  ;;  %v1189_v55 = vmul.f32 %v3686_v52, %v1187_v19 }
 0xe72   :  { %v1177_v14 = vadd.f32 %v1176_v10, %v1087_v12 }
 0xe74   :  { %3687 = vtanh.f32 %v1177_v14 }
 0xe81   :  { %v3688_v15 = vpop.eup %3687 }
 0xe82   :  { %1181 = vrot.lane.b32.xlu0 %v3688_v15, %s3844_s5 }
 0xef4   :  { %v1182_v21 = vpop.permute.xlu0 %1181 }
 0xef5   :  { %v1184_v56 = vmul.f32 %v1182_v21, %v1179_v17  ;;  %v1211_v17 = vld [vmem:[%s5217_s30 + $0x10] sm:$0x3] }
 0xef6   :  { %v1312_v19 = vsub.f32 1.0, %v1211_v17 }
 0xef7   :  { %v1190_v57 = vadd.f32 %v1189_v55, %v1184_v56 }
 0xef9   :  { %v1192_v58 = vrot.slane %v1190_v57, 6 }
 0xefb   :  { %1193 = vrot.lane.b32.xlu0 %v1192_v58, %s3844_s5 }
 0xf6d   :  { %v1194_v63 = vpop.permute.xlu0 %1193 }
 0xf6e   :  { %v1196_v9 = vmul.f32 %v1194_v63, %v1088_v59 }
 0xf70   :  { %v1199_v1 = vadd.f32 %v1198_v0, %v1196_v9  ;;  %v1324_v9 = vld [vmem:[#allocation2 + $0x20] sm:$0xc] }
 0xf72   :  { %1302 = vrot.lane.b32.xlu0 %v1199_v1, %s3844_s5  ;;  %3339 = vmatmul.mubr.msk.f32.vlgmr.msra.gmra.mxu0 %vm206_vm1, %v1199_v1  ;;  %v4510_v2 = vmul.f32 %v1199_v1, %v1088_v59  ;;  %v1313_v55 = vmul.f32 %v1312_v19, %v1199_v1 }
 0xf73   :  { %1470 = vmatpush1.msra.mxu0 %v4441_v36  ;;  %1517 = vmatprep.mubr.f32.mxu0 %v3843_v4 }
 0xf74   :  { %1471 = vmatprep.subr.mxu0 %v4449_v38  ;;  %1201 = vst.msk [vmem:[#allocation3 + $0x7] sm:$0x1] %vm346_vm2, %v4510_v2 }
 0xf75   :  { %1207 = vst.msk [vmem:[#allocation3 + $0x16] sm:$0x2] %vm353_vm3, %v4510_v2  ;;  %1472 = vmatpush1.msra.mxu0 %v4459_v39 }
 0xf76   :  { %1473 = vmatprep.subr.mxu0 %v4465_v40 }
 0xf77   :  { %1474 = vmatpush1.msra.mxu0 %v4471_v41 }
 0xf78   :  { %1475 = vmatprep.subr.mxu0 %v4477_v45 }
 0xf79   :  { %1476 = vmatpush1.msra.mxu0 %v4483_v49 }
 0xf7a   :  { %1477 = vmatprep.subr.mxu0 %v4527_v3 }
 0xf7b   :  { %1478 = vmatpush1.msra.mxu0 %v4533_v5 }
 0xf7c   :  { %1479 = vmatprep.subr.mxu0 %v4539_v6 }
 0xf7d   :  { %1480 = vmatpush1.msra.mxu0 %v4545_v7 }
 0xf7e   :  { %1481 = vmatprep.subr.mxu0 %v4551_v11 }
 0xf7f   :  { %1482 = vmatpush1.msra.mxu0 %v4557_v13 }
 0xf80   :  { %1483 = vmatprep.subr.mxu0 %v4563_v16 }
 0xf81   :  { %1484 = vmatpush1.msra.mxu0 %v4569_v18 }
 0xf82   :  { %1715 = vmatprep.subr.mxu0 %v4497_v47 }
 0xfe4   :  { %v1303_v52 = vpop.permute.xlu0 %1302 }
0x1032   :  { %v1281_v20 = vpop.f32.mrf.mxu0 }
0x1033   :  { %v1282_v22 = vadd.f32 %v1281_v20, %v4194_v53 }
0x1034   :  { %v1283_v29 = vpop.f32.mrf.mxu0 }
0x1035   :  { %v1286_v26 = vadd.f32 %v1282_v22, %v1209_v24  ;;  %v1284_v48 = vadd.f32 %v1283_v29, %v4200_v62 }
0x1037   :  { %v3340_v23 = vmul.f32 -1.442695, %v1286_v26 }
0x1039   :  { %3689 = vpow2.f32 %v3340_v23 }
0x1046   :  { %v3690_v25 = vpop.eup %3689 }
0x1047   :  { %v1290_v27 = vadd.f32 1.0, %v3690_v25 }
0x1049   :  { %3691 = vrcp.f32 %v1290_v27 }
0x1056   :  { %v3692_v31 = vpop.eup %3691 }
0x1057   :  { %v1293_v33 = vmul.f32 %v3692_v31, %v1284_v48  ;;  %v1296_v51 = vsub.f32 1.0, %v3692_v31  ;;  %v1305_v12 = vmul.f32 %v3692_v31, %v1303_v52  ;;  %v1325_v48 = vld [vmem:[#allocation2 + $0x28] sm:$0xc] }
0x1059   :  { %v1294_v35 = vadd.f32 %v1293_v33, %v1210_v28 }
0x105b   :  { %3693 = vtanh.f32 %v1294_v35 }
0x1068   :  { %v3694_v37 = vpop.eup %3693 }
0x1069   :  { %1298 = vrot.lane.b32.xlu1 %v3694_v37, %s3844_s5 }
0x10db   :  { %v1299_v10 = vpop.permute.xlu1 %1298 }
0x10dc   :  { %v1301_v14 = vmul.f32 %v1299_v10, %v1296_v51 }
0x10de   :  { %v1306_v15 = vadd.f32 %v1305_v12, %v1301_v14  ;;  %v1326_v14 = vld [vmem:[%s5217_s30 + $0x12] sm:$0x3] }
0x10e0   :  { %1308 = vrot.lane.b32.xlu1 %v1306_v15, %s3844_s5  ;;  %v1435_v15 = vsub.f32 1.0, %v1326_v14 }
0x1152   :  { %v1309_v21 = vpop.permute.xlu1 %1308 }
0x1153   :  { %v1311_v56 = vmul.f32 %v1309_v21, %v1211_v17 }
0x1155   :  { %v1314_v57 = vadd.f32 %v1313_v55, %v1311_v56 }
0x1157   :  { %3341 = vmatmul.mubr.msk.f32.vlgmr.msra.gmra.mxu1 %vm206_vm1, %v1314_v57  ;;  %v1423_v58 = vrot.slane %v1314_v57, 6  ;;  %v4581_v59 = vmul.f32 %v1314_v57, %v1211_v17  ;;  %v1436_v19 = vmul.f32 %v1435_v15, %v1314_v57 }
0x1158   :  { %1593 = vmatpush1.msra.mxu1 %v4441_v36  ;;  %1640 = vmatprep.mubr.f32.mxu1 %v3843_v4 }
0x1159   :  { %1424 = vrot.lane.b32.xlu1 %v1423_v58, %s3844_s5  ;;  %1594 = vmatprep.subr.mxu1 %v4449_v38  ;;  %1316 = vst.msk [vmem:[#allocation3 + $0x8] sm:$0x1] %vm346_vm2, %v4581_v59 }
0x115a   :  { %1322 = vst.msk [vmem:[#allocation3 + $0x17] sm:$0x2] %vm353_vm3, %v4581_v59  ;;  %1595 = vmatpush1.msra.mxu1 %v4459_v39 }
0x115b   :  { %1596 = vmatprep.subr.mxu1 %v4465_v40 }
0x115c   :  { %1597 = vmatpush1.msra.mxu1 %v4471_v41 }
0x115d   :  { %1598 = vmatprep.subr.mxu1 %v4477_v45 }
0x115e   :  { %1599 = vmatpush1.msra.mxu1 %v4483_v49 }
0x115f   :  { %1600 = vmatprep.subr.mxu1 %v4527_v3 }
0x1160   :  { %1601 = vmatpush1.msra.mxu1 %v4533_v5 }
0x1161   :  { %1602 = vmatprep.subr.mxu1 %v4539_v6 }
0x1162   :  { %1603 = vmatpush1.msra.mxu1 %v4545_v7 }
0x1163   :  { %1604 = vmatprep.subr.mxu1 %v4551_v11 }
0x1164   :  { %1605 = vmatpush1.msra.mxu1 %v4557_v13 }
0x1165   :  { %1606 = vmatprep.subr.mxu1 %v4563_v16 }
0x1166   :  { %1607 = vmatpush1.msra.mxu1 %v4569_v18 }
0x1167   :  { %1830 = vmatprep.subr.mxu1 %v4497_v47 }
0x11cb   :  { %v1425_v35 = vpop.permute.xlu1 %1424 }
0x1217   :  { %v1396_v61 = vpop.f32.mrf.mxu1 }
0x1218   :  { %v1397_v63 = vadd.f32 %v1396_v61, %v4194_v53 }
0x1219   :  { %v1398_v26 = vpop.f32.mrf.mxu1 }
0x121a   :  { %v1402_v0 = vrot.slane %v1397_v63, 6  ;;  %v1399_v23 = vadd.f32 %v1398_v26, %v4200_v62 }
0x121c   :  { %v1404_v1 = vadd.f32 %v1402_v0, %v1324_v9  ;;  %v1412_v25 = vrot.slane %v1399_v23, 6  ;;  %v1447_v0 = vld [vmem:[#allocation2 + $0x20] sm:$0x30] }
0x121e   :  { %v3342_v20 = vmul.f32 -1.442695, %v1404_v1 }
0x1220   :  { %3695 = vpow2.f32 %v3342_v20 }
0x122d   :  { %v3696_v22 = vpop.eup %3695 }
0x122e   :  { %v1408_v24 = vadd.f32 1.0, %v3696_v22 }
0x1230   :  { %3697 = vrcp.f32 %v1408_v24 }
0x123d   :  { %v3698_v27 = vpop.eup %3697 }
0x123e   :  { %v1414_v29 = vmul.f32 %v3698_v27, %v1412_v25  ;;  %v1417_v28 = vsub.f32 1.0, %v3698_v27  ;;  %v1427_v51 = vmul.f32 %v3698_v27, %v1425_v35 }
0x1240   :  { %v1415_v31 = vadd.f32 %v1414_v29, %v1325_v48  ;;  %v1448_v29 = vld [vmem:[#allocation2 + $0x28] sm:$0x30] }
0x1242   :  { %3699 = vtanh.f32 %v1415_v31 }
0x124f   :  { %v3700_v33 = vpop.eup %3699 }
0x1250   :  { %1419 = vrot.lane.b32.xlu0 %v3700_v33, %s3844_s5 }
0x12c2   :  { %v1420_v37 = vpop.permute.xlu0 %1419 }
0x12c3   :  { %v1422_v52 = vmul.f32 %v1420_v37, %v1417_v28 }
0x12c5   :  { %v1428_v10 = vadd.f32 %v1427_v51, %v1422_v52 }
0x12c7   :  { %v1430_v12 = vrot.slane %v1428_v10, 2 }
0x12c9   :  { %1431 = vrot.lane.b32.xlu0 %v1430_v12, %s3844_s5  ;;  %v1449_v12 = vld [vmem:[%s5217_s30 + $0x14] sm:$0x3] }
0x133b   :  { %v1432_v17 = vpop.permute.xlu0 %1431 }
0x133c   :  { %v1434_v21 = vmul.f32 %v1432_v17, %v1326_v14 }
0x133e   :  { %v1437_v55 = vadd.f32 %v1436_v19, %v1434_v21 }
0x1340   :  { %3343 = vmatmul.mubr.msk.f32.vlgmr.msra.gmra.mxu0 %vm206_vm1, %v1437_v55  ;;  %v1546_v56 = vrot.slane %v1437_v55, 4  ;;  %v4613_v58 = vmul.f32 %v1437_v55, %v1326_v14  ;;  %v1558_v14 = vsub.f32 1.0, %v1449_v12 }
0x1341   :  { %1716 = vmatpush1.msra.mxu0 %v4441_v36  ;;  %1763 = vmatprep.mubr.f32.mxu0 %v3843_v4 }
0x1342   :  { %1547 = vrot.lane.b32.xlu0 %v1546_v56, %s3844_s5  ;;  %1717 = vmatprep.subr.mxu0 %v4449_v38  ;;  %1439 = vst.msk [vmem:[#allocation3 + $0x9] sm:$0x1] %vm346_vm2, %v4613_v58  ;;  %v1559_v17 = vmul.f32 %v1558_v14, %v1437_v55 }
0x1343   :  { %1445 = vst.msk [vmem:[#allocation3 + $0x18] sm:$0x2] %vm353_vm3, %v4613_v58  ;;  %1718 = vmatpush1.msra.mxu0 %v4459_v39 }
0x1344   :  { %1719 = vmatprep.subr.mxu0 %v4465_v40 }
0x1345   :  { %1720 = vmatpush1.msra.mxu0 %v4471_v41 }
0x1346   :  { %1721 = vmatprep.subr.mxu0 %v4477_v45 }
0x1347   :  { %1722 = vmatpush1.msra.mxu0 %v4483_v49 }
0x1348   :  { %1723 = vmatprep.subr.mxu0 %v4527_v3 }
0x1349   :  { %1724 = vmatpush1.msra.mxu0 %v4533_v5 }
0x134a   :  { %1725 = vmatprep.subr.mxu0 %v4539_v6 }
0x134b   :  { %1726 = vmatpush1.msra.mxu0 %v4545_v7 }
0x134c   :  { %1727 = vmatprep.subr.mxu0 %v4551_v11 }
0x134d   :  { %1728 = vmatpush1.msra.mxu0 %v4557_v13 }
0x134e   :  { %1729 = vmatprep.subr.mxu0 %v4563_v16 }
0x134f   :  { %1730 = vmatpush1.msra.mxu0 %v4569_v18 }
0x1350   :  { %1953 = vmatprep.subr.mxu0 %v4497_v47 }
0x13b4   :  { %v1548_v28 = vpop.permute.xlu0 %1547 }
0x1400   :  { %v1519_v57 = vpop.f32.mrf.mxu0 }
0x1401   :  { %v1520_v61 = vadd.f32 %v1519_v57, %v4194_v53 }
0x1402   :  { %v1521_v24 = vpop.f32.mrf.mxu0 }
0x1403   :  { %v1525_v63 = vrot.slane %v1520_v61, 4  ;;  %v1522_v26 = vadd.f32 %v1521_v24, %v4200_v62 }
0x1405   :  { %v1527_v9 = vadd.f32 %v1525_v63, %v1447_v0  ;;  %v1535_v23 = vrot.slane %v1522_v26, 4  ;;  %v1570_v0 = vld [vmem:[#allocation2 + $0x20] sm:$0xc0] }
0x1407   :  { %v3344_v1 = vmul.f32 -1.442695, %v1527_v9 }
0x1409   :  { %3701 = vpow2.f32 %v3344_v1 }
0x1416   :  { %v3702_v20 = vpop.eup %3701 }
0x1417   :  { %v1531_v22 = vadd.f32 1.0, %v3702_v20 }
0x1419   :  { %3703 = vrcp.f32 %v1531_v22 }
0x1426   :  { %v3704_v25 = vpop.eup %3703 }
0x1427   :  { %v1537_v27 = vmul.f32 %v3704_v25, %v1535_v23  ;;  %v1540_v33 = vsub.f32 1.0, %v3704_v25  ;;  %v1550_v37 = vmul.f32 %v3704_v25, %v1548_v28 }
0x1429   :  { %v1538_v48 = vadd.f32 %v1537_v27, %v1448_v29  ;;  %v1571_v29 = vld [vmem:[#allocation2 + $0x28] sm:$0xc0] }
0x142b   :  { %3705 = vtanh.f32 %v1538_v48 }
0x1438   :  { %v3706_v31 = vpop.eup %3705 }
0x1439   :  { %1542 = vrot.lane.b32.xlu1 %v3706_v31, %s3844_s5 }
0x14ab   :  { %v1543_v35 = vpop.permute.xlu1 %1542 }
0x14ac   :  { %v1545_v51 = vmul.f32 %v1543_v35, %v1540_v33 }
0x14ae   :  { %v1551_v52 = vadd.f32 %v1550_v37, %v1545_v51 }
0x14b0   :  { %v1553_v10 = vrot.slane %v1551_v52, 4 }
0x14b2   :  { %1554 = vrot.lane.b32.xlu1 %v1553_v10, %s3844_s5  ;;  %v1572_v10 = vld [vmem:[%s5217_s30 + $0x16] sm:$0x3] }
0x1524   :  { %v1555_v15 = vpop.permute.xlu1 %1554 }
0x1525   :  { %v1557_v19 = vmul.f32 %v1555_v15, %v1449_v12 }
0x1527   :  { %v1560_v21 = vadd.f32 %v1559_v17, %v1557_v19 }
0x1529   :  { %3345 = vmatmul.mubr.msk.f32.vlgmr.msra.gmra.mxu1 %vm206_vm1, %v1560_v21  ;;  %v1669_v56 = vrot.slane %v1560_v21, 2  ;;  %v4645_v57 = vmul.f32 %v1560_v21, %v1449_v12  ;;  %v1681_v12 = vsub.f32 1.0, %v1572_v10 }
0x152a   :  { %1831 = vmatpush1.msra.mxu1 %v4441_v36  ;;  %1878 = vmatprep.mubr.f32.mxu1 %v3843_v4 }
0x152b   :  { %1670 = vrot.lane.b32.xlu1 %v1669_v56, %s3844_s5  ;;  %1832 = vmatprep.subr.mxu1 %v4449_v38  ;;  %1562 = vst.msk [vmem:[#allocation3 + $0xa] sm:$0x1] %vm346_vm2, %v4645_v57  ;;  %v1682_v15 = vmul.f32 %v1681_v12, %v1560_v21 }
0x152c   :  { %1568 = vst.msk [vmem:[#allocation3 + $0x19] sm:$0x2] %vm353_vm3, %v4645_v57  ;;  %1833 = vmatpush1.msra.mxu1 %v4459_v39 }
0x152d   :  { %1834 = vmatprep.subr.mxu1 %v4465_v40 }
0x152e   :  { %1835 = vmatpush1.msra.mxu1 %v4471_v41 }
0x152f   :  { %1836 = vmatprep.subr.mxu1 %v4477_v45 }
0x1530   :  { %1837 = vmatpush1.msra.mxu1 %v4483_v49 }
0x1531   :  { %1838 = vmatprep.subr.mxu1 %v4527_v3 }
0x1532   :  { %1839 = vmatpush1.msra.mxu1 %v4533_v5 }
0x1533   :  { %1840 = vmatprep.subr.mxu1 %v4539_v6 }
0x1534   :  { %1841 = vmatpush1.msra.mxu1 %v4545_v7 }
0x1535   :  { %1842 = vmatprep.subr.mxu1 %v4551_v11 }
0x1536   :  { %1843 = vmatpush1.msra.mxu1 %v4557_v13 }
0x1537   :  { %1844 = vmatprep.subr.mxu1 %v4563_v16 }
0x1538   :  { %1845 = vmatpush1.msra.mxu1 %v4569_v18 }
0x1539   :  { %2076 = vmatprep.subr.mxu1 %v4497_v47 }
0x159d   :  { %v1671_v33 = vpop.permute.xlu1 %1670 }
0x15e9   :  { %v1642_v55 = vpop.f32.mrf.mxu1 }
0x15ea   :  { %v1643_v61 = vadd.f32 %v1642_v55, %v4194_v53 }
0x15eb   :  { %v1644_v24 = vpop.f32.mrf.mxu1 }
0x15ec   :  { %v1648_v63 = vrot.slane %v1643_v61, 2  ;;  %v1645_v26 = vadd.f32 %v1644_v24, %v4200_v62  ;;  %v1693_v61 = vld [vmem:[#allocation2 + $0x30] sm:$0x3] }
0x15ee   :  { %v1650_v9 = vadd.f32 %v1648_v63, %v1570_v0  ;;  %v1658_v23 = vrot.slane %v1645_v26, 2 }
0x15f0   :  { %v3346_v1 = vmul.f32 -1.442695, %v1650_v9 }
0x15f2   :  { %3707 = vpow2.f32 %v3346_v1 }
0x15ff   :  { %v3708_v20 = vpop.eup %3707 }
0x1600   :  { %v1654_v22 = vadd.f32 1.0, %v3708_v20 }
0x1602   :  { %3709 = vrcp.f32 %v1654_v22 }
0x160f   :  { %v3710_v25 = vpop.eup %3709 }
0x1610   :  { %v1660_v27 = vmul.f32 %v3710_v25, %v1658_v23  ;;  %v1663_v31 = vsub.f32 1.0, %v3710_v25  ;;  %v1673_v35 = vmul.f32 %v3710_v25, %v1671_v33  ;;  %v1694_v23 = vld [vmem:[#allocation2 + $0x38] sm:$0x3] }
0x1612   :  { %v1661_v48 = vadd.f32 %v1660_v27, %v1571_v29 }
0x1614   :  { %3711 = vtanh.f32 %v1661_v48 }
0x1621   :  { %v3712_v47 = vpop.eup %3711 }
0x1622   :  { %1665 = vrot.lane.b32.xlu0 %v3712_v47, %s3844_s5 }
0x1694   :  { %v1666_v28 = vpop.permute.xlu0 %1665 }
0x1695   :  { %v1668_v37 = vmul.f32 %v1666_v28, %v1663_v31 }
0x1697   :  { %v1674_v51 = vadd.f32 %v1673_v35, %v1668_v37  ;;  %v1695_v35 = vld [vmem:[%s5217_s30 + $0x18] sm:$0x3] }
0x1698   :  { %v1796_v37 = vsub.f32 1.0, %v1695_v35 }
0x1699   :  { %v1676_v52 = vrot.slane %v1674_v51, 6 }
0x169b   :  { %1677 = vrot.lane.b32.xlu0 %v1676_v52, %s3844_s5 }
0x170d   :  { %v1678_v14 = vpop.permute.xlu0 %1677 }
0x170e   :  { %v1680_v17 = vmul.f32 %v1678_v14, %v1572_v10 }
0x1710   :  { %v1683_v19 = vadd.f32 %v1682_v15, %v1680_v17 }
0x1712   :  { %1786 = vrot.lane.b32.xlu0 %v1683_v19, %s3844_s5  ;;  %3347 = vmatmul.mubr.msk.f32.vlgmr.msra.gmra.mxu0 %vm206_vm1, %v1683_v19  ;;  %v4678_v56 = vmul.f32 %v1683_v19, %v1572_v10  ;;  %v1797_v52 = vmul.f32 %v1796_v37, %v1683_v19 }
0x1713   :  { %1954 = vmatpush1.msra.mxu0 %v4441_v36  ;;  %2001 = vmatprep.mubr.f32.mxu0 %v3843_v4 }
0x1714   :  { %1955 = vmatprep.subr.mxu0 %v4449_v38  ;;  %1685 = vst.msk [vmem:[#allocation3 + $0xb] sm:$0x1] %vm346_vm2, %v4678_v56 }
0x1715   :  { %1691 = vst.msk [vmem:[#allocation3 + $0x1a] sm:$0x2] %vm353_vm3, %v4678_v56  ;;  %1956 = vmatpush1.msra.mxu0 %v4459_v39 }
0x1716   :  { %1957 = vmatprep.subr.mxu0 %v4465_v40 }
0x1717   :  { %1958 = vmatpush1.msra.mxu0 %v4471_v41 }
0x1718   :  { %1959 = vmatprep.subr.mxu0 %v4477_v45 }
0x1719   :  { %1960 = vmatpush1.msra.mxu0 %v4483_v49 }
0x171a   :  { %1961 = vmatprep.subr.mxu0 %v4527_v3 }
0x171b   :  { %1962 = vmatpush1.msra.mxu0 %v4533_v5 }
0x171c   :  { %1963 = vmatprep.subr.mxu0 %v4539_v6 }
0x171d   :  { %1964 = vmatpush1.msra.mxu0 %v4545_v7 }
0x171e   :  { %1965 = vmatprep.subr.mxu0 %v4551_v11 }
0x171f   :  { %1966 = vmatpush1.msra.mxu0 %v4557_v13 }
0x1720   :  { %1967 = vmatprep.subr.mxu0 %v4563_v16 }
0x1721   :  { %1968 = vmatpush1.msra.mxu0 %v4569_v18 }
0x1784   :  { %v1787_v48 = vpop.permute.xlu0 %1786 }
0x17d2   :  { %v1765_v21 = vpop.f32.mrf.mxu0 }
0x17d3   :  { %v1766_v55 = vadd.f32 %v1765_v21, %v4194_v53 }
0x17d4   :  { %v1767_v20 = vpop.f32.mrf.mxu0 }
0x17d5   :  { %v1770_v63 = vadd.f32 %v1766_v55, %v1693_v61  ;;  %v1768_v22 = vadd.f32 %v1767_v20, %v4200_v62 }
0x17d7   :  { %v3348_v0 = vmul.f32 -1.442695, %v1770_v63 }
0x17d9   :  { %3713 = vpow2.f32 %v3348_v0 }
0x17e6   :  { %v3714_v9 = vpop.eup %3713 }
0x17e7   :  { %v1774_v1 = vadd.f32 1.0, %v3714_v9 }
0x17e9   :  { %3715 = vrcp.f32 %v1774_v1  ;;  %v1810_v1 = vld [vmem:[%s5217_s30 + $0x1a] sm:$0x3] }
0x17ea   :  { %v1919_v20 = vsub.f32 1.0, %v1810_v1 }
0x17f6   :  { %v3716_v24 = vpop.eup %3715 }
0x17f7   :  { %v1777_v26 = vmul.f32 %v3716_v24, %v1768_v22  ;;  %v1780_v29 = vsub.f32 1.0, %v3716_v24  ;;  %v1789_v31 = vmul.f32 %v3716_v24, %v1787_v48 }
0x17f9   :  { %v1778_v25 = vadd.f32 %v1777_v26, %v1694_v23 }
0x17fb   :  { %3717 = vtanh.f32 %v1778_v25 }
0x1808   :  { %v3718_v27 = vpop.eup %3717 }
0x1809   :  { %1782 = vrot.lane.b32.xlu1 %v3718_v27, %s3844_s5 }
0x187b   :  { %v1783_v47 = vpop.permute.xlu1 %1782 }
0x187c   :  { %v1785_v33 = vmul.f32 %v1783_v47, %v1780_v29 }
0x187e   :  { %v1790_v28 = vadd.f32 %v1789_v31, %v1785_v33  ;;  %v1931_v31 = vld [vmem:[#allocation2 + $0x30] sm:$0x30] }
0x1880   :  { %1792 = vrot.lane.b32.xlu1 %v1790_v28, %s3844_s5 }
0x18f2   :  { %v1793_v51 = vpop.permute.xlu1 %1792 }
0x18f3   :  { %v1795_v10 = vmul.f32 %v1793_v51, %v1695_v35 }
0x18f5   :  { %v1798_v12 = vadd.f32 %v1797_v52, %v1795_v10 }
0x18f7   :  { %3349 = vmatmul.mubr.msk.f32.vlgmr.msra.gmra.mxu1 %vm206_vm1, %v1798_v12  ;;  %v1907_v14 = vrot.slane %v1798_v12, 6  ;;  %v4708_v15 = vmul.f32 %v1798_v12, %v1695_v35  ;;  %v1920_v24 = vmul.f32 %v1919_v20, %v1798_v12 }
0x18f8   :  { %2077 = vmatpush1.msra.mxu1 %v4441_v36  ;;  %2124 = vmatprep.mubr.f32.mxu1 %v3843_v4 }
0x18f9   :  { %1908 = vrot.lane.b32.xlu1 %v1907_v14, %s3844_s5  ;;  %2078 = vmatprep.subr.mxu1 %v4449_v38  ;;  %1800 = vst.msk [vmem:[#allocation3 + $0xc] sm:$0x1] %vm346_vm2, %v4708_v15 }
0x18fa   :  { %1806 = vst.msk [vmem:[#allocation3 + $0x1b] sm:$0x2] %vm353_vm3, %v4708_v15  ;;  %2079 = vmatpush1.msra.mxu1 %v4459_v39 }
0x18fb   :  { %2080 = vmatprep.subr.mxu1 %v4465_v40  ;;  %v1808_v40 = vld [vmem:[#allocation2 + $0x30] sm:$0xc] }
0x18fc   :  { %2081 = vmatpush1.msra.mxu1 %v4471_v41 }
0x18fd   :  { %2082 = vmatprep.subr.mxu1 %v4477_v45 }
0x18fe   :  { %2083 = vmatpush1.msra.mxu1 %v4483_v49 }
0x18ff   :  { %2084 = vmatprep.subr.mxu1 %v4527_v3 }
0x1900   :  { %2085 = vmatpush1.msra.mxu1 %v4533_v5 }
0x1901   :  { %2086 = vmatprep.subr.mxu1 %v4539_v6 }
0x1902   :  { %2087 = vmatpush1.msra.mxu1 %v4545_v7 }
0x1903   :  { %2088 = vmatprep.subr.mxu1 %v4551_v11 }
0x1904   :  { %2089 = vmatpush1.msra.mxu1 %v4557_v13 }
0x1905   :  { %2090 = vmatprep.subr.mxu1 %v4563_v16  ;;  %v1809_v16 = vld [vmem:[#allocation2 + $0x38] sm:$0xc] }
0x1906   :  { %2091 = vmatpush1.msra.mxu1 %v4569_v18 }
0x196b   :  { %v1909_v21 = vpop.permute.xlu1 %1908 }
0x19b7   :  { %v1880_v36 = vpop.f32.mrf.mxu1 }
0x19b8   :  { %v1881_v38 = vadd.f32 %v1880_v36, %v4194_v53  ;;  %v1932_v36 = vld [vmem:[#allocation2 + $0x38] sm:$0x30] }
0x19b9   :  { %v1882_v5 = vpop.f32.mrf.mxu1 }
0x19ba   :  { %v1886_v39 = vrot.slane %v1881_v38, 6  ;;  %v1883_v6 = vadd.f32 %v1882_v5, %v4200_v62 }
0x19bc   :  { %v1888_v41 = vadd.f32 %v1886_v39, %v1808_v40  ;;  %v1896_v7 = vrot.slane %v1883_v6, 6 }
0x19be   :  { %v3350_v45 = vmul.f32 -1.442695, %v1888_v41 }
0x19c0   :  { %3719 = vpow2.f32 %v3350_v45 }
0x19cd   :  { %v3720_v49 = vpop.eup %3719 }
0x19ce   :  { %v1892_v3 = vadd.f32 1.0, %v3720_v49 }
0x19d0   :  { %3721 = vrcp.f32 %v1892_v3 }
0x19dd   :  { %v3722_v11 = vpop.eup %3721 }
0x19de   :  { %v1898_v13 = vmul.f32 %v3722_v11, %v1896_v7  ;;  %v1901_v19 = vsub.f32 1.0, %v3722_v11  ;;  %v1911_v61 = vmul.f32 %v3722_v11, %v1909_v21  ;;  %v1933_v7 = vld [vmem:[%s5217_s30 + $0x1c] sm:$0x3] }
0x19df   :  { %v2042_v11 = vsub.f32 1.0, %v1933_v7 }
0x19e0   :  { %v1899_v17 = vadd.f32 %v1898_v13, %v1809_v16 }
0x19e2   :  { %3723 = vtanh.f32 %v1899_v17 }
0x19ef   :  { %v3724_v18 = vpop.eup %3723 }
0x19f0   :  { %1903 = vrot.lane.b32.xlu0 %v3724_v18, %s3844_s5 }
0x1a62   :  { %v1904_v55 = vpop.permute.xlu0 %1903 }
0x1a63   :  { %v1906_v63 = vmul.f32 %v1904_v55, %v1901_v19 }
0x1a65   :  { %v1912_v0 = vadd.f32 %v1911_v61, %v1906_v63 }
0x1a67   :  { %v1914_v9 = vrot.slane %v1912_v0, 2 }
0x1a69   :  { %1915 = vrot.lane.b32.xlu0 %v1914_v9, %s3844_s5 }
0x1adb   :  { %v1916_v22 = vpop.permute.xlu0 %1915 }
0x1adc   :  { %v1918_v26 = vmul.f32 %v1916_v22, %v1810_v1 }
0x1ade   :  { %v1921_v23 = vadd.f32 %v1920_v24, %v1918_v26 }
0x1ae0   :  { %3351 = vmatmul.mubr.msk.f32.vlgmr.msra.gmra.mxu0 %vm206_vm1, %v1921_v23  ;;  %v2030_v25 = vrot.slane %v1921_v23, 4  ;;  %v4739_v27 = vmul.f32 %v1921_v23, %v1810_v1  ;;  %v2043_v16 = vmul.f32 %v2042_v11, %v1921_v23  ;;  %v2054_v1 = vld [vmem:[#allocation2 + $0x30] sm:$0xc0] }
0x1ae2   :  { %2031 = vrot.lane.b32.xlu0 %v2030_v25, %s3844_s5  ;;  %1923 = vst.msk [vmem:[#allocation3 + $0xd] sm:$0x1] %vm346_vm2, %v4739_v27 }
0x1ae3   :  { %1929 = vst.msk [vmem:[#allocation3 + $0x1c] sm:$0x2] %vm353_vm3, %v4739_v27 }
0x1b54   :  { %v2032_v41 = vpop.permute.xlu0 %2031 }
0x1ba0   :  { %v2003_v29 = vpop.f32.mrf.mxu0 }
0x1ba1   :  { %v2004_v48 = vadd.f32 %v2003_v29, %v4194_v53 }
0x1ba2   :  { %v2005_v51 = vpop.f32.mrf.mxu0 }
0x1ba3   :  { %v2009_v47 = vrot.slane %v2004_v48, 4  ;;  %v2006_v52 = vadd.f32 %v2005_v51, %v4200_v62 }
0x1ba5   :  { %v2011_v33 = vadd.f32 %v2009_v47, %v1931_v31  ;;  %v2019_v10 = vrot.slane %v2006_v52, 4  ;;  %v2055_v31 = vld [vmem:[#allocation2 + $0x38] sm:$0xc0] }
0x1ba7   :  { %v3352_v28 = vmul.f32 -1.442695, %v2011_v33 }
0x1ba9   :  { %3725 = vpow2.f32 %v3352_v28 }
0x1bb6   :  { %v3726_v35 = vpop.eup %3725 }
0x1bb7   :  { %v2015_v37 = vadd.f32 1.0, %v3726_v35 }
0x1bb9   :  { %3727 = vrcp.f32 %v2015_v37 }
0x1bc6   :  { %v3728_v12 = vpop.eup %3727 }
0x1bc7   :  { %v2021_v14 = vmul.f32 %v3728_v12, %v2019_v10  ;;  %v2024_v40 = vsub.f32 1.0, %v3728_v12  ;;  %v2034_v49 = vmul.f32 %v3728_v12, %v2032_v41  ;;  %v2214_v41 = vld [vmem:[%s5194_s11 + $0x20] sm:$0xff] }
0x1bc9   :  { %v2022_v38 = vadd.f32 %v2021_v14, %v1932_v36 }
0x1bcb   :  { %3729 = vtanh.f32 %v2022_v38  ;;  %v2216_v38 = vld [vmem:[%s5194_s11 + $0x30] sm:$0xff] }
0x1bd8   :  { %v3730_v39 = vpop.eup %3729 }
0x1bd9   :  { %2026 = vrot.lane.b32.xlu1 %v3730_v39, %s3844_s5 }
0x1c4b   :  { %v2027_v45 = vpop.permute.xlu1 %2026 }
0x1c4c   :  { %v2029_v3 = vmul.f32 %v2027_v45, %v2024_v40  ;;  %v2215_v40 = vld [vmem:[%s5194_s11 + $0x28] sm:$0xff] }
0x1c4e   :  { %v2035_v5 = vadd.f32 %v2034_v49, %v2029_v3  ;;  %v2212_v49 = vld [vmem:[%s5194_s11 + $0x10] sm:$0xff] }
0x1c50   :  { %v2037_v6 = vrot.slane %v2035_v5, 4 }
0x1c52   :  { %2038 = vrot.lane.b32.xlu1 %v2037_v6, %s3844_s5  ;;  %v2211_v6 = vld [vmem:[%s5194_s11 + $0x8] sm:$0xff] }
0x1cc4   :  { %v2039_v13 = vpop.permute.xlu1 %2038 }
0x1cc5   :  { %v2041_v17 = vmul.f32 %v2039_v13, %v1933_v7 }
0x1cc7   :  { %v4753_v18 = vadd.f32 %v2043_v16, %v2041_v17 }
0x1cc9   :  { %3353 = vmatmul.mubr.msk.f32.vlgmr.msra.gmra.mxu1 %vm206_vm1, %v4753_v18  ;;  %v2153_v19 = vrot.slane %v4753_v18, 2  ;;  %v2045_v21 = vmul.f32 %v4753_v18, %v1933_v7  ;;  %v2210_v7 = vld [vmem:[%s5194_s11] sm:$0xff] }
0x1ccb   :  { %2154 = vrot.lane.b32.xlu1 %v2153_v19, %s3844_s5  ;;  %2046 = vst.msk [vmem:[#allocation3 + $0xe] sm:$0x1] %vm346_vm2, %v2045_v21 }
0x1ccc   :  { %2052 = vst.msk [vmem:[#allocation3 + $0x1d] sm:$0x2] %vm353_vm3, %v2045_v21 }
0x1ccf   :  { %1318 = vrot.lane.b32.xlu1 %v4581_v59, %s3845_s25 }
0x1cd3   :  { %1564 = vrot.lane.b32.xlu1 %v4645_v57, %s3845_s25 }
0x1cd7   :  { %1802 = vrot.lane.b32.xlu1 %v4708_v15, %s3845_s25 }
0x1cdb   :  { %2048 = vrot.lane.b32.xlu1 %v2045_v21, %s3845_s25 }
0x1cdf   :  { %349 = vrot.lane.b32.xlu1 %v4213_v30, %s3845_s25 }
0x1ce3   :  { %596 = vrot.lane.b32.xlu1 %v4303_v32, %s3845_s25 }
0x1ce7   :  { %834 = vrot.lane.b32.xlu1 %v4367_v60, %s3845_s25 }
0x1ceb   :  { %1080 = vrot.lane.b32.xlu1 %v4436_v34, %s3845_s25 }
0x1d3d   :  { %v2155_v59 = vpop.permute.xlu1 %2154 }
0x1d41   :  { %v1319_v55 = vpop.permute.xlu1 %1318 }
0x1d42   :  { %1321 = vst.msk [vmem:[#allocation4 + $0x7] sm:$0x1] %vm346_vm2, %v1319_v55 }
0x1d43   :  { %1323 = vst.msk [vmem:[#allocation4 + $0x16] sm:$0x2] %vm353_vm3, %v1319_v55 }
0x1d45   :  { %v1565_v57 = vpop.permute.xlu1 %1564 }
0x1d46   :  { %1567 = vst.msk [vmem:[#allocation4 + $0x5] sm:$0x1] %vm346_vm2, %v1565_v57 }
0x1d47   :  { %1569 = vst.msk [vmem:[#allocation4 + $0x14] sm:$0x2] %vm353_vm3, %v1565_v57 }
0x1d49   :  { %v1803_v30 = vpop.permute.xlu1 %1802 }
0x1d4a   :  { %1805 = vst.msk [vmem:[#allocation4 + $0x3] sm:$0x1] %vm346_vm2, %v1803_v30 }
0x1d4b   :  { %1807 = vst.msk [vmem:[#allocation4 + $0x12] sm:$0x2] %vm353_vm3, %v1803_v30 }
0x1d4d   :  { %v2049_v32 = vpop.permute.xlu1 %2048 }
0x1d4e   :  { %2051 = vst.msk [vmem:[#allocation4 + $0x1] sm:$0x1] %vm346_vm2, %v2049_v32 }
0x1d4f   :  { %2053 = vst.msk [vmem:[#allocation4 + $0x10] sm:$0x2] %vm353_vm3, %v2049_v32 }
0x1d51   :  { %v350_v60 = vpop.permute.xlu1 %349 }
0x1d52   :  { %352 = vst.msk [vmem:[#allocation4 + $0xf] sm:$0x1] %vm346_vm2, %v350_v60 }
0x1d53   :  { %355 = vst.msk [vmem:[#allocation4 + $0x1e] sm:$0x2] %vm353_vm3, %v350_v60  ;;  %v2179_v60 = vld [vmem:[#allocation3 + $0x10] sm:$0xff] }
0x1d55   :  { %v597_v34 = vpop.permute.xlu1 %596 }
0x1d56   :  { %599 = vst.msk [vmem:[#allocation4 + $0xd] sm:$0x1] %vm346_vm2, %v597_v34 }
0x1d57   :  { %601 = vst.msk [vmem:[#allocation4 + $0x1c] sm:$0x2] %vm353_vm3, %v597_v34 }
0x1d59   :  { %v835_v15 = vpop.permute.xlu1 %834 }
0x1d5a   :  { %837 = vst.msk [vmem:[#allocation4 + $0xb] sm:$0x1] %vm346_vm2, %v835_v15 }
0x1d5b   :  { %839 = vst.msk [vmem:[#allocation4 + $0x1a] sm:$0x2] %vm353_vm3, %v835_v15 }
0x1d5d   :  { %v1081_v61 = vpop.permute.xlu1 %1080 }
0x1d5e   :  { %1083 = vst.msk [vmem:[#allocation4 + $0x9] sm:$0x1] %vm346_vm2, %v1081_v61 }
0x1d5f   :  { %1085 = vst.msk [vmem:[#allocation4 + $0x18] sm:$0x2] %vm353_vm3, %v1081_v61 }
0x1d89   :  { %v2126_v63 = vpop.f32.mrf.mxu1 }
0x1d8a   :  { %v2127_v0 = vadd.f32 %v2126_v63, %v4194_v53 }
0x1d8b   :  { %v2128_v23 = vpop.f32.mrf.mxu1 }
0x1d8c   :  { %v2132_v9 = vrot.slane %v2127_v0, 2  ;;  %v2129_v25 = vadd.f32 %v2128_v23, %v4200_v62  ;;  %v2056_v62 = vld [vmem:[%s5217_s30 + $0x1e] sm:$0x3]  ;;  %s3281_s30 = sshll.u32 %s3849_s21, 4  ;;  %s3282_s30 = int_to_ptr.vmem [resolvable:$true] %s3281_s30 }
0x1d8d   :  { %s3757_s1 = scalar_lea.vmem %s3282_s30, 32  ;;  %p3762_p1 = scmp.lt.s32.totalorder %s3282_s30, %s3282_s30 }
0x1d8e   :  { %v2134_v20 = vadd.f32 %v2132_v9, %v2054_v1  ;;  %v2142_v29 = vrot.slane %v2129_v25, 2  ;;  %v2206_v9 = vld [vmem:[%s5189_s6] sm:$0xff]  ;;  %v2423_v1 = vld [vmem:[%s5195_s12 + $0x38] sm:$0xff]  ;;  %p3758_p0 = scmp.ne.s32.totalorder %s3282_s30, %s3757_s1  ;;  %p3763_p2 = scmp.lt.s32.totalorder %s3757_s1, %s3757_s1 }
0x1d8f   :  { %3493 = vmatprep.mubr.msk.f32.mxu1 %vm2201_vm4, %v2206_v9 }
0x1d90   :  { %v3354_v22 = vmul.f32 -1.442695, %v2134_v20  ;;  %v2422_v20 = vld [vmem:[%s5195_s12 + $0x30] sm:$0xff]  ;;  %p3764_p3 = por %p3763_p2, %p3762_p1 }
0x1d92   :  { %3731 = vpow2.f32 %v3354_v22  ;;  %v2421_v22 = vld [vmem:[%s5195_s12 + $0x28] sm:$0xff]  ;;  %p3765_p4 = pnand %p3764_p3, %p3758_p0 }
0x1d9f   :  { %v3732_v24 = vpop.eup %3731 }
0x1da0   :  { %v2138_v26 = vadd.f32 1.0, %v3732_v24  ;;  %v2420_v24 = vld [vmem:[%s5195_s12 + $0x20] sm:$0xff] }
0x1da2   :  { %3733 = vrcp.f32 %v2138_v26  ;;  %v2419_v26 = vld [vmem:[%s5195_s12 + $0x18] sm:$0xff] }
0x1daf   :  { %v3734_v48 = vpop.eup %3733 }
0x1db0   :  { %v2144_v47 = vmul.f32 %v3734_v48, %v2142_v29  ;;  %v2147_v53 = vsub.f32 1.0, %v3734_v48  ;;  %v2157_v37 = vmul.f32 %v3734_v48, %v2155_v59  ;;  %v2177_v59 = vld [vmem:[#allocation3] sm:$0xff] }
0x1db2   :  { %v2145_v33 = vadd.f32 %v2144_v47, %v2055_v31  ;;  %v2207_v47 = vld [vmem:[%s5189_s6 + $0x8] sm:$0xff]  ;;  %v2208_v31 = vld [vmem:[%s5189_s6 + $0x10] sm:$0xff] }
0x1db4   :  { %3735 = vtanh.f32 %v2145_v33  ;;  %v2209_v33 = vld [vmem:[%s5189_s6 + $0x18] sm:$0xff] }
0x1dc1   :  { %v3736_v28 = vpop.eup %3735 }
0x1dc2   :  { %2149 = vrot.lane.b32.xlu0 %v3736_v28, %s3844_s5  ;;  %v2418_v28 = vld [vmem:[%s5195_s12 + $0x10] sm:$0xff] }
0x1e34   :  { %v2150_v35 = vpop.permute.xlu0 %2149 }
0x1e35   :  { %v2152_v51 = vmul.f32 %v2150_v35, %v2147_v53  ;;  %v2417_v53 = vld [vmem:[%s5195_s12 + $0x8] sm:$0xff]  ;;  %v2416_v35 = vld [vmem:[%s5195_s12] sm:$0xff] }
0x1e37   :  { %v2158_v52 = vadd.f32 %v2157_v37, %v2152_v51 }
0x1e39   :  { %v2160_v10 = vrot.slane %v2158_v52, 6 }
0x1e3b   :  { %2161 = vrot.lane.b32.xlu0 %v2160_v10, %s3844_s5 }
0x1e3f   :  { %1441 = vrot.lane.b32.xlu0 %v4613_v58, %s3845_s25  ;;  %v2165_v58 = vsub.f32 1.0, %v2056_v62 }
0x1e43   :  { %1687 = vrot.lane.b32.xlu0 %v4678_v56, %s3845_s25  ;;  %v2166_v56 = vmul.f32 %v2165_v58, %v4753_v18 }
0x1e47   :  { %1925 = vrot.lane.b32.xlu0 %v4739_v27, %s3845_s25 }
0x1e4b   :  { %473 = vrot.lane.b32.xlu0 %v4270_v50, %s3845_s25 }
0x1e4f   :  { %719 = vrot.lane.b32.xlu0 %v4336_v8, %s3845_s25 }
0x1e53   :  { %957 = vrot.lane.b32.xlu0 %v4399_v54, %s3845_s25  ;;  %v2217_v54 = vld [vmem:[%s5194_s11 + $0x38] sm:$0xff] }
0x1e54   :  { %3463 = vmatprep.subr.mxu0 %v2217_v54 }
0x1e55   :  { %3464 = vmatpush3.msra.mxu0 %v2217_v54 }
0x1e56   :  { %3465 = vmatprep.subr.mxu0 %v2216_v38 }
0x1e57   :  { %3466 = vmatpush3.msra.mxu0 %v2216_v38 }
0x1e58   :  { %3467 = vmatprep.subr.mxu0 %v2215_v40 }
0x1e59   :  { %3468 = vmatpush3.msra.mxu0 %v2215_v40 }
0x1e5a   :  { %3469 = vmatprep.subr.mxu0 %v2214_v41 }
0x1e5b   :  { %3470 = vmatpush3.msra.mxu0 %v2214_v41 }
0x1ead   :  { %v2162_v12 = vpop.permute.xlu0 %2161 }
0x1eae   :  { %v2164_v14 = vmul.f32 %v2162_v12, %v2056_v62 }
0x1eb0   :  { %v4813_v36 = vadd.f32 %v2166_v56, %v2164_v14 }
0x1eb1   :  { %v1442_v27 = vpop.permute.xlu0 %1441 }
0x1eb2   :  { %1444 = vst.msk [vmem:[#allocation4 + $0x6] sm:$0x1] %vm346_vm2, %v1442_v27  ;;  %v2168_v50 = vmul.f32 %v4813_v36, %v2056_v62 }
0x1eb3   :  { %1446 = vst.msk [vmem:[#allocation4 + $0x15] sm:$0x2] %vm353_vm3, %v1442_v27 }
0x1eb4   :  { %2169 = vst.msk [vmem:[#allocation3 + $0xf] sm:$0x1] %vm346_vm2, %v2168_v50  ;;  %2171 = vrot.lane.b32.xlu0 %v2168_v50, %s3845_s25 }
0x1eb5   :  { %2175 = vst.msk [vmem:[#allocation3 + $0x1e] sm:$0x2] %vm353_vm3, %v2168_v50  ;;  %v1688_v8 = vpop.permute.xlu0 %1687 }
0x1eb6   :  { %1690 = vst.msk [vmem:[#allocation4 + $0x4] sm:$0x1] %vm346_vm2, %v1688_v8 }
0x1eb7   :  { %1692 = vst.msk [vmem:[#allocation4 + $0x13] sm:$0x2] %vm353_vm3, %v1688_v8 }
0x1eb8   :  { %1203 = vrot.lane.b32.xlu0 %v4510_v2, %s3845_s25  ;;  %v2213_v2 = vld [vmem:[%s5194_s11 + $0x18] sm:$0xff] }
0x1eb9   :  { %v1926_v39 = vpop.permute.xlu0 %1925  ;;  %3471 = vmatprep.subr.mxu0 %v2213_v2 }
0x1eba   :  { %1928 = vst.msk [vmem:[#allocation4 + $0x2] sm:$0x1] %vm346_vm2, %v1926_v39  ;;  %3472 = vmatpush3.msra.mxu0 %v2213_v2 }
0x1ebb   :  { %1930 = vst.msk [vmem:[#allocation4 + $0x11] sm:$0x2] %vm353_vm3, %v1926_v39  ;;  %3473 = vmatprep.subr.mxu0 %v2212_v49  ;;  %v2178_v57 = vld [vmem:[#allocation3 + $0x8] sm:$0xff] }
0x1ebc   :  { %3474 = vmatpush3.msra.mxu0 %v2212_v49  ;;  %v2180_v61 = vld [vmem:[#allocation3 + $0x18] sm:$0xff] }
0x1ebd   :  { %v474_v45 = vpop.permute.xlu0 %473  ;;  %3475 = vmatprep.subr.mxu0 %v2211_v6 }
0x1ebe   :  { %476 = vst.msk [vmem:[#allocation4 + $0xe] sm:$0x1] %vm346_vm2, %v474_v45  ;;  %3476 = vmatpush3.msra.mxu0 %v2211_v6 }
0x1ebf   :  { %478 = vst.msk [vmem:[#allocation4 + $0x1d] sm:$0x2] %vm353_vm3, %v474_v45  ;;  %3477 = vmatprep.subr.mxu0 %v2210_v7 }
0x1ec0   :  { %3478 = vmatpush3.msra.mxu0 %v2210_v7 }
0x1ec1   :  { %v720_v3 = vpop.permute.xlu0 %719  ;;  %3499 = vmatprep.subr.mxu0 %v2423_v1 }
0x1ec2   :  { %722 = vst.msk [vmem:[#allocation4 + $0xc] sm:$0x1] %vm346_vm2, %v720_v3 }
0x1ec3   :  { %724 = vst.msk [vmem:[#allocation4 + $0x1b] sm:$0x2] %vm353_vm3, %v720_v3 }
0x1ec5   :  { %v958_v5 = vpop.permute.xlu0 %957 }
0x1ec6   :  { %960 = vst.msk [vmem:[#allocation4 + $0xa] sm:$0x1] %vm346_vm2, %v958_v5 }
0x1ec7   :  { %962 = vst.msk [vmem:[#allocation4 + $0x19] sm:$0x2] %vm353_vm3, %v958_v5 }
0x1f26   :  { %v2172_v11 = vpop.permute.xlu0 %2171 }
0x1f27   :  { %2174 = vst.msk [vmem:[#allocation4] sm:$0x1] %vm346_vm2, %v2172_v11 }
0x1f28   :  { %2176 = vst.msk [vmem:[#allocation4 + $0xf] sm:$0x2] %vm353_vm3, %v2172_v11  ;;  %v2614_v11 = vld [vmem:[%s5190_s7] sm:$0x3]  ;;  %s3850_s7 = smov [#allocation5]  }
0x1f2a   :  { %v1204_v13 = vpop.permute.xlu0 %1203 }
0x1f2b   :  { %1206 = vst.msk [vmem:[#allocation4 + $0x8] sm:$0x1] %vm346_vm2, %v1204_v13 }
0x1f2c   :  { %1208 = vst.msk [vmem:[#allocation4 + $0x17] sm:$0x2] %vm353_vm3, %v1204_v13  ;;  %v2688_v13 = vld [vmem:[%s5191_s8] sm:$0x3]  ;;  %s3268_s8 = sshll.u32 %s3850_s7, 4  ;;  %s3269_s8 = int_to_ptr.vmem [resolvable:$true] %s3268_s8 }
0x1f2e   :  { %v2181_v16 = vld [vmem:[#allocation4] sm:$0xff] }
0x1f2f   :  { %2189 = vrot.lane.b32.xlu1 %v2181_v16, %s3846_s22  ;;  %v2183_v17 = vld [vmem:[#allocation4 + $0x10] sm:$0xff]  ;;  %v2771_v16 = vld [vmem:[%s5196_s13 + $0x38] sm:$0xff] }
0x1f32   :  { %v2182_v18 = vld [vmem:[#allocation4 + $0x8] sm:$0xff] }
0x1f33   :  { %2193 = vrot.lane.b32.xlu1 %v2183_v17, %s3846_s22  ;;  %2191 = vrot.lane.b32.xlu0 %v2182_v18, %s3846_s22  ;;  %v2184_v19 = vld [vmem:[#allocation4 + $0x18] sm:$0xff]  ;;  %v2770_v17 = vld [vmem:[%s5196_s13 + $0x30] sm:$0xff]  ;;  %v2769_v18 = vld [vmem:[%s5196_s13 + $0x28] sm:$0xff] }
0x1f37   :  { %2195 = vrot.lane.b32.xlu0 %v2184_v19, %s3846_s22  ;;  %v2768_v19 = vld [vmem:[%s5196_s13 + $0x20] sm:$0xff] }
0x1fa1   :  { %v2190_v21 = vpop.permute.xlu1 %2189 }
0x1fa2   :  { %v4862_v55 = vsel %vm2201_vm4, %v2177_v59, %v2190_v21  ;;  %v2767_v21 = vld [vmem:[%s5196_s13 + $0x18] sm:$0xff]  ;;  %v2766_v59 = vld [vmem:[%s5196_s13 + $0x10] sm:$0xff] }
0x1fa3   :  { %3479 = vmatprep.mubr.msk.f32.mxu0 %vm206_vm1, %v4862_v55 }
0x1fa5   :  { %v2192_v30 = vpop.permute.xlu0 %2191  ;;  %v2194_v32 = vpop.permute.xlu1 %2193 }
0x1fa6   :  { %v4867_v34 = vsel %vm2201_vm4, %v2178_v57, %v2192_v30  ;;  %v4870_v15 = vsel %vm2201_vm4, %v2179_v60, %v2194_v32  ;;  %v2764_v57 = vld [vmem:[%s5196_s13] sm:$0xff] }
0x1fa7   :  { %3480 = vmatmul.mubr.msk.f32.vlgmr.msra.gmra.mxu0 %vm206_vm1, %v4867_v34 }
0x1fa8   :  { %3482 = vmatprep.mubr.msk.f32.mxu0 %vm206_vm1, %v4870_v15  ;;  %3500 = vmatpush3.msra.mxu0 %v2423_v1  ;;  %v2994_v1 = vld [vmem:[%s5198_s15 + $0x28] sm:$0xff] }
0x1fa9   :  { %v2196_v63 = vpop.permute.xlu0 %2195  ;;  %3501 = vmatprep.subr.mxu0 %v2422_v20 }
0x1faa   :  { %v4877_v0 = vsel %vm2201_vm4, %v2180_v61, %v2196_v63  ;;  %3502 = vmatpush3.msra.mxu0 %v2422_v20  ;;  %v2993_v20 = vld [vmem:[%s5198_s15 + $0x20] sm:$0xff] }
0x1fab   :  { %3483 = vmatmul.mubr.msk.f32.gmra.mxu0 %vm206_vm1, %v4877_v0  ;;  %3503 = vmatprep.subr.mxu0 %v2421_v22 }
0x1fac   :  { %3504 = vmatpush3.msra.mxu0 %v2421_v22  ;;  %v2992_v22 = vld [vmem:[%s5198_s15 + $0x18] sm:$0xff] }
0x1fad   :  { %3505 = vmatprep.subr.mxu0 %v2420_v24 }
0x1fae   :  { %3506 = vmatpush3.msra.mxu0 %v2420_v24  ;;  %v2991_v24 = vld [vmem:[%s5198_s15 + $0x10] sm:$0xff] }
0x1faf   :  { %3507 = vmatprep.subr.mxu0 %v2419_v26 }
0x1fb0   :  { %3508 = vmatpush3.msra.mxu0 %v2419_v26  ;;  %v2990_v26 = vld [vmem:[%s5198_s15 + $0x8] sm:$0xff] }
0x1fb1   :  { %3509 = vmatprep.subr.mxu0 %v2418_v28 }
0x1fb2   :  { %3510 = vmatpush3.msra.mxu0 %v2418_v28 }
0x1fb3   :  { %3511 = vmatprep.subr.mxu0 %v2417_v53 }
0x1fb4   :  { %3512 = vmatpush3.msra.mxu0 %v2417_v53 }
0x1fb5   :  { %3513 = vmatprep.subr.mxu0 %v2416_v35 }
0x1fb6   :  { %3514 = vmatpush3.msra.mxu0 %v2416_v35 }
0x1fb7   :  { %3546 = vmatprep.subr.mxu0 %v3843_v4 }
0x2067   :  { %v3481_v23 = vpop.f32.mrf.mxu0 }
0x2069   :  { %v2296_v25 = vpop.f32.mrf.mxu0 }
0x206b   :  { %v3484_v29 = vpop.f32.mrf.mxu0 }
0x206c   :  { %3485 = vmatprep.subr.mxu1 %v3484_v29 }
0x206d   :  { %v2306_v48 = vpop.f32.mrf.mxu0  ;;  %3486 = vmatpush3.msra.mxu1 %v3484_v29 }
0x206e   :  { %3487 = vmatprep.subr.mxu1 %v2306_v48 }
0x206f   :  { %3488 = vmatpush3.msra.mxu1 %v2306_v48 }
0x2070   :  { %3489 = vmatprep.subr.mxu1 %v3481_v23 }
0x2071   :  { %3490 = vmatpush3.msra.mxu1 %v3481_v23  ;;  %v2989_v23 = vld [vmem:[%s5198_s15] sm:$0xff] }
0x2072   :  { %3491 = vmatprep.subr.mxu1 %v2296_v25 }
0x2073   :  { %3492 = vmatpush3.msra.mxu1 %v2296_v25  ;;  %v3848_v25 = vmov 1966171168  }
0x2074   :  { %3494 = vmatmul.mubr.msk.f32.vlgmr.msra.gmra.mxu1 %vm2201_vm4, %v2207_v47  ;;  %v2854_v29 = vunpack.c.l.s4 %v3848_v25  ;;  %v3002_v25 = vld [vmem:[%s5198_s15 + $0x68] sm:$0xff] }
0x2075   :  { %3496 = vmatprep.mubr.msk.f32.mxu1 %vm2201_vm4, %v2208_v31 }
0x2076   :  { %v2855_v48 = vunpack.c.0.s8 %v2854_v29 }
0x2078   :  { %3497 = vmatmul.mubr.msk.f32.gmra.mxu1 %vm2201_vm4, %v2209_v33 }
0x2079   :  { %3529 = vmatprep.mubr.msk.f32.mxu1 %vm2201_vm4, %v2206_v9  ;;  %v2995_v9 = vld [vmem:[%s5198_s15 + $0x30] sm:$0xff] }
0x2134   :  { %v3495_v37 = vpop.f32.mrf.mxu1 }
0x2135   :  { %v2413_v10 = vmax.f32 %v3495_v37, 0.0 }
0x2136   :  { %v2393_v51 = vpop.f32.mrf.mxu1 }
0x2137   :  { %v2412_v52 = vmax.f32 %v2393_v51, 0.0 }
0x2138   :  { %v3498_v62 = vpop.f32.mrf.mxu1 }
0x2139   :  { %3515 = vmatprep.mubr.msk.f32.mxu0 %vm206_vm1, %v2412_v52  ;;  %v2415_v56 = vmax.f32 %v3498_v62, 0.0 }
0x213a   :  { %v2403_v58 = vpop.f32.mrf.mxu1  ;;  %3516 = vmatmul.mubr.msk.f32.vlgmr.msra.gmra.mxu0 %vm206_vm1, %v2413_v10 }
0x213b   :  { %v2414_v12 = vmax.f32 %v2403_v58, 0.0 }
0x213d   :  { %3518 = vmatprep.mubr.msk.f32.mxu0 %vm206_vm1, %v2414_v12 }
0x213e   :  { %3519 = vmatmul.mubr.msk.f32.gmra.mxu0 %vm206_vm1, %v2415_v56 }
0x213f   :  { %3554 = vmatprep.mubr.msk.f32.mxu0 %vm3847_vm5, %v3843_v4 }
0x21fa   :  { %v3517_v14 = vpop.f32.mrf.mxu0 }
0x21fc   :  { %v2502_v27 = vpop.f32.mrf.mxu0 }
0x21fe   :  { %v3520_v50 = vpop.f32.mrf.mxu0 }
0x21ff   :  { %3521 = vmatprep.subr.mxu1 %v3520_v50 }
0x2200   :  { %v2512_v8 = vpop.f32.mrf.mxu0  ;;  %3522 = vmatpush3.msra.mxu1 %v3520_v50 }
0x2201   :  { %3523 = vmatprep.subr.mxu1 %v2512_v8 }
0x2202   :  { %3524 = vmatpush3.msra.mxu1 %v2512_v8 }
0x2203   :  { %3525 = vmatprep.subr.mxu1 %v3517_v14 }
0x2204   :  { %3526 = vmatpush3.msra.mxu1 %v3517_v14 }
0x2205   :  { %3527 = vmatprep.subr.mxu1 %v2502_v27 }
0x2206   :  { %3528 = vmatpush3.msra.mxu1 %v2502_v27 }
0x2207   :  { %3530 = vmatmul.mubr.msk.f32.vlgmr.msra.gmra.mxu1 %vm2201_vm4, %v2207_v47  ;;  %3535 = vmatprep.subr.mxu1 %v3843_v4  ;;  %v3373_v47 = vld [vmem:[%s5197_s14] ss:$0 sm:$0xff] }
0x2208   :  { %3532 = vmatprep.mubr.msk.f32.mxu1 %vm2201_vm4, %v2208_v31  ;;  %v2858_v31 = vsub.s32 %v2855_v48, %v4172_v43  ;;  %v3001_v48 = vld [vmem:[%s5198_s15 + $0x60] sm:$0xff] }
0x220b   :  { %3533 = vmatmul.mubr.msk.f32.gmra.mxu1 %vm2201_vm4, %v2209_v33 }
0x220c   :  { %3543 = vmatprep.mubr.msk.f32.mxu1 %vm3847_vm5, %v3843_v4 }
0x22c7   :  { %v3531_v54 = vpop.f32.mrf.mxu1 }
0x22c8   :  { %v2607_v38 = vmax.f32 %v3531_v54, 0.0 }
0x22c9   :  { %v2587_v39 = vpop.f32.mrf.mxu1 }
0x22ca   :  { %v4936_v40 = vadd.f32 %v2607_v38, %v4867_v34  ;;  %v2606_v41 = vmax.f32 %v2587_v39, 0.0  ;;  %v2908_v38 = vand.u32 127, %v93_v42 }
0x22cb   :  { %v3534_v45 = vpop.f32.mrf.mxu1 }
0x22cc   :  { %3243 = vst.msk [vmem:[#allocation5 + $0x8] sm:$0xff] %vm206_vm1, %v4936_v40  ;;  %v4941_v2 = vadd.f32 %v2606_v41, %v4862_v55  ;;  %v2609_v49 = vmax.f32 %v3534_v45, 0.0  ;;  %v2765_v55 = vld [vmem:[%s5196_s13 + $0x8] sm:$0xff]  ;;  %v2913_v39 = vadd.s32 4294967288, %v2908_v38  ;;  %v2911_v45 = vsub.s32 %v2908_v38, %v4172_v43 }
0x22cd   :  { %v2597_v3 = vpop.f32.mrf.mxu1 }
0x22ce   :  { %3242 = vst.msk [vmem:[#allocation5] sm:$0xff] %vm206_vm1, %v4941_v2  ;;  %v4946_v5 = vadd.f32 %v2609_v49, %v4877_v0  ;;  %v2608_v6 = vmax.f32 %v2597_v3, 0.0  ;;  %v2996_v0 = vld [vmem:[%s5198_s15 + $0x38] sm:$0xff]  ;;  %v2916_v41 = vsub.s32 %v2913_v39, %v4172_v43 }
0x22d0   :  { %3245 = vst.msk [vmem:[#allocation5 + $0x18] sm:$0xff] %vm206_vm1, %v4946_v5  ;;  %v4951_v7 = vadd.f32 %v2608_v6, %v4870_v15  ;;  %3536 = vmatpush3.msra.mxu1 %v4946_v5  ;;  %3547 = vmatpush3.msra.mxu0 %v4946_v5 }
0x22d1   :  { %3537 = vmatprep.subr.mxu1 %v3843_v4  ;;  %3548 = vmatprep.subr.mxu0 %v3843_v4 }
0x22d2   :  { %3244 = vst.msk [vmem:[#allocation5 + $0x10] sm:$0xff] %vm206_vm1, %v4951_v7  ;;  %3538 = vmatpush3.msra.mxu1 %v4951_v7  ;;  %3549 = vmatpush3.msra.mxu0 %v4951_v7 }
0x22d3   :  { %3539 = vmatprep.subr.mxu1 %v3843_v4  ;;  %3550 = vmatprep.subr.mxu0 %v3843_v4 }
0x22d4   :  { %3540 = vmatpush3.msra.mxu1 %v4936_v40  ;;  %3551 = vmatpush3.msra.mxu0 %v4936_v40 }
0x22d5   :  { %3541 = vmatprep.subr.mxu1 %v3843_v4  ;;  %3552 = vmatprep.subr.mxu0 %v3843_v4 }
0x22d6   :  { %3542 = vmatpush3.msra.mxu1 %v4941_v2  ;;  %3553 = vmatpush3.msra.mxu0 %v4941_v2 }
0x22d7   :  { %3544 = vmatmul.mubr.msk.f32.vlgmr.msra.gmra.mxu1 %vm2201_vm4, %v2614_v11  ;;  %3555 = vmatmul.mubr.msk.f32.vlgmr.msra.gmra.mxu0 %vm2201_vm4, %v2688_v13  ;;  %v2901_v13 = vld [vmem:[%s5192_s9] sm:$0x3] }
0x22d8   :  { %3557 = vmatprep.subr.mxu1 %v3843_v4  ;;  %3573 = vmatprep.mubr.msk.f32.mxu1 %vm3847_vm5, %v3843_v4  ;;  %vm2902_vm8 = vcmp.gt.f32.partialorder %v2901_v13, 0.0  ;;  %v3157_v13 = vld [vmem:[%s5198_s15 + $0xa0] sm:$0xff] }
0x22d9   :  { %3558 = vmatpush3.msra.mxu1 %v2771_v16  ;;  %3576 = vmatprep.subr.mxu0 %v3843_v4 }
0x22da   :  { %3559 = vmatprep.subr.mxu1 %v3843_v4  ;;  %3592 = vmatprep.mubr.msk.f32.mxu0 %vm3847_vm5, %v3843_v4 }
0x22db   :  { %3560 = vmatpush3.msra.mxu1 %v2770_v17 }
0x22dc   :  { %3561 = vmatprep.subr.mxu1 %v3843_v4 }
0x22dd   :  { %3562 = vmatpush3.msra.mxu1 %v2769_v18 }
0x22de   :  { %3563 = vmatprep.subr.mxu1 %v3843_v4 }
0x22df   :  { %3564 = vmatpush3.msra.mxu1 %v2768_v19 }
0x22e0   :  { %3565 = vmatprep.subr.mxu1 %v3843_v4 }
0x22e1   :  { %3566 = vmatpush3.msra.mxu1 %v2767_v21 }
0x22e2   :  { %3567 = vmatprep.subr.mxu1 %v3843_v4 }
0x22e3   :  { %3568 = vmatpush3.msra.mxu1 %v2766_v59 }
0x22e4   :  { %3569 = vmatprep.subr.mxu1 %v3843_v4 }
0x22e5   :  { %3570 = vmatpush3.msra.mxu1 %v2765_v55 }
0x22e6   :  { %3571 = vmatprep.subr.mxu1 %v3843_v4 }
0x22e7   :  { %3572 = vmatpush3.msra.mxu1 %v2764_v57 }
0x22e8   :  { %3595 = vmatprep.subr.mxu1 %v3843_v4 }
0x2397   :  { %v5015_v30 = vpop.f32.mrf.mxu1  ;;  %v5017_v32 = vpop.f32.mrf.mxu0 }
0x2398   :  { %v5021_v60 = vadd.f32 %v5017_v32, %v5015_v30  ;;  %v3256_v34 = vsub.f32 %v5015_v30, %v5017_v32 }
0x2399   :  { %v3545_v15 = vpop.f32.mrf.mxu1  ;;  %v3556_v61 = vpop.f32.mrf.mxu0 }
0x239a   :  { %v2763_v63 = vmul.f32 0.5, %v5021_v60 }
0x239c   :  { %3574 = vmatmul.mubr.msk.f32.vlgmr.msra.gmra.mxu1 %vm206_vm1, %v2763_v63 }
0x239d   :  { %3596 = vmatpush3.msra.mxu1 %v2996_v0  ;;  %3611 = vmatprep.mubr.msk.f32.mxu1 %vm3847_vm5, %v3843_v4 }
0x239e   :  { %3597 = vmatprep.subr.mxu1 %v3843_v4 }
0x239f   :  { %3598 = vmatpush3.msra.mxu1 %v2995_v9 }
0x23a0   :  { %3599 = vmatprep.subr.mxu1 %v3843_v4 }
0x23a1   :  { %3600 = vmatpush3.msra.mxu1 %v2994_v1 }
0x23a2   :  { %3601 = vmatprep.subr.mxu1 %v3843_v4 }
0x23a3   :  { %3602 = vmatpush3.msra.mxu1 %v2993_v20 }
0x23a4   :  { %3603 = vmatprep.subr.mxu1 %v3843_v4 }
0x23a5   :  { %3604 = vmatpush3.msra.mxu1 %v2992_v22  ;;  %v3004_v22 = vld [vmem:[%s5198_s15 + $0x78] sm:$0xff] }
0x23a6   :  { %3605 = vmatprep.subr.mxu1 %v3843_v4  ;;  %3577 = vmatpush3.msra.mxu0 %v3004_v22 }
0x23a7   :  { %3606 = vmatpush3.msra.mxu1 %v2991_v24  ;;  %3578 = vmatprep.subr.mxu0 %v3843_v4 }
0x23a8   :  { %3607 = vmatprep.subr.mxu1 %v3843_v4 }
0x23a9   :  { %3608 = vmatpush3.msra.mxu1 %v2990_v26  ;;  %v3003_v26 = vld [vmem:[%s5198_s15 + $0x70] sm:$0xff] }
0x23aa   :  { %3609 = vmatprep.subr.mxu1 %v3843_v4  ;;  %3579 = vmatpush3.msra.mxu0 %v3003_v26 }
0x23ab   :  { %3610 = vmatpush3.msra.mxu1 %v2989_v23  ;;  %3580 = vmatprep.subr.mxu0 %v3843_v4 }
0x23ac   :  { %3581 = vmatpush3.msra.mxu0 %v3002_v25 }
0x23ad   :  { %3582 = vmatprep.subr.mxu0 %v3843_v4 }
0x23ae   :  { %3583 = vmatpush3.msra.mxu0 %v3001_v48 }
0x23af   :  { %3584 = vmatprep.subr.mxu0 %v3843_v4 }
0x245c   :  { %v2848_v33 = vpop.f32.mrf.mxu1 }
0x245d   :  { %v2849_v28 = vadd.f32 %v3373_v47, %v2848_v33  ;;  %v3000_v47 = vld [vmem:[%s5198_s15 + $0x58] sm:$0xff]  ;;  %v2998_v33 = vld [vmem:[%s5198_s15 + $0x48] sm:$0xff] }
0x245e   :  { %v3575_v53 = vpop.f32.mrf.mxu1  ;;  %3585 = vmatpush3.msra.mxu0 %v3000_v47 }
0x245f   :  { %v2859_v35 = vrot.slane %v2849_v28, %v2858_v31  ;;  %3612 = vmatmul.mubr.msk.f32.vlgmr.msra.gmra.mxu1 %vm206_vm1, %v2849_v28  ;;  %3586 = vmatprep.subr.mxu0 %v3843_v4 }
0x2461   :  { %v2860_v37 = vcombine.high %v2859_v35, %v2859_v35  ;;  %v2867_v51 = vrot.slane %v2859_v35, %v2858_v31 }
0x2463   :  { %v2878_v52 = vrot.slane %v2867_v51, %v4175_v44  ;;  %v2874_v10 = vrot.slane %v2860_v37, %v2858_v31 }
0x2465   :  { %v2886_v62 = vmul.f32 %v2878_v52, %v4936_v40  ;;  %v2885_v58 = vmul.f32 %v2878_v52, %v4941_v2  ;;  %v2882_v12 = vrot.slane %v2874_v10, %v4175_v44 }
0x2467   :  { %v2892_v56 = vsel %vm206_vm1, %v2886_v62, 0.0  ;;  %v2889_v14 = vsel %vm206_vm1, %v2885_v58, 0.0  ;;  %v2888_v27 = vmul.f32 %v2882_v12, %v4946_v5  ;;  %v2887_v50 = vmul.f32 %v2882_v12, %v4951_v7 }
0x2468   :  { %2893 = vadd.xlane.f32.xlu0 %v2892_v56  ;;  %2890 = vadd.xlane.f32.xlu1 %v2889_v14 }
0x2469   :  { %v2898_v8 = vsel %vm206_vm1, %v2888_v27, 0.0  ;;  %v2895_v54 = vsel %vm206_vm1, %v2887_v50, 0.0 }
0x246c   :  { %2899 = vadd.xlane.f32.xlu1 %v2898_v8  ;;  %2896 = vadd.xlane.f32.xlu0 %v2895_v54 }
0x24f1   :  { %v2894_v49 = vpop.xlane.xlu0 %2893  ;;  %v2891_v3 = vpop.xlane.xlu1 %2890 }
0x24f2   :  { %v2917_v6 = vrot.slane %v2894_v49, %v2916_v41  ;;  %v2912_v11 = vrot.slane %v2891_v3, %v2911_v45 }
0x24f4   :  { %v2919_v42 = vsel %vm2918_vm6, %v2917_v6, %v2912_v11 }
0x24f5   :  { %v2900_v16 = vpop.xlane.xlu1 %2899  ;;  %v2897_v17 = vpop.xlane.xlu0 %2896 }
0x24f6   :  { %v2927_v18 = vrot.slane %v2900_v16, %v2916_v41  ;;  %v2923_v19 = vrot.slane %v2897_v17, %v2911_v45  ;;  %v3156_v16 = vld [vmem:[%s5198_s15 + $0x98] sm:$0xff]  ;;  %v3155_v17 = vld [vmem:[%s5198_s15 + $0x90] sm:$0xff] }
0x24f8   :  { %v2928_v21 = vsel %vm2918_vm6, %v2927_v18, %v2923_v19  ;;  %v3154_v18 = vld [vmem:[%s5198_s15 + $0x88] sm:$0xff]  ;;  %v3153_v19 = vld [vmem:[%s5198_s15 + $0x80] sm:$0xff] }
0x24f9   :  { %v2930_v43 = vsel %vm2929_vm7, %v2928_v21, %v2919_v42  ;;  %v3152_v42 = vld [vmem:[%s5193_s10] sm:$0x3] }
0x24fa   :  { %v2932_v59 = vsel %vm2902_vm8, %v2930_v43, -1e+30 }
0x24fb   :  { %v2934_v55 = vsel %vm2933_vm9, %v2932_v59, -inf }
0x24fc   :  { %2935 = vmax.xlane.f32.xlu0 %v2934_v55 }
0x251f   :  { %v5082_v57 = vpop.f32.mrf.mxu1 }
0x2521   :  { %v3613_v15 = vpop.f32.mrf.mxu1 }
0x2585   :  { %v2936_v61 = vpop.xlane.xlu0 %2935 }
0x2586   :  { %v2937_v63 = vsub.f32 %v2932_v59, %v2936_v61 }
0x2588   :  { %v2938_v0 = vmul.f32 1.442695, %v2937_v63 }
0x258a   :  { %3737 = vpow2.f32 %v2938_v0 }
0x2597   :  { %v3738_v9 = vpop.eup %3737 }
0x2598   :  { %v2940_v1 = vsel %vm2933_vm9, %v3738_v9, 0.0 }
0x2599   :  { %2941 = vadd.xlane.f32.xlu1 %v2940_v1 }
0x2622   :  { %v2942_v20 = vpop.xlane.xlu1 %2941 }
0x2623   :  { %3739 = vrcp.f32 %v2942_v20 }
0x2630   :  { %v3740_v24 = vpop.eup %3739 }
0x2631   :  { %v2944_v23 = vmul.f32 %v3740_v24, %v3738_v9 }
0x2633   :  { %v2948_v29 = vrot.slane %v2944_v23, %v4175_v44  ;;  %v2959_v31 = vrot.slane %v2944_v23, %v4181_v46  ;;  %v2999_v44 = vld [vmem:[%s5198_s15 + $0x50] sm:$0xff]  ;;  %v2997_v46 = vld [vmem:[%s5198_s15 + $0x40] sm:$0xff] }
0x2634   :  { %3587 = vmatpush3.msra.mxu0 %v2999_v44 }
0x2635   :  { %2954 = vbcast.lane.b32.xlu1 %v2948_v29, 264  ;;  %2950 = vbcast.lane.b32.xlu0 %v2948_v29, 256 }
0x2636   :  { %3588 = vmatprep.subr.mxu0 %v3843_v4 }
0x2637   :  { %3589 = vmatpush3.msra.mxu0 %v2998_v33 }
0x2638   :  { %3590 = vmatprep.subr.mxu0 %v3843_v4 }
0x2639   :  { %2961 = vbcast.lane.b32.xlu1 %v2959_v31, 256  ;;  %2965 = vbcast.lane.b32.xlu0 %v2959_v31, 264 }
0x263a   :  { %3591 = vmatpush3.msra.mxu0 %v2997_v46 }
0x263b   :  { %3614 = vmatprep.subr.mxu0 %v3843_v4 }
0x263d   :  { %3247 = vrot.lane.b32.xlu1 %v4813_v36, %s3845_s25  ;;  %3258 = vrot.lane.b32.xlu0 %v3256_v34, %s3844_s5 }
0x26a7   :  { %v2955_v28 = vpop.permute.xlu1 %2954  ;;  %v2951_v53 = vpop.permute.xlu0 %2950 }
0x26a8   :  { %v2968_v35 = vmul.f32 %v2955_v28, %v4936_v40  ;;  %v2967_v37 = vmul.f32 %v2951_v53, %v4941_v2 }
0x26aa   :  { %v2972_v51 = vsel %vm206_vm1, %v2968_v35, 0.0  ;;  %v2971_v30 = vsel %vm206_vm1, %v2967_v37, 0.0 }
0x26ab   :  { %v2973_v32 = vadd.f32 %v2972_v51, %v2971_v30  ;;  %v2962_v34 = vpop.permute.xlu1 %2961  ;;  %v2966_v52 = vpop.permute.xlu0 %2965 }
0x26ac   :  { %v2969_v10 = vmul.f32 %v2962_v34, %v4951_v7  ;;  %v2970_v62 = vmul.f32 %v2966_v52, %v4946_v5 }
0x26ad   :  { %v2974_v58 = vrot.slane %v2973_v32, 4 }
0x26ae   :  { %v2980_v12 = vsel %vm206_vm1, %v2969_v10, 0.0  ;;  %v2981_v56 = vsel %vm206_vm1, %v2970_v62, 0.0 }
0x26af   :  { %v2975_v14 = vadd.f32 %v2974_v58, %v2973_v32  ;;  %v2982_v40 = vadd.f32 %v2981_v56, %v2980_v12  ;;  %v3248_v27 = vpop.permute.xlu1 %3247  ;;  %v3259_v2 = vpop.permute.xlu0 %3258 }
0x26b0   :  { %v3250_v50 = vadd.f32 %v3248_v27, %v4813_v36  ;;  %v3261_v8 = vsel %vm206_vm1, %v5021_v60, %v3259_v2  ;;  %v3158_v36 = vld [vmem:[%s5198_s15 + $0xa8] sm:$0xff] }
0x26b1   :  { %v2976_v54 = vrot.slane %v2975_v14, 2  ;;  %v2983_v38 = vrot.slane %v2982_v40, 4  ;;  %3262 = vst [vmem:[#allocation10] sm:$0x3] %v3261_v8 }
0x26b2   :  { %v3251_v7 = vmul.f32 0.5, %v3250_v50 }
0x26b3   :  { %v2977_v5 = vadd.f32 %v2976_v54, %v2975_v14  ;;  %v2984_v39 = vadd.f32 %v2983_v38, %v2982_v40 }
0x26b4   :  { %3253 = vst.msk [vmem:[#allocation7] sm:$0x3] %vm3252_vm10, %v3251_v7 }
0x26b5   :  { %v2985_v41 = vrot.slane %v2984_v39, 2  ;;  %v2978_v45 = vrot.slane %v2977_v5, 1 }
0x26b7   :  { %v2986_v49 = vadd.f32 %v2985_v41, %v2984_v39  ;;  %v2979_v6 = vadd.f32 %v2978_v45, %v2977_v5 }
0x26b9   :  { %v2987_v3 = vrot.slane %v2986_v49, 1 }
0x26bb   :  { %v2988_v11 = vadd.f32 %v2987_v3, %v2986_v49 }
0x26bd   :  { %v3007_v60 = vsel %vm2929_vm7, %v2988_v11, %v2979_v6 }
0x26be   :  { %3593 = vmatmul.mubr.msk.f32.vlgmr.msra.gmra.mxu0 %vm206_vm1, %v3007_v60 }
0x26bf   :  { %3615 = vmatpush3.msra.mxu0 %v3158_v36  ;;  %3626 = vmatprep.mubr.msk.f32.mxu0 %vm3847_vm5, %v3843_v4 }
0x26c0   :  { %3616 = vmatprep.subr.mxu0 %v3843_v4 }
0x26c1   :  { %3617 = vmatpush3.msra.mxu0 %v3157_v13 }
0x26c2   :  { %3618 = vmatprep.subr.mxu0 %v3843_v4 }
0x26c3   :  { %3619 = vmatpush3.msra.mxu0 %v3156_v16 }
0x26c4   :  { %3620 = vmatprep.subr.mxu0 %v3843_v4 }
0x26c5   :  { %3621 = vmatpush3.msra.mxu0 %v3155_v17 }
0x26c6   :  { %3622 = vmatprep.subr.mxu0 %v3843_v4 }
0x26c7   :  { %3623 = vmatpush3.msra.mxu0 %v3154_v18 }
0x26c8   :  { %3624 = vmatprep.subr.mxu0 %v3843_v4 }
0x26c9   :  { %3625 = vmatpush3.msra.mxu0 %v3153_v19 }
0x26ca   :  { %3627 = vmatmul.mubr.msk.f32.vlgmr.msra.gmra.mxu0 %vm3159_vm11, %v3152_v42 }
0x26cb   :  { %3768 = shalt.err (!%p3765_p4)
}
0x26cc   :  { %3284 = dma.vmem_to_hbm [thread:$0]  %s3282_s30, 32, %s5201_s18, [#allocation8]  }
0x26cd   :  { %s3777_s10 = scalar_lea.vmem %s3269_s8, 512  ;;  %p3782_p6 = scmp.lt.s32.totalorder %s3269_s8, %s3269_s8 }
0x26ce   :  { %p3778_p5 = scmp.ne.s32.totalorder %s3269_s8, %s3777_s10  ;;  %p3783_p7 = scmp.lt.s32.totalorder %s3777_s10, %s3777_s10 }
0x26d0   :  { %p3784_p8 = por %p3783_p7, %p3782_p6 }
0x26d2   :  { %p3785_p9 = pnand %p3784_p8, %p3778_p5 }
0x26d4   :  { %3788 = shalt.err (!%p3785_p9)
}
0x26d5   :  { %s3851_s11 = smov 128   ;;  %s3852_s24 = smov 8  }
0x26d6   :  { %3274 = dma.vmem_to_hbm [thread:$0]  %s3269_s8, 512, %s5200_s17, [#allocation6], %s3851_s11, %s3851_s11, %s3852_s24  }
0x26d7   :  { %s3853_s5 = smov [#allocation10]  }
0x26d8   :  { %s3301_s25 = sshll.u32 %s3853_s5, 4  ;;  %s3302_s25 = int_to_ptr.vmem [resolvable:$true] %s3301_s25 }
0x26d9   :  { %s3797_s26 = scalar_lea.vmem %s3302_s25, 32  ;;  %p3802_p11 = scmp.lt.s32.totalorder %s3302_s25, %s3302_s25 }
0x26da   :  { %p3798_p10 = scmp.ne.s32.totalorder %s3302_s25, %s3797_s26  ;;  %p3803_p12 = scmp.lt.s32.totalorder %s3797_s26, %s3797_s26 }
0x26dc   :  { %p3804_p13 = por %p3803_p12, %p3802_p11 }
0x26de   :  { %p3805_p0 = pnand %p3804_p13, %p3798_p10 }
0x26e0   :  { %3808 = shalt.err (!%p3805_p0)
}
0x26e1   :  { %3304 = dma.vmem_to_hbm [thread:$0]  %s3302_s25, 32, %s5203_s20, [#allocation11]   ;;  %v3378_v55 = vld [vmem:[%s5199_s16] ss:$0 sm:$0xff] }
0x26e2   :  { %s3854_s28 = smov [#allocation9]  }
0x26e3   :  { %s3291_s14 = sshll.u32 %s3854_s28, 4  ;;  %s3292_s14 = int_to_ptr.vmem [resolvable:$true] %s3291_s14 }
0x26e4   :  { %s3817_s4 = scalar_lea.vmem %s3292_s14, 32  ;;  %p3822_p2 = scmp.lt.s32.totalorder %s3292_s14, %s3292_s14 }
0x26e5   :  { %p3818_p1 = scmp.ne.s32.totalorder %s3292_s14, %s3817_s4  ;;  %p3823_p3 = scmp.lt.s32.totalorder %s3817_s4, %s3817_s4 }
0x26e7   :  { %p3824_p4 = por %p3823_p3, %p3822_p2 }
0x26e9   :  { %p3825_p5 = pnand %p3824_p4, %p3818_p1 }
0x277e   :  { %v3076_v4 = vpop.f32.mrf.mxu0 }
0x277f   :  { %v3149_v43 = vadd.f32 %v5082_v57, %v3076_v4 }
0x2780   :  { %v3594_v21 = vpop.f32.mrf.mxu0 }
0x278a   :  { %v3229_v59 = vpop.f32.mrf.mxu0 }
0x278b   :  { %v3233_v15 = vadd.f32 %v3229_v59, %v3149_v43 }
0x278c   :  { %v3628_v61 = vpop.f32.mrf.mxu0 }
0x278d   :  { %v3241_v63 = vadd.f32 %v3378_v55, %v3233_v15 }
0x278f   :  { %v3254_v0 = vmax.f32 %v3241_v63, 0.0 }
0x2791   :  { %3255 = vst.msk [vmem:[#allocation9] sm:$0x3] %vm3252_vm10, %v3254_v0 }
0x2792   :  { %3828 = shalt.err (!%p3825_p5)
}
0x2793   :  { %3294 = dma.vmem_to_hbm [thread:$0]  %s3292_s14, 32, %s5202_s19, [#allocation8]  }
0x2794   :  { %3837 = dma.done.wait [#allocation6], 512  }
0x2795   :  { %3838 = vsyncadd [#allocation6], 4294966784 }
0x2796   :  { %3839 = dma.done.wait [#allocation8], 64  }
0x2797   :  { %3840 = vsyncadd [#allocation8], 4294967232 }
0x2798   :  { %3841 = dma.done.wait [#allocation11], 32  }
0x2799   :  { %3842 = vsyncadd [#allocation11], 4294967264 }
0x279a   :  { %3317 = vsyncpa [#allocation6], 1 }
0x279b   :  { %3318 = vsyncpa [#allocation8], 1 }
0x279c   :  { %3319 = vsyncpa [#allocation11], 1 }

</bundles_post_ra>
